<compile_context>
chip_gen: v7x
topology: tpu7x:2x2x1
jax: 0.10.0
libtpu: 0.0.40
codegen_flags: <defaults>
</compile_context>

<pallas_src>
import numpy as np
import jax
import jax.numpy as jnp
from jax.experimental import pallas as pl
from jax.experimental.pallas import tpu as pltpu

# ---------------- small, self-consistent configuration ----------------
B = 2          # batch
N = 16         # spatial length
CIN = 4        # input_channel
COUT = 8       # output_channel
H = 32         # hidden_size (FNO hidden_channels)
MODES = 8      # n_modes (kept Fourier modes, <= N//2 + 1)
L = 3          # num_layers (Fourier blocks)
LIFT = 2 * H   # lifting ChannelMLP hidden width
PROJ = 2 * H   # projection ChannelMLP hidden width
DOF = 4        # stored by FNOProjected but unused in forward
ND = 2         # stored by FNOProjected but unused in forward
P = 4 + L      # number of pointwise (1x1-conv) weight matrices / biases


# =========================== Pallas kernel ===========================
def fno1d_kernel(x_ref, dft_ref, wspec_ref, wpt_ref, bias_ref, o_ref):
    """Whole FNOProjected forward for one problem instance, all VMEM-resident."""
    bf16, f32 = jnp.bfloat16, jnp.float32

    def mm(a, b):
        # single-pass bf16 MXU matmul, f32 accumulation (no HIGHEST emulation)
        return jnp.dot(a.astype(bf16), b.astype(bf16), preferred_element_type=f32)

    # ---- hoisted constants: DFT/iDFT factor matrices + bias slab (used L times) ----
    fwd_cos = dft_ref[0][:MODES, :N]      # (M, N)   cos(2*pi*m*n/N)
    fwd_sin = dft_ref[1][:MODES, :N]      # (M, N)  -sin(2*pi*m*n/N)
    inv_cos = dft_ref[2][:N, :MODES]      # (N, M)   (c_m/N) cos
    inv_sin = dft_ref[3][:N, :MODES]      # (N, M)  -(c_m/N) sin
    bias_all = bias_ref[...]              # (P, 64)  f32

    def pointwise(h, k, rows, cols):
        # 1x1 conv over channels == (B*N, rows) @ (rows, cols) + bias
        w = wpt_ref[k][:rows, :cols]      # static slice of packed weight slab
        return mm(h, w) + bias_all[k:k + 1, :cols]

    x = x_ref[...]                                            # (B*N, CIN) f32

    # ---- lifting ChannelMLP: CIN -> LIFT -> H ----
    h = jax.nn.gelu(pointwise(x, 0, CIN, LIFT), approximate=True)
    h = pointwise(h, 1, LIFT, H)                              # (B*N, H)

    # ---- L Fourier blocks ----
    for l in range(L):
        w_re = wspec_ref[2 * l]                               # (M, H, H) bf16
        w_im = wspec_ref[2 * l + 1]                           # (M, H, H) bf16

        # truncated rFFT along the spatial axis, as DFT matmuls (per sample).
        xr_parts, xi_parts = [], []
        for b in range(B):
            hb = h[b * N:(b + 1) * N, :]                      # (N, H)
            xr_parts.append(mm(fwd_cos, hb))                  # (M, H)
            xi_parts.append(mm(fwd_sin, hb))                  # (M, H)
        xr = jnp.stack(xr_parts, axis=1)                      # (M, B, H)
        xi = jnp.stack(xi_parts, axis=1)                      # (M, B, H)

        # per-mode complex channel mixing, batched over modes on the MXU
        # (one batched einsum per term instead of MODES tiny matmuls).
        def cmix(xa, w):
            return jnp.einsum('mbi,mio->mbo', xa.astype(bf16), w,
                              preferred_element_type=f32)
        yr = cmix(xr, w_re) - cmix(xi, w_im)                  # (M, B, H)
        yi = cmix(xr, w_im) + cmix(xi, w_re)                  # (M, B, H)

        # truncated irFFT back to the spatial axis.
        spec_parts = [mm(inv_cos, yr[:, b, :]) + mm(inv_sin, yi[:, b, :])
                      for b in range(B)]                      # each (N, H)
        spec = jnp.concatenate(spec_parts, axis=0)            # (B*N, H)

        # spectral conv + pointwise linear skip (+ bias), GELU except last block
        h = spec + pointwise(h, 2 + l, H, H)
        if l < L - 1:
            h = jax.nn.gelu(h, approximate=True)

    # ---- projection ChannelMLP: H -> PROJ -> COUT ----
    h = jax.nn.gelu(pointwise(h, 2 + L, H, PROJ), approximate=True)
    o_ref[...] = pointwise(h, 3 + L, PROJ, COUT)              # (B*N, COUT)


def fno_projected_forward(x, dft, wspec, wpt, bias):
    """x: (B, N, CIN) channel-last, exactly what FNOProjected.forward receives."""
    out = pl.pallas_call(
        fno1d_kernel,
        out_shape=jax.ShapeDtypeStruct((B * N, COUT), jnp.float32),
        in_specs=[pl.BlockSpec(memory_space=pltpu.MemorySpace.VMEM)] * 5,
        out_specs=pl.BlockSpec(memory_space=pltpu.MemorySpace.VMEM),
    )(x.reshape(B * N, CIN), dft, wspec, wpt, bias)
    return out.reshape(B, N, COUT)                            # == y.transpose(1, 2)


# ---------------- pure-JAX reference (same math, no Pallas) ----------------
def reference_forward(x, dft, wspec, wpt, bias):
    bf16, f32 = jnp.bfloat16, jnp.float32

    def mm(a, b):
        return jnp.dot(a.astype(bf16), b.astype(bf16), preferred_element_type=f32)

    fwd_cos = dft[0, :MODES, :N]; fwd_sin = dft[1, :MODES, :N]
    inv_cos = dft[2, :N, :MODES]; inv_sin = dft[3, :N, :MODES]

    def pointwise(h, k, rows, cols):
        return mm(h, wpt[k, :rows, :cols]) + bias[k:k + 1, :cols]

    h = x.reshape(B * N, CIN)
    h = jax.nn.gelu(pointwise(h, 0, CIN, LIFT), approximate=True)
    h = pointwise(h, 1, LIFT, H)
    for l in range(L):
        w_re, w_im = wspec[2 * l], wspec[2 * l + 1]
        xr = jnp.stack([mm(fwd_cos, h[b * N:(b + 1) * N, :]) for b in range(B)], axis=1)
        xi = jnp.stack([mm(fwd_sin, h[b * N:(b + 1) * N, :]) for b in range(B)], axis=1)
        cmix = lambda xa, w: jnp.einsum('mbi,mio->mbo', xa.astype(bf16), w,
                                        preferred_element_type=f32)
        yr = cmix(xr, w_re) - cmix(xi, w_im)
        yi = cmix(xr, w_im) + cmix(xi, w_re)
        spec = jnp.concatenate([mm(inv_cos, yr[:, b, :]) + mm(inv_sin, yi[:, b, :])
                                for b in range(B)], axis=0)
        h = spec + pointwise(h, 2 + l, H, H)
        if l < L - 1:
            h = jax.nn.gelu(h, approximate=True)
    h = jax.nn.gelu(pointwise(h, 2 + L, H, PROJ), approximate=True)
    return pointwise(h, 3 + L, PROJ, COUT).reshape(B, N, COUT)


# ---------------- deterministic parameter construction ----------------
def make_dft_slab():
    """Packed (4, 16, 16) slab of exact rFFT/irFFT factor matrices for N, MODES."""
    n = np.arange(N)[None, :]
    m = np.arange(MODES)[:, None]
    ang = 2.0 * np.pi * m * n / N                 # (M, N)
    fct = np.cos(ang)                             # X_r[m] = sum_n h[n] cos
    fst = -np.sin(ang)                            # X_i[m] = -sum_n h[n] sin
    cm = np.where((m[:, 0] == 0) | (2 * m[:, 0] == N), 1.0, 2.0)[:, None]
    act = (cm / N) * np.cos(ang)                  # y[n] = sum_m X_r act + X_i ast
    ast = -(cm / N) * np.sin(ang)

    # sanity: exactly matches numpy rfft / irfft truncated to MODES (fp64)
    v = np.random.RandomState(0).randn(N)
    xf = np.fft.rfft(v)[:MODES]
    assert np.allclose(fct @ v, xf.real, atol=1e-9)
    assert np.allclose(fst @ v, xf.imag, atol=1e-9)
    full = np.zeros(N // 2 + 1, np.complex128); full[:MODES] = xf
    assert np.allclose(xf.real @ act + xf.imag @ ast, np.fft.irfft(full, n=N), atol=1e-9)

    side = max(N, MODES)
    slab = np.zeros((4, side, side), np.float32)
    slab[0, :MODES, :N] = fct
    slab[1, :MODES, :N] = fst
    slab[2, :N, :MODES] = act.T
    slab[3, :N, :MODES] = ast.T
    return jnp.asarray(slab, jnp.bfloat16)


def make_params(key):
    keys = iter(jax.random.split(key, 16))
    nxt = lambda: next(keys)

    def glorot(shape):
        std = np.sqrt(2.0 / (shape[0] + shape[1]))
        return std * np.asarray(jax.random.normal(nxt(), shape, jnp.float32))

    # pointwise (1x1-conv) weights + biases packed into single padded slabs
    wpt = np.zeros((P, 64, 64), np.float32)
    bias = np.zeros((P, 64), np.float32)
    dims = [(CIN, LIFT), (LIFT, H)] + [(H, H)] * L + [(H, PROJ), (PROJ, COUT)]
    for k, (r, c) in enumerate(dims):
        wpt[k, :r, :c] = glorot((r, c))
        bias[k, :c] = 0.01 * np.asarray(jax.random.normal(nxt(), (c,), jnp.float32))

    # spectral weights: [2*l] = real part, [2*l+1] = imag part, each (MODES, H, H)
    wspec = (1.0 / H) * np.asarray(
        jax.random.normal(nxt(), (2 * L, MODES, H, H), jnp.float32))

    return (make_dft_slab(),
            jnp.asarray(wspec, jnp.bfloat16),
            jnp.asarray(wpt, jnp.bfloat16),
            jnp.asarray(bias, jnp.float32))


if __name__ == "__main__":
    key = jax.random.PRNGKey(0)
    k_param, k_x = jax.random.split(key)

    dft, wspec, wpt, bias = make_params(k_param)
    # FNOProjected.forward input: (batch, spatial, input_channel)
    x = jax.random.normal(k_x, (B, N, CIN), jnp.float32)

    out = jax.block_until_ready(fno_projected_forward(x, dft, wspec, wpt, bias))
    assert out.shape == (B, N, COUT)

    ref = jax.block_until_ready(reference_forward(x, dft, wspec, wpt, bias))
    np.testing.assert_allclose(np.asarray(out), np.asarray(ref), rtol=2e-3, atol=2e-3)

    print("KERNEL_OK")
</pallas_src>

<mosaic_0001>
module attributes {stable_mosaic.version = 11 : i64} {
  func.func @fno1d_kernel(%arg0: memref<32x4xf32, #tpu.memory_space<vmem>>, %arg1: memref<4x16x16xbf16, #tpu.memory_space<vmem>>, %arg2: memref<6x8x32x32xbf16, #tpu.memory_space<vmem>>, %arg3: memref<7x64x64xbf16, #tpu.memory_space<vmem>>, %arg4: memref<7x64xf32, #tpu.memory_space<vmem>>, %arg5: memref<32x8xf32, #tpu.memory_space<vmem>>) attributes {dimension_semantics = [], scalar_prefetch = 0 : i64, scratch_operands = 0 : i64, tpu.core_type = #tpu.core_type<tc>} {
    %c0 = arith.constant 0 : index
    %c0_0 = arith.constant 0 : index
    %c0_1 = arith.constant 0 : index
    %0 = vector.load %arg1[%c0, %c0_0, %c0_1] : memref<4x16x16xbf16, #tpu.memory_space<vmem>>, vector<1x16x16xbf16>
    %1 = vector.shape_cast %0 : vector<1x16x16xbf16> to vector<16x16xbf16>
    %2 = vector.extract_strided_slice %1 {offsets = [0, 0], sizes = [8, 16], strides = [1, 1]} : vector<16x16xbf16> to vector<8x16xbf16>
    %c1 = arith.constant 1 : index
    %c0_2 = arith.constant 0 : index
    %c0_3 = arith.constant 0 : index
    %3 = vector.load %arg1[%c1, %c0_2, %c0_3] : memref<4x16x16xbf16, #tpu.memory_space<vmem>>, vector<1x16x16xbf16>
    %4 = vector.shape_cast %3 : vector<1x16x16xbf16> to vector<16x16xbf16>
    %5 = vector.extract_strided_slice %4 {offsets = [0, 0], sizes = [8, 16], strides = [1, 1]} : vector<16x16xbf16> to vector<8x16xbf16>
    %c2 = arith.constant 2 : index
    %c0_4 = arith.constant 0 : index
    %c0_5 = arith.constant 0 : index
    %6 = vector.load %arg1[%c2, %c0_4, %c0_5] : memref<4x16x16xbf16, #tpu.memory_space<vmem>>, vector<1x16x16xbf16>
    %7 = vector.shape_cast %6 : vector<1x16x16xbf16> to vector<16x16xbf16>
    %8 = vector.extract_strided_slice %7 {offsets = [0, 0], sizes = [16, 8], strides = [1, 1]} : vector<16x16xbf16> to vector<16x8xbf16>
    %c3 = arith.constant 3 : index
    %c0_6 = arith.constant 0 : index
    %c0_7 = arith.constant 0 : index
    %9 = vector.load %arg1[%c3, %c0_6, %c0_7] : memref<4x16x16xbf16, #tpu.memory_space<vmem>>, vector<1x16x16xbf16>
    %10 = vector.shape_cast %9 : vector<1x16x16xbf16> to vector<16x16xbf16>
    %11 = vector.extract_strided_slice %10 {offsets = [0, 0], sizes = [16, 8], strides = [1, 1]} : vector<16x16xbf16> to vector<16x8xbf16>
    %c0_8 = arith.constant 0 : index
    %c0_9 = arith.constant 0 : index
    %12 = vector.load %arg4[%c0_8, %c0_9] : memref<7x64xf32, #tpu.memory_space<vmem>>, vector<7x64xf32>
    %c0_10 = arith.constant 0 : index
    %c0_11 = arith.constant 0 : index
    %13 = vector.load %arg0[%c0_10, %c0_11] : memref<32x4xf32, #tpu.memory_space<vmem>>, vector<32x4xf32>
    %c0_12 = arith.constant 0 : index
    %c0_13 = arith.constant 0 : index
    %c0_14 = arith.constant 0 : index
    %14 = vector.load %arg3[%c0_12, %c0_13, %c0_14] : memref<7x64x64xbf16, #tpu.memory_space<vmem>>, vector<1x64x64xbf16>
    %15 = vector.shape_cast %14 : vector<1x64x64xbf16> to vector<64x64xbf16>
    %16 = vector.extract_strided_slice %15 {offsets = [0, 0], sizes = [4, 64], strides = [1, 1]} : vector<64x64xbf16> to vector<4x64xbf16>
    %17 = arith.truncf %13 : vector<32x4xf32> to vector<32x4xbf16>
    %cst = arith.constant dense<0.000000e+00> : vector<32x64xf32>
    %18 = tpu.matmul %17, %16, %cst {dimension_numbers = #tpu.dot_dimension_numbers<[1], [0], [0], [1], [0, 0, 1, 1], [], []>} : vector<32x4xbf16>, vector<4x64xbf16>, vector<32x64xf32> -> vector<32x64xf32>
    %19 = vector.extract_strided_slice %12 {offsets = [0, 0], sizes = [1, 64], strides = [1, 1]} : vector<7x64xf32> to vector<1x64xf32>
    %20 = vector.broadcast %19 : vector<1x64xf32> to vector<32x64xf32>
    %21 = arith.addf %18, %20 : vector<32x64xf32>
    %22 = arith.mulf %21, %21 : vector<32x64xf32>
    %23 = arith.mulf %21, %22 : vector<32x64xf32>
    %cst_15 = arith.constant 4.471500e-02 : f32
    %24 = vector.broadcast %cst_15 : f32 to vector<32x64xf32>
    %25 = arith.mulf %24, %23 : vector<32x64xf32>
    %26 = arith.addf %21, %25 : vector<32x64xf32>
    %cst_16 = arith.constant 0.797884583 : f32
    %27 = vector.broadcast %cst_16 : f32 to vector<32x64xf32>
    %28 = arith.mulf %27, %26 : vector<32x64xf32>
    %29 = math.tanh %28 : vector<32x64xf32>
    %cst_17 = arith.constant 1.000000e+00 : f32
    %30 = vector.broadcast %cst_17 : f32 to vector<32x64xf32>
    %31 = arith.addf %30, %29 : vector<32x64xf32>
    %cst_18 = arith.constant 5.000000e-01 : f32
    %32 = vector.broadcast %cst_18 : f32 to vector<32x64xf32>
    %33 = arith.mulf %32, %31 : vector<32x64xf32>
    %34 = arith.mulf %21, %33 : vector<32x64xf32>
    %c1_19 = arith.constant 1 : index
    %c0_20 = arith.constant 0 : index
    %c0_21 = arith.constant 0 : index
    %35 = vector.load %arg3[%c1_19, %c0_20, %c0_21] : memref<7x64x64xbf16, #tpu.memory_space<vmem>>, vector<1x64x64xbf16>
    %36 = vector.shape_cast %35 : vector<1x64x64xbf16> to vector<64x64xbf16>
    %37 = vector.extract_strided_slice %36 {offsets = [0, 0], sizes = [64, 32], strides = [1, 1]} : vector<64x64xbf16> to vector<64x32xbf16>
    %38 = arith.truncf %34 : vector<32x64xf32> to vector<32x64xbf16>
    %cst_22 = arith.constant dense<0.000000e+00> : vector<32x32xf32>
    %39 = tpu.matmul %38, %37, %cst_22 {dimension_numbers = #tpu.dot_dimension_numbers<[1], [0], [0], [1], [0, 0, 1, 1], [], []>} : vector<32x64xbf16>, vector<64x32xbf16>, vector<32x32xf32> -> vector<32x32xf32>
    %40 = vector.extract_strided_slice %12 {offsets = [1, 0], sizes = [1, 32], strides = [1, 1]} : vector<7x64xf32> to vector<1x32xf32>
    %41 = vector.broadcast %40 : vector<1x32xf32> to vector<32x32xf32>
    %42 = arith.addf %39, %41 : vector<32x32xf32>
    %c0_23 = arith.constant 0 : index
    %c0_24 = arith.constant 0 : index
    %c0_25 = arith.constant 0 : index
    %c0_26 = arith.constant 0 : index
    %43 = vector.load %arg2[%c0_23, %c0_24, %c0_25, %c0_26] : memref<6x8x32x32xbf16, #tpu.memory_space<vmem>>, vector<1x8x32x32xbf16>
    %44 = vector.shape_cast %43 : vector<1x8x32x32xbf16> to vector<8x32x32xbf16>
    %c1_27 = arith.constant 1 : index
    %c0_28 = arith.constant 0 : index
    %c0_29 = arith.constant 0 : index
    %c0_30 = arith.constant 0 : index
    %45 = vector.load %arg2[%c1_27, %c0_28, %c0_29, %c0_30] : memref<6x8x32x32xbf16, #tpu.memory_space<vmem>>, vector<1x8x32x32xbf16>
    %46 = vector.shape_cast %45 : vector<1x8x32x32xbf16> to vector<8x32x32xbf16>
    %47 = vector.extract_strided_slice %42 {offsets = [0, 0], sizes = [16, 32], strides = [1, 1]} : vector<32x32xf32> to vector<16x32xf32>
    %48 = arith.truncf %47 : vector<16x32xf32> to vector<16x32xbf16>
    %cst_31 = arith.constant dense<0.000000e+00> : vector<8x32xf32>
    %49 = tpu.matmul %2, %48, %cst_31 {dimension_numbers = #tpu.dot_dimension_numbers<[1], [0], [0], [1], [0, 0, 1, 1], [], []>} : vector<8x16xbf16>, vector<16x32xbf16>, vector<8x32xf32> -> vector<8x32xf32>
    %50 = arith.truncf %47 : vector<16x32xf32> to vector<16x32xbf16>
    %cst_32 = arith.constant dense<0.000000e+00> : vector<8x32xf32>
    %51 = tpu.matmul %5, %50, %cst_32 {dimension_numbers = #tpu.dot_dimension_numbers<[1], [0], [0], [1], [0, 0, 1, 1], [], []>} : vector<8x16xbf16>, vector<16x32xbf16>, vector<8x32xf32> -> vector<8x32xf32>
    %52 = vector.extract_strided_slice %42 {offsets = [16, 0], sizes = [16, 32], strides = [1, 1]} : vector<32x32xf32> to vector<16x32xf32>
    %53 = arith.truncf %52 : vector<16x32xf32> to vector<16x32xbf16>
    %cst_33 = arith.constant dense<0.000000e+00> : vector<8x32xf32>
    %54 = tpu.matmul %2, %53, %cst_33 {dimension_numbers = #tpu.dot_dimension_numbers<[1], [0], [0], [1], [0, 0, 1, 1], [], []>} : vector<8x16xbf16>, vector<16x32xbf16>, vector<8x32xf32> -> vector<8x32xf32>
    %55 = arith.truncf %52 : vector<16x32xf32> to vector<16x32xbf16>
    %cst_34 = arith.constant dense<0.000000e+00> : vector<8x32xf32>
    %56 = tpu.matmul %5, %55, %cst_34 {dimension_numbers = #tpu.dot_dimension_numbers<[1], [0], [0], [1], [0, 0, 1, 1], [], []>} : vector<8x16xbf16>, vector<16x32xbf16>, vector<8x32xf32> -> vector<8x32xf32>
    %57 = vector.shape_cast %49 : vector<8x32xf32> to vector<8x1x32xf32>
    %58 = vector.shape_cast %54 : vector<8x32xf32> to vector<8x1x32xf32>
    %59 = tpu.concatenate %57, %58 in 1 : vector<8x1x32xf32>, vector<8x1x32xf32> -> vector<8x2x32xf32>
    %60 = vector.shape_cast %51 : vector<8x32xf32> to vector<8x1x32xf32>
    %61 = vector.shape_cast %56 : vector<8x32xf32> to vector<8x1x32xf32>
    %62 = tpu.concatenate %60, %61 in 1 : vector<8x1x32xf32>, vector<8x1x32xf32> -> vector<8x2x32xf32>
    %63 = arith.truncf %59 : vector<8x2x32xf32> to vector<8x2x32xbf16>
    "tpu.trace_start"() <{level = 10 : i32, message = "mbi,mio->mbo"}> : () -> ()
    %cst_35 = arith.constant dense<0.000000e+00> : vector<8x2x32xf32>
    %64 = tpu.matmul %63, %44, %cst_35 {dimension_numbers = #tpu.dot_dimension_numbers<[2], [1], [1], [2], [0, 0, 0, 1, 1, 2], [0], [0]>} : vector<8x2x32xbf16>, vector<8x32x32xbf16>, vector<8x2x32xf32> -> vector<8x2x32xf32>
    "tpu.trace_stop"() : () -> ()
    %65 = arith.truncf %62 : vector<8x2x32xf32> to vector<8x2x32xbf16>
    "tpu.trace_start"() <{level = 10 : i32, message = "mbi,mio->mbo"}> : () -> ()
    %cst_36 = arith.constant dense<0.000000e+00> : vector<8x2x32xf32>
    %66 = tpu.matmul %65, %46, %cst_36 {dimension_numbers = #tpu.dot_dimension_numbers<[2], [1], [1], [2], [0, 0, 0, 1, 1, 2], [0], [0]>} : vector<8x2x32xbf16>, vector<8x32x32xbf16>, vector<8x2x32xf32> -> vector<8x2x32xf32>
    "tpu.trace_stop"() : () -> ()
    %67 = arith.subf %64, %66 : vector<8x2x32xf32>
    %68 = arith.truncf %59 : vector<8x2x32xf32> to vector<8x2x32xbf16>
    "tpu.trace_start"() <{level = 10 : i32, message = "mbi,mio->mbo"}> : () -> ()
    %cst_37 = arith.constant dense<0.000000e+00> : vector<8x2x32xf32>
    %69 = tpu.matmul %68, %46, %cst_37 {dimension_numbers = #tpu.dot_dimension_numbers<[2], [1], [1], [2], [0, 0, 0, 1, 1, 2], [0], [0]>} : vector<8x2x32xbf16>, vector<8x32x32xbf16>, vector<8x2x32xf32> -> vector<8x2x32xf32>
    "tpu.trace_stop"() : () -> ()
    %70 = arith.truncf %62 : vector<8x2x32xf32> to vector<8x2x32xbf16>
    "tpu.trace_start"() <{level = 10 : i32, message = "mbi,mio->mbo"}> : () -> ()
    %cst_38 = arith.constant dense<0.000000e+00> : vector<8x2x32xf32>
    %71 = tpu.matmul %70, %44, %cst_38 {dimension_numbers = #tpu.dot_dimension_numbers<[2], [1], [1], [2], [0, 0, 0, 1, 1, 2], [0], [0]>} : vector<8x2x32xbf16>, vector<8x32x32xbf16>, vector<8x2x32xf32> -> vector<8x2x32xf32>
    "tpu.trace_stop"() : () -> ()
    %72 = arith.addf %69, %71 : vector<8x2x32xf32>
    %73 = vector.extract_strided_slice %67 {offsets = [0, 0, 0], sizes = [8, 1, 32], strides = [1, 1, 1]} : vector<8x2x32xf32> to vector<8x1x32xf32>
    %74 = vector.shape_cast %73 : vector<8x1x32xf32> to vector<8x32xf32>
    %75 = arith.truncf %74 : vector<8x32xf32> to vector<8x32xbf16>
    %cst_39 = arith.constant dense<0.000000e+00> : vector<16x32xf32>
    %76 = tpu.matmul %8, %75, %cst_39 {dimension_numbers = #tpu.dot_dimension_numbers<[1], [0], [0], [1], [0, 0, 1, 1], [], []>} : vector<16x8xbf16>, vector<8x32xbf16>, vector<16x32xf32> -> vector<16x32xf32>
    %77 = vector.extract_strided_slice %72 {offsets = [0, 0, 0], sizes = [8, 1, 32], strides = [1, 1, 1]} : vector<8x2x32xf32> to vector<8x1x32xf32>
    %78 = vector.shape_cast %77 : vector<8x1x32xf32> to vector<8x32xf32>
    %79 = arith.truncf %78 : vector<8x32xf32> to vector<8x32xbf16>
    %cst_40 = arith.constant dense<0.000000e+00> : vector<16x32xf32>
    %80 = tpu.matmul %11, %79, %cst_40 {dimension_numbers = #tpu.dot_dimension_numbers<[1], [0], [0], [1], [0, 0, 1, 1], [], []>} : vector<16x8xbf16>, vector<8x32xbf16>, vector<16x32xf32> -> vector<16x32xf32>
    %81 = arith.addf %76, %80 : vector<16x32xf32>
    %82 = vector.extract_strided_slice %67 {offsets = [0, 1, 0], sizes = [8, 1, 32], strides = [1, 1, 1]} : vector<8x2x32xf32> to vector<8x1x32xf32>
    %83 = vector.shape_cast %82 : vector<8x1x32xf32> to vector<8x32xf32>
    %84 = arith.truncf %83 : vector<8x32xf32> to vector<8x32xbf16>
    %cst_41 = arith.constant dense<0.000000e+00> : vector<16x32xf32>
    %85 = tpu.matmul %8, %84, %cst_41 {dimension_numbers = #tpu.dot_dimension_numbers<[1], [0], [0], [1], [0, 0, 1, 1], [], []>} : vector<16x8xbf16>, vector<8x32xbf16>, vector<16x32xf32> -> vector<16x32xf32>
    %86 = vector.extract_strided_slice %72 {offsets = [0, 1, 0], sizes = [8, 1, 32], strides = [1, 1, 1]} : vector<8x2x32xf32> to vector<8x1x32xf32>
    %87 = vector.shape_cast %86 : vector<8x1x32xf32> to vector<8x32xf32>
    %88 = arith.truncf %87 : vector<8x32xf32> to vector<8x32xbf16>
    %cst_42 = arith.constant dense<0.000000e+00> : vector<16x32xf32>
    %89 = tpu.matmul %11, %88, %cst_42 {dimension_numbers = #tpu.dot_dimension_numbers<[1], [0], [0], [1], [0, 0, 1, 1], [], []>} : vector<16x8xbf16>, vector<8x32xbf16>, vector<16x32xf32> -> vector<16x32xf32>
    %90 = arith.addf %85, %89 : vector<16x32xf32>
    %91 = tpu.concatenate %81, %90 in 0 : vector<16x32xf32>, vector<16x32xf32> -> vector<32x32xf32>
    %c2_43 = arith.constant 2 : index
    %c0_44 = arith.constant 0 : index
    %c0_45 = arith.constant 0 : index
    %92 = vector.load %arg3[%c2_43, %c0_44, %c0_45] : memref<7x64x64xbf16, #tpu.memory_space<vmem>>, vector<1x64x64xbf16>
    %93 = vector.shape_cast %92 : vector<1x64x64xbf16> to vector<64x64xbf16>
    %94 = vector.extract_strided_slice %93 {offsets = [0, 0], sizes = [32, 32], strides = [1, 1]} : vector<64x64xbf16> to vector<32x32xbf16>
    %95 = arith.truncf %42 : vector<32x32xf32> to vector<32x32xbf16>
    %cst_46 = arith.constant dense<0.000000e+00> : vector<32x32xf32>
    %96 = tpu.matmul %95, %94, %cst_46 {dimension_numbers = #tpu.dot_dimension_numbers<[1], [0], [0], [1], [0, 0, 1, 1], [], []>} : vector<32x32xbf16>, vector<32x32xbf16>, vector<32x32xf32> -> vector<32x32xf32>
    %97 = vector.extract_strided_slice %12 {offsets = [2, 0], sizes = [1, 32], strides = [1, 1]} : vector<7x64xf32> to vector<1x32xf32>
    %98 = vector.broadcast %97 : vector<1x32xf32> to vector<32x32xf32>
    %99 = arith.addf %96, %98 : vector<32x32xf32>
    %100 = arith.addf %91, %99 : vector<32x32xf32>
    %101 = arith.mulf %100, %100 : vector<32x32xf32>
    %102 = arith.mulf %100, %101 : vector<32x32xf32>
    %cst_47 = arith.constant 4.471500e-02 : f32
    %103 = vector.broadcast %cst_47 : f32 to vector<32x32xf32>
    %104 = arith.mulf %103, %102 : vector<32x32xf32>
    %105 = arith.addf %100, %104 : vector<32x32xf32>
    %cst_48 = arith.constant 0.797884583 : f32
    %106 = vector.broadcast %cst_48 : f32 to vector<32x32xf32>
    %107 = arith.mulf %106, %105 : vector<32x32xf32>
    %108 = math.tanh %107 : vector<32x32xf32>
    %cst_49 = arith.constant 1.000000e+00 : f32
    %109 = vector.broadcast %cst_49 : f32 to vector<32x32xf32>
    %110 = arith.addf %109, %108 : vector<32x32xf32>
    %cst_50 = arith.constant 5.000000e-01 : f32
    %111 = vector.broadcast %cst_50 : f32 to vector<32x32xf32>
    %112 = arith.mulf %111, %110 : vector<32x32xf32>
    %113 = arith.mulf %100, %112 : vector<32x32xf32>
    %c2_51 = arith.constant 2 : index
    %c0_52 = arith.constant 0 : index
    %c0_53 = arith.constant 0 : index
    %c0_54 = arith.constant 0 : index
    %114 = vector.load %arg2[%c2_51, %c0_52, %c0_53, %c0_54] : memref<6x8x32x32xbf16, #tpu.memory_space<vmem>>, vector<1x8x32x32xbf16>
    %115 = vector.shape_cast %114 : vector<1x8x32x32xbf16> to vector<8x32x32xbf16>
    %c3_55 = arith.constant 3 : index
    %c0_56 = arith.constant 0 : index
    %c0_57 = arith.constant 0 : index
    %c0_58 = arith.constant 0 : index
    %116 = vector.load %arg2[%c3_55, %c0_56, %c0_57, %c0_58] : memref<6x8x32x32xbf16, #tpu.memory_space<vmem>>, vector<1x8x32x32xbf16>
    %117 = vector.shape_cast %116 : vector<1x8x32x32xbf16> to vector<8x32x32xbf16>
    %118 = vector.extract_strided_slice %113 {offsets = [0, 0], sizes = [16, 32], strides = [1, 1]} : vector<32x32xf32> to vector<16x32xf32>
    %119 = arith.truncf %118 : vector<16x32xf32> to vector<16x32xbf16>
    %cst_59 = arith.constant dense<0.000000e+00> : vector<8x32xf32>
    %120 = tpu.matmul %2, %119, %cst_59 {dimension_numbers = #tpu.dot_dimension_numbers<[1], [0], [0], [1], [0, 0, 1, 1], [], []>} : vector<8x16xbf16>, vector<16x32xbf16>, vector<8x32xf32> -> vector<8x32xf32>
    %121 = arith.truncf %118 : vector<16x32xf32> to vector<16x32xbf16>
    %cst_60 = arith.constant dense<0.000000e+00> : vector<8x32xf32>
    %122 = tpu.matmul %5, %121, %cst_60 {dimension_numbers = #tpu.dot_dimension_numbers<[1], [0], [0], [1], [0, 0, 1, 1], [], []>} : vector<8x16xbf16>, vector<16x32xbf16>, vector<8x32xf32> -> vector<8x32xf32>
    %123 = vector.extract_strided_slice %113 {offsets = [16, 0], sizes = [16, 32], strides = [1, 1]} : vector<32x32xf32> to vector<16x32xf32>
    %124 = arith.truncf %123 : vector<16x32xf32> to vector<16x32xbf16>
    %cst_61 = arith.constant dense<0.000000e+00> : vector<8x32xf32>
    %125 = tpu.matmul %2, %124, %cst_61 {dimension_numbers = #tpu.dot_dimension_numbers<[1], [0], [0], [1], [0, 0, 1, 1], [], []>} : vector<8x16xbf16>, vector<16x32xbf16>, vector<8x32xf32> -> vector<8x32xf32>
    %126 = arith.truncf %123 : vector<16x32xf32> to vector<16x32xbf16>
    %cst_62 = arith.constant dense<0.000000e+00> : vector<8x32xf32>
    %127 = tpu.matmul %5, %126, %cst_62 {dimension_numbers = #tpu.dot_dimension_numbers<[1], [0], [0], [1], [0, 0, 1, 1], [], []>} : vector<8x16xbf16>, vector<16x32xbf16>, vector<8x32xf32> -> vector<8x32xf32>
    %128 = vector.shape_cast %120 : vector<8x32xf32> to vector<8x1x32xf32>
    %129 = vector.shape_cast %125 : vector<8x32xf32> to vector<8x1x32xf32>
    %130 = tpu.concatenate %128, %129 in 1 : vector<8x1x32xf32>, vector<8x1x32xf32> -> vector<8x2x32xf32>
    %131 = vector.shape_cast %122 : vector<8x32xf32> to vector<8x1x32xf32>
    %132 = vector.shape_cast %127 : vector<8x32xf32> to vector<8x1x32xf32>
    %133 = tpu.concatenate %131, %132 in 1 : vector<8x1x32xf32>, vector<8x1x32xf32> -> vector<8x2x32xf32>
    %134 = arith.truncf %130 : vector<8x2x32xf32> to vector<8x2x32xbf16>
    "tpu.trace_start"() <{level = 10 : i32, message = "mbi,mio->mbo"}> : () -> ()
    %cst_63 = arith.constant dense<0.000000e+00> : vector<8x2x32xf32>
    %135 = tpu.matmul %134, %115, %cst_63 {dimension_numbers = #tpu.dot_dimension_numbers<[2], [1], [1], [2], [0, 0, 0, 1, 1, 2], [0], [0]>} : vector<8x2x32xbf16>, vector<8x32x32xbf16>, vector<8x2x32xf32> -> vector<8x2x32xf32>
    "tpu.trace_stop"() : () -> ()
    %136 = arith.truncf %133 : vector<8x2x32xf32> to vector<8x2x32xbf16>
    "tpu.trace_start"() <{level = 10 : i32, message = "mbi,mio->mbo"}> : () -> ()
    %cst_64 = arith.constant dense<0.000000e+00> : vector<8x2x32xf32>
    %137 = tpu.matmul %136, %117, %cst_64 {dimension_numbers = #tpu.dot_dimension_numbers<[2], [1], [1], [2], [0, 0, 0, 1, 1, 2], [0], [0]>} : vector<8x2x32xbf16>, vector<8x32x32xbf16>, vector<8x2x32xf32> -> vector<8x2x32xf32>
    "tpu.trace_stop"() : () -> ()
    %138 = arith.subf %135, %137 : vector<8x2x32xf32>
    %139 = arith.truncf %130 : vector<8x2x32xf32> to vector<8x2x32xbf16>
    "tpu.trace_start"() <{level = 10 : i32, message = "mbi,mio->mbo"}> : () -> ()
    %cst_65 = arith.constant dense<0.000000e+00> : vector<8x2x32xf32>
    %140 = tpu.matmul %139, %117, %cst_65 {dimension_numbers = #tpu.dot_dimension_numbers<[2], [1], [1], [2], [0, 0, 0, 1, 1, 2], [0], [0]>} : vector<8x2x32xbf16>, vector<8x32x32xbf16>, vector<8x2x32xf32> -> vector<8x2x32xf32>
    "tpu.trace_stop"() : () -> ()
    %141 = arith.truncf %133 : vector<8x2x32xf32> to vector<8x2x32xbf16>
    "tpu.trace_start"() <{level = 10 : i32, message = "mbi,mio->mbo"}> : () -> ()
    %cst_66 = arith.constant dense<0.000000e+00> : vector<8x2x32xf32>
    %142 = tpu.matmul %141, %115, %cst_66 {dimension_numbers = #tpu.dot_dimension_numbers<[2], [1], [1], [2], [0, 0, 0, 1, 1, 2], [0], [0]>} : vector<8x2x32xbf16>, vector<8x32x32xbf16>, vector<8x2x32xf32> -> vector<8x2x32xf32>
    "tpu.trace_stop"() : () -> ()
    %143 = arith.addf %140, %142 : vector<8x2x32xf32>
    %144 = vector.extract_strided_slice %138 {offsets = [0, 0, 0], sizes = [8, 1, 32], strides = [1, 1, 1]} : vector<8x2x32xf32> to vector<8x1x32xf32>
    %145 = vector.shape_cast %144 : vector<8x1x32xf32> to vector<8x32xf32>
    %146 = arith.truncf %145 : vector<8x32xf32> to vector<8x32xbf16>
    %cst_67 = arith.constant dense<0.000000e+00> : vector<16x32xf32>
    %147 = tpu.matmul %8, %146, %cst_67 {dimension_numbers = #tpu.dot_dimension_numbers<[1], [0], [0], [1], [0, 0, 1, 1], [], []>} : vector<16x8xbf16>, vector<8x32xbf16>, vector<16x32xf32> -> vector<16x32xf32>
    %148 = vector.extract_strided_slice %143 {offsets = [0, 0, 0], sizes = [8, 1, 32], strides = [1, 1, 1]} : vector<8x2x32xf32> to vector<8x1x32xf32>
    %149 = vector.shape_cast %148 : vector<8x1x32xf32> to vector<8x32xf32>
    %150 = arith.truncf %149 : vector<8x32xf32> to vector<8x32xbf16>
    %cst_68 = arith.constant dense<0.000000e+00> : vector<16x32xf32>
    %151 = tpu.matmul %11, %150, %cst_68 {dimension_numbers = #tpu.dot_dimension_numbers<[1], [0], [0], [1], [0, 0, 1, 1], [], []>} : vector<16x8xbf16>, vector<8x32xbf16>, vector<16x32xf32> -> vector<16x32xf32>
    %152 = arith.addf %147, %151 : vector<16x32xf32>
    %153 = vector.extract_strided_slice %138 {offsets = [0, 1, 0], sizes = [8, 1, 32], strides = [1, 1, 1]} : vector<8x2x32xf32> to vector<8x1x32xf32>
    %154 = vector.shape_cast %153 : vector<8x1x32xf32> to vector<8x32xf32>
    %155 = arith.truncf %154 : vector<8x32xf32> to vector<8x32xbf16>
    %cst_69 = arith.constant dense<0.000000e+00> : vector<16x32xf32>
    %156 = tpu.matmul %8, %155, %cst_69 {dimension_numbers = #tpu.dot_dimension_numbers<[1], [0], [0], [1], [0, 0, 1, 1], [], []>} : vector<16x8xbf16>, vector<8x32xbf16>, vector<16x32xf32> -> vector<16x32xf32>
    %157 = vector.extract_strided_slice %143 {offsets = [0, 1, 0], sizes = [8, 1, 32], strides = [1, 1, 1]} : vector<8x2x32xf32> to vector<8x1x32xf32>
    %158 = vector.shape_cast %157 : vector<8x1x32xf32> to vector<8x32xf32>
    %159 = arith.truncf %158 : vector<8x32xf32> to vector<8x32xbf16>
    %cst_70 = arith.constant dense<0.000000e+00> : vector<16x32xf32>
    %160 = tpu.matmul %11, %159, %cst_70 {dimension_numbers = #tpu.dot_dimension_numbers<[1], [0], [0], [1], [0, 0, 1, 1], [], []>} : vector<16x8xbf16>, vector<8x32xbf16>, vector<16x32xf32> -> vector<16x32xf32>
    %161 = arith.addf %156, %160 : vector<16x32xf32>
    %162 = tpu.concatenate %152, %161 in 0 : vector<16x32xf32>, vector<16x32xf32> -> vector<32x32xf32>
    %c3_71 = arith.constant 3 : index
    %c0_72 = arith.constant 0 : index
    %c0_73 = arith.constant 0 : index
    %163 = vector.load %arg3[%c3_71, %c0_72, %c0_73] : memref<7x64x64xbf16, #tpu.memory_space<vmem>>, vector<1x64x64xbf16>
    %164 = vector.shape_cast %163 : vector<1x64x64xbf16> to vector<64x64xbf16>
    %165 = vector.extract_strided_slice %164 {offsets = [0, 0], sizes = [32, 32], strides = [1, 1]} : vector<64x64xbf16> to vector<32x32xbf16>
    %166 = arith.truncf %113 : vector<32x32xf32> to vector<32x32xbf16>
    %cst_74 = arith.constant dense<0.000000e+00> : vector<32x32xf32>
    %167 = tpu.matmul %166, %165, %cst_74 {dimension_numbers = #tpu.dot_dimension_numbers<[1], [0], [0], [1], [0, 0, 1, 1], [], []>} : vector<32x32xbf16>, vector<32x32xbf16>, vector<32x32xf32> -> vector<32x32xf32>
    %168 = vector.extract_strided_slice %12 {offsets = [3, 0], sizes = [1, 32], strides = [1, 1]} : vector<7x64xf32> to vector<1x32xf32>
    %169 = vector.broadcast %168 : vector<1x32xf32> to vector<32x32xf32>
    %170 = arith.addf %167, %169 : vector<32x32xf32>
    %171 = arith.addf %162, %170 : vector<32x32xf32>
    %172 = arith.mulf %171, %171 : vector<32x32xf32>
    %173 = arith.mulf %171, %172 : vector<32x32xf32>
    %cst_75 = arith.constant 4.471500e-02 : f32
    %174 = vector.broadcast %cst_75 : f32 to vector<32x32xf32>
    %175 = arith.mulf %174, %173 : vector<32x32xf32>
    %176 = arith.addf %171, %175 : vector<32x32xf32>
    %cst_76 = arith.constant 0.797884583 : f32
    %177 = vector.broadcast %cst_76 : f32 to vector<32x32xf32>
    %178 = arith.mulf %177, %176 : vector<32x32xf32>
    %179 = math.tanh %178 : vector<32x32xf32>
    %cst_77 = arith.constant 1.000000e+00 : f32
    %180 = vector.broadcast %cst_77 : f32 to vector<32x32xf32>
    %181 = arith.addf %180, %179 : vector<32x32xf32>
    %cst_78 = arith.constant 5.000000e-01 : f32
    %182 = vector.broadcast %cst_78 : f32 to vector<32x32xf32>
    %183 = arith.mulf %182, %181 : vector<32x32xf32>
    %184 = arith.mulf %171, %183 : vector<32x32xf32>
    %c4 = arith.constant 4 : index
    %c0_79 = arith.constant 0 : index
    %c0_80 = arith.constant 0 : index
    %c0_81 = arith.constant 0 : index
    %185 = vector.load %arg2[%c4, %c0_79, %c0_80, %c0_81] : memref<6x8x32x32xbf16, #tpu.memory_space<vmem>>, vector<1x8x32x32xbf16>
    %186 = vector.shape_cast %185 : vector<1x8x32x32xbf16> to vector<8x32x32xbf16>
    %c5 = arith.constant 5 : index
    %c0_82 = arith.constant 0 : index
    %c0_83 = arith.constant 0 : index
    %c0_84 = arith.constant 0 : index
    %187 = vector.load %arg2[%c5, %c0_82, %c0_83, %c0_84] : memref<6x8x32x32xbf16, #tpu.memory_space<vmem>>, vector<1x8x32x32xbf16>
    %188 = vector.shape_cast %187 : vector<1x8x32x32xbf16> to vector<8x32x32xbf16>
    %189 = vector.extract_strided_slice %184 {offsets = [0, 0], sizes = [16, 32], strides = [1, 1]} : vector<32x32xf32> to vector<16x32xf32>
    %190 = arith.truncf %189 : vector<16x32xf32> to vector<16x32xbf16>
    %cst_85 = arith.constant dense<0.000000e+00> : vector<8x32xf32>
    %191 = tpu.matmul %2, %190, %cst_85 {dimension_numbers = #tpu.dot_dimension_numbers<[1], [0], [0], [1], [0, 0, 1, 1], [], []>} : vector<8x16xbf16>, vector<16x32xbf16>, vector<8x32xf32> -> vector<8x32xf32>
    %192 = arith.truncf %189 : vector<16x32xf32> to vector<16x32xbf16>
    %cst_86 = arith.constant dense<0.000000e+00> : vector<8x32xf32>
    %193 = tpu.matmul %5, %192, %cst_86 {dimension_numbers = #tpu.dot_dimension_numbers<[1], [0], [0], [1], [0, 0, 1, 1], [], []>} : vector<8x16xbf16>, vector<16x32xbf16>, vector<8x32xf32> -> vector<8x32xf32>
    %194 = vector.extract_strided_slice %184 {offsets = [16, 0], sizes = [16, 32], strides = [1, 1]} : vector<32x32xf32> to vector<16x32xf32>
    %195 = arith.truncf %194 : vector<16x32xf32> to vector<16x32xbf16>
    %cst_87 = arith.constant dense<0.000000e+00> : vector<8x32xf32>
    %196 = tpu.matmul %2, %195, %cst_87 {dimension_numbers = #tpu.dot_dimension_numbers<[1], [0], [0], [1], [0, 0, 1, 1], [], []>} : vector<8x16xbf16>, vector<16x32xbf16>, vector<8x32xf32> -> vector<8x32xf32>
    %197 = arith.truncf %194 : vector<16x32xf32> to vector<16x32xbf16>
    %cst_88 = arith.constant dense<0.000000e+00> : vector<8x32xf32>
    %198 = tpu.matmul %5, %197, %cst_88 {dimension_numbers = #tpu.dot_dimension_numbers<[1], [0], [0], [1], [0, 0, 1, 1], [], []>} : vector<8x16xbf16>, vector<16x32xbf16>, vector<8x32xf32> -> vector<8x32xf32>
    %199 = vector.shape_cast %191 : vector<8x32xf32> to vector<8x1x32xf32>
    %200 = vector.shape_cast %196 : vector<8x32xf32> to vector<8x1x32xf32>
    %201 = tpu.concatenate %199, %200 in 1 : vector<8x1x32xf32>, vector<8x1x32xf32> -> vector<8x2x32xf32>
    %202 = vector.shape_cast %193 : vector<8x32xf32> to vector<8x1x32xf32>
    %203 = vector.shape_cast %198 : vector<8x32xf32> to vector<8x1x32xf32>
    %204 = tpu.concatenate %202, %203 in 1 : vector<8x1x32xf32>, vector<8x1x32xf32> -> vector<8x2x32xf32>
    %205 = arith.truncf %201 : vector<8x2x32xf32> to vector<8x2x32xbf16>
    "tpu.trace_start"() <{level = 10 : i32, message = "mbi,mio->mbo"}> : () -> ()
    %cst_89 = arith.constant dense<0.000000e+00> : vector<8x2x32xf32>
    %206 = tpu.matmul %205, %186, %cst_89 {dimension_numbers = #tpu.dot_dimension_numbers<[2], [1], [1], [2], [0, 0, 0, 1, 1, 2], [0], [0]>} : vector<8x2x32xbf16>, vector<8x32x32xbf16>, vector<8x2x32xf32> -> vector<8x2x32xf32>
    "tpu.trace_stop"() : () -> ()
    %207 = arith.truncf %204 : vector<8x2x32xf32> to vector<8x2x32xbf16>
    "tpu.trace_start"() <{level = 10 : i32, message = "mbi,mio->mbo"}> : () -> ()
    %cst_90 = arith.constant dense<0.000000e+00> : vector<8x2x32xf32>
    %208 = tpu.matmul %207, %188, %cst_90 {dimension_numbers = #tpu.dot_dimension_numbers<[2], [1], [1], [2], [0, 0, 0, 1, 1, 2], [0], [0]>} : vector<8x2x32xbf16>, vector<8x32x32xbf16>, vector<8x2x32xf32> -> vector<8x2x32xf32>
    "tpu.trace_stop"() : () -> ()
    %209 = arith.subf %206, %208 : vector<8x2x32xf32>
    %210 = arith.truncf %201 : vector<8x2x32xf32> to vector<8x2x32xbf16>
    "tpu.trace_start"() <{level = 10 : i32, message = "mbi,mio->mbo"}> : () -> ()
    %cst_91 = arith.constant dense<0.000000e+00> : vector<8x2x32xf32>
    %211 = tpu.matmul %210, %188, %cst_91 {dimension_numbers = #tpu.dot_dimension_numbers<[2], [1], [1], [2], [0, 0, 0, 1, 1, 2], [0], [0]>} : vector<8x2x32xbf16>, vector<8x32x32xbf16>, vector<8x2x32xf32> -> vector<8x2x32xf32>
    "tpu.trace_stop"() : () -> ()
    %212 = arith.truncf %204 : vector<8x2x32xf32> to vector<8x2x32xbf16>
    "tpu.trace_start"() <{level = 10 : i32, message = "mbi,mio->mbo"}> : () -> ()
    %cst_92 = arith.constant dense<0.000000e+00> : vector<8x2x32xf32>
    %213 = tpu.matmul %212, %186, %cst_92 {dimension_numbers = #tpu.dot_dimension_numbers<[2], [1], [1], [2], [0, 0, 0, 1, 1, 2], [0], [0]>} : vector<8x2x32xbf16>, vector<8x32x32xbf16>, vector<8x2x32xf32> -> vector<8x2x32xf32>
    "tpu.trace_stop"() : () -> ()
    %214 = arith.addf %211, %213 : vector<8x2x32xf32>
    %215 = vector.extract_strided_slice %209 {offsets = [0, 0, 0], sizes = [8, 1, 32], strides = [1, 1, 1]} : vector<8x2x32xf32> to vector<8x1x32xf32>
    %216 = vector.shape_cast %215 : vector<8x1x32xf32> to vector<8x32xf32>
    %217 = arith.truncf %216 : vector<8x32xf32> to vector<8x32xbf16>
    %cst_93 = arith.constant dense<0.000000e+00> : vector<16x32xf32>
    %218 = tpu.matmul %8, %217, %cst_93 {dimension_numbers = #tpu.dot_dimension_numbers<[1], [0], [0], [1], [0, 0, 1, 1], [], []>} : vector<16x8xbf16>, vector<8x32xbf16>, vector<16x32xf32> -> vector<16x32xf32>
    %219 = vector.extract_strided_slice %214 {offsets = [0, 0, 0], sizes = [8, 1, 32], strides = [1, 1, 1]} : vector<8x2x32xf32> to vector<8x1x32xf32>
    %220 = vector.shape_cast %219 : vector<8x1x32xf32> to vector<8x32xf32>
    %221 = arith.truncf %220 : vector<8x32xf32> to vector<8x32xbf16>
    %cst_94 = arith.constant dense<0.000000e+00> : vector<16x32xf32>
    %222 = tpu.matmul %11, %221, %cst_94 {dimension_numbers = #tpu.dot_dimension_numbers<[1], [0], [0], [1], [0, 0, 1, 1], [], []>} : vector<16x8xbf16>, vector<8x32xbf16>, vector<16x32xf32> -> vector<16x32xf32>
    %223 = arith.addf %218, %222 : vector<16x32xf32>
    %224 = vector.extract_strided_slice %209 {offsets = [0, 1, 0], sizes = [8, 1, 32], strides = [1, 1, 1]} : vector<8x2x32xf32> to vector<8x1x32xf32>
    %225 = vector.shape_cast %224 : vector<8x1x32xf32> to vector<8x32xf32>
    %226 = arith.truncf %225 : vector<8x32xf32> to vector<8x32xbf16>
    %cst_95 = arith.constant dense<0.000000e+00> : vector<16x32xf32>
    %227 = tpu.matmul %8, %226, %cst_95 {dimension_numbers = #tpu.dot_dimension_numbers<[1], [0], [0], [1], [0, 0, 1, 1], [], []>} : vector<16x8xbf16>, vector<8x32xbf16>, vector<16x32xf32> -> vector<16x32xf32>
    %228 = vector.extract_strided_slice %214 {offsets = [0, 1, 0], sizes = [8, 1, 32], strides = [1, 1, 1]} : vector<8x2x32xf32> to vector<8x1x32xf32>
    %229 = vector.shape_cast %228 : vector<8x1x32xf32> to vector<8x32xf32>
    %230 = arith.truncf %229 : vector<8x32xf32> to vector<8x32xbf16>
    %cst_96 = arith.constant dense<0.000000e+00> : vector<16x32xf32>
    %231 = tpu.matmul %11, %230, %cst_96 {dimension_numbers = #tpu.dot_dimension_numbers<[1], [0], [0], [1], [0, 0, 1, 1], [], []>} : vector<16x8xbf16>, vector<8x32xbf16>, vector<16x32xf32> -> vector<16x32xf32>
    %232 = arith.addf %227, %231 : vector<16x32xf32>
    %233 = tpu.concatenate %223, %232 in 0 : vector<16x32xf32>, vector<16x32xf32> -> vector<32x32xf32>
    %c4_97 = arith.constant 4 : index
    %c0_98 = arith.constant 0 : index
    %c0_99 = arith.constant 0 : index
    %234 = vector.load %arg3[%c4_97, %c0_98, %c0_99] : memref<7x64x64xbf16, #tpu.memory_space<vmem>>, vector<1x64x64xbf16>
    %235 = vector.shape_cast %234 : vector<1x64x64xbf16> to vector<64x64xbf16>
    %236 = vector.extract_strided_slice %235 {offsets = [0, 0], sizes = [32, 32], strides = [1, 1]} : vector<64x64xbf16> to vector<32x32xbf16>
    %237 = arith.truncf %184 : vector<32x32xf32> to vector<32x32xbf16>
    %cst_100 = arith.constant dense<0.000000e+00> : vector<32x32xf32>
    %238 = tpu.matmul %237, %236, %cst_100 {dimension_numbers = #tpu.dot_dimension_numbers<[1], [0], [0], [1], [0, 0, 1, 1], [], []>} : vector<32x32xbf16>, vector<32x32xbf16>, vector<32x32xf32> -> vector<32x32xf32>
    %239 = vector.extract_strided_slice %12 {offsets = [4, 0], sizes = [1, 32], strides = [1, 1]} : vector<7x64xf32> to vector<1x32xf32>
    %240 = vector.broadcast %239 : vector<1x32xf32> to vector<32x32xf32>
    %241 = arith.addf %238, %240 : vector<32x32xf32>
    %242 = arith.addf %233, %241 : vector<32x32xf32>
    %c5_101 = arith.constant 5 : index
    %c0_102 = arith.constant 0 : index
    %c0_103 = arith.constant 0 : index
    %243 = vector.load %arg3[%c5_101, %c0_102, %c0_103] : memref<7x64x64xbf16, #tpu.memory_space<vmem>>, vector<1x64x64xbf16>
    %244 = vector.shape_cast %243 : vector<1x64x64xbf16> to vector<64x64xbf16>
    %245 = vector.extract_strided_slice %244 {offsets = [0, 0], sizes = [32, 64], strides = [1, 1]} : vector<64x64xbf16> to vector<32x64xbf16>
    %246 = arith.truncf %242 : vector<32x32xf32> to vector<32x32xbf16>
    %cst_104 = arith.constant dense<0.000000e+00> : vector<32x64xf32>
    %247 = tpu.matmul %246, %245, %cst_104 {dimension_numbers = #tpu.dot_dimension_numbers<[1], [0], [0], [1], [0, 0, 1, 1], [], []>} : vector<32x32xbf16>, vector<32x64xbf16>, vector<32x64xf32> -> vector<32x64xf32>
    %248 = vector.extract_strided_slice %12 {offsets = [5, 0], sizes = [1, 64], strides = [1, 1]} : vector<7x64xf32> to vector<1x64xf32>
    %249 = vector.broadcast %248 : vector<1x64xf32> to vector<32x64xf32>
    %250 = arith.addf %247, %249 : vector<32x64xf32>
    %251 = arith.mulf %250, %250 : vector<32x64xf32>
    %252 = arith.mulf %250, %251 : vector<32x64xf32>
    %cst_105 = arith.constant 4.471500e-02 : f32
    %253 = vector.broadcast %cst_105 : f32 to vector<32x64xf32>
    %254 = arith.mulf %253, %252 : vector<32x64xf32>
    %255 = arith.addf %250, %254 : vector<32x64xf32>
    %cst_106 = arith.constant 0.797884583 : f32
    %256 = vector.broadcast %cst_106 : f32 to vector<32x64xf32>
    %257 = arith.mulf %256, %255 : vector<32x64xf32>
    %258 = math.tanh %257 : vector<32x64xf32>
    %cst_107 = arith.constant 1.000000e+00 : f32
    %259 = vector.broadcast %cst_107 : f32 to vector<32x64xf32>
    %260 = arith.addf %259, %258 : vector<32x64xf32>
    %cst_108 = arith.constant 5.000000e-01 : f32
    %261 = vector.broadcast %cst_108 : f32 to vector<32x64xf32>
    %262 = arith.mulf %261, %260 : vector<32x64xf32>
    %263 = arith.mulf %250, %262 : vector<32x64xf32>
    %c6 = arith.constant 6 : index
    %c0_109 = arith.constant 0 : index
    %c0_110 = arith.constant 0 : index
    %264 = vector.load %arg3[%c6, %c0_109, %c0_110] : memref<7x64x64xbf16, #tpu.memory_space<vmem>>, vector<1x64x64xbf16>
    %265 = vector.shape_cast %264 : vector<1x64x64xbf16> to vector<64x64xbf16>
    %266 = vector.extract_strided_slice %265 {offsets = [0, 0], sizes = [64, 8], strides = [1, 1]} : vector<64x64xbf16> to vector<64x8xbf16>
    %267 = arith.truncf %263 : vector<32x64xf32> to vector<32x64xbf16>
    %cst_111 = arith.constant dense<0.000000e+00> : vector<32x8xf32>
    %268 = tpu.matmul %267, %266, %cst_111 {dimension_numbers = #tpu.dot_dimension_numbers<[1], [0], [0], [1], [0, 0, 1, 1], [], []>} : vector<32x64xbf16>, vector<64x8xbf16>, vector<32x8xf32> -> vector<32x8xf32>
    %269 = vector.extract_strided_slice %12 {offsets = [6, 0], sizes = [1, 8], strides = [1, 1]} : vector<7x64xf32> to vector<1x8xf32>
    %270 = vector.broadcast %269 : vector<1x8xf32> to vector<32x8xf32>
    %271 = arith.addf %268, %270 : vector<32x8xf32>
    %c0_112 = arith.constant 0 : index
    %c0_113 = arith.constant 0 : index
    %272 = vector.load %arg5[%c0_112, %c0_113] : memref<32x8xf32, #tpu.memory_space<vmem>>, vector<32x8xf32>
    tpu.vector_store %arg5[%c0_112, %c0_113], %271 {strides = array<i32>} : memref<32x8xf32, #tpu.memory_space<vmem>>, vector<32x8xf32>,
    return
  }
}

</mosaic_0001>

<bundles_post_ra>
// kernel: tpu_custom_call.1
= control target key start
LH: loop header
LB: loop body
LE: loop exit
PB: predicated region body
PF: predicated region fallthrough
CT: control target
= control target key end

     0   :  { %10 = vsyncpa [#allocation3], 0  ;;  %s11647_s0 = inlined_call_operand.vmem [shape: f32[32,4], index: 0, kind: input, shape index: {}]   ;;  %s11648_s1 = inlined_call_operand.vmem [shape: bf16[4,16,16], index: 1, kind: input, shape index: {}]   ;;  %s11649_s2 = inlined_call_operand.hbm [shape: bf16[6,8,32,32], index: 2, kind: input, shape index: {}]   ;;  %s11650_s3 = inlined_call_operand.hbm [shape: bf16[7,64,64], index: 3, kind: input, shape index: {}]   ;;  %s11651_s4 = inlined_call_operand.vmem [shape: f32[7,64], index: 4, kind: input, shape index: {}]   ;;  %s11652_s5 = inlined_call_operand.vmem [shape: f32[32,8], index: 5, kind: output, shape index: {}]  }
   0x1   :  { %11 = vsyncpa [#allocation5], 0  ;;  %s9855_s18 = smov [#allocation2]   ;;  %s9807_s22 = scalar_lea.hbm %s11649_s2, 12288 }
   0x2   :  { %s21_s19 = sshll.u32 %s9855_s18, 4  ;;  %p9808_p0 = scmp.ne.s32.totalorder %s11649_s2, %s9807_s22  ;;  %s22_s19 = int_to_ptr.vmem [resolvable:$true] %s21_s19 }
   0x3   :  { %p9811_p1 = scmp.lt.u32.totalorder %s9807_s22, %s11649_s2 }
   0x5   :  { %p9813_p2 = pnand %p9811_p1, %p9808_p0 }
   0x7   :  { %9816 = shalt.err (!%p9813_p2)
}
   0x8   :  { %s9817_s27 = scalar_lea.vmem %s22_s19, 12288  ;;  %p9822_p4 = scmp.lt.s32.totalorder %s22_s19, %s22_s19 }
   0x9   :  { %p9818_p3 = scmp.ne.s32.totalorder %s22_s19, %s9817_s27  ;;  %p9823_p5 = scmp.lt.s32.totalorder %s9817_s27, %s9817_s27 }
   0xb   :  { %p9824_p6 = por %p9823_p5, %p9822_p4 }
   0xd   :  { %p9825_p7 = pnand %p9824_p6, %p9818_p3 }
   0xf   :  { %9828 = shalt.err (!%p9825_p7)
}
  0x10   :  { %s9856_s28 = smov 64   ;;  %s9857_s29 = smov 4  }
  0x11   :  { %27 = dma.hbm_to_vmem [thread:$0]  %s11649_s2, 12288, %s22_s19, [#allocation3], %s9856_s28, %s9856_s28, %s9857_s29  }
  0x12   :  { %s9858_s7 = smov [#allocation4]   ;;  %s9829_s11 = scalar_lea.hbm %s11650_s3, 3584 }
  0x13   :  { %s33_s8 = sshll.u32 %s9858_s7, 4  ;;  %p9830_p8 = scmp.ne.s32.totalorder %s11650_s3, %s9829_s11  ;;  %s34_s8 = int_to_ptr.vmem [resolvable:$true] %s33_s8 }
  0x14   :  { %p9833_p9 = scmp.lt.u32.totalorder %s9829_s11, %s11650_s3 }
  0x16   :  { %p9835_p10 = pnand %p9833_p9, %p9830_p8 }
  0x18   :  { %9838 = shalt.err (!%p9835_p10)
}
  0x19   :  { %s9839_s16 = scalar_lea.vmem %s34_s8, 3584  ;;  %p9844_p12 = scmp.lt.s32.totalorder %s34_s8, %s34_s8 }
  0x1a   :  { %p9840_p11 = scmp.ne.s32.totalorder %s34_s8, %s9839_s16  ;;  %p9845_p13 = scmp.lt.s32.totalorder %s9839_s16, %s9839_s16 }
  0x1c   :  { %p9846_p0 = por %p9845_p13, %p9844_p12 }
  0x1e   :  { %p9847_p1 = pnand %p9846_p0, %p9840_p11 }
  0x20   :  { %9850 = shalt.err (!%p9847_p1)
}
  0x21   :  { %39 = dma.hbm_to_vmem [thread:$0]  %s11650_s3, 3584, %s34_s8, [#allocation5], %s9856_s28, %s9856_s28, %s9857_s29  }
  0x22   :  { %9851 = dma.done.wait [#allocation3], 12288  }
  0x23   :  { %9852 = vsyncadd [#allocation3], 4294955008 }
  0x24   :  { %9853 = dma.done.wait [#allocation5], 3584  }
  0x25   :  { %9854 = vsyncadd [#allocation5], 4294963712  ;;  %vm77_vm0 = vcmask 1041408   ;;  %v63_v0 = vld [vmem:[#allocation4] sm:$0xf]  ;;  %v59_v1 = vld [vmem:[%s11647_s0] sm:$0xff]  ;;  %v66_v12 = vlaneseq }
  0x26   :  { %v60_v2 = vld [vmem:[%s11647_s0 + $0x8] sm:$0xff]  ;;  %vm70_vm1 = vcmask 31744   ;;  %9642 = vmatprep.subr.msk.bf16.mxu0 %vm77_vm0, %v63_v0  ;;  %v79_v3 = vsel %vm77_vm0, %v63_v0, 0  ;;  %v61_v5 = vld [vmem:[%s11647_s0 + $0x10] sm:$0xff]  ;;  %v62_v6 = vld [vmem:[%s11647_s0 + $0x18] sm:$0xff]  ;;  %vm205_vm2 = vcmask 523264  }
  0x27   :  { %v64_v4 = vpack.c.bf16 %v60_v2, %v59_v1  ;;  %8549 = vmatpush3.bf16.msra.mxu0 %v79_v3  ;;  %v65_v7 = vpack.c.bf16 %v62_v6, %v61_v5  ;;  %v9650_v8 = vld [vmem:[#allocation4 + $0x20] sm:$0xff]   ;;  %v9651_v9 = vld [vmem:[#allocation4 + $0x28] sm:$0xff]   ;;  %v9652_v10 = vld [vmem:[#allocation4 + $0x30] sm:$0xff]   ;;  %v9928_v13 = vshrl.u32 %v66_v12, 7  ;;  %v9859_v63 = vmov 0.0  }
  0x28   :  { %8554 = vmatprep.subr.bf16.mxu1 %v9650_v8  ;;  %v9653_v11 = vld [vmem:[#allocation4 + $0x38] sm:$0xff]   ;;  %8566 = vmatprep.subr.bf16.mxu0 %v9859_v63  ;;  %vm9860_vm3 = vmmov 0   ;;  %vm327_vm4 = vcmask 130048   ;;  %vm643_vm5 = vcmask 1040384   ;;  %vm828_vm6 = vcmask 261120  }
  0x29   :  { %8550 = vmatprep.mubr.msk.bf16.mxu0 %vm70_vm1, %v64_v4  ;;  %8555 = vmatpush3.bf16.msra.mxu1 %v9650_v8  ;;  %v9931_v14 = vsub.s32 0, %v9928_v13  ;;  %v58_v15 = vld [vmem:[%s11651_s4] sm:$0x7f]  ;;  %v179_v0 = vsub.s32 1, %v9928_v13  ;;  %vm2391_vm7 = vcmask 1041409   ;;  %vm2394_vm8 = vcmask 1042434  }
  0x2a   :  { %8551 = vmatmul.mubr.msk.bf16.vlgmr.msra.gmra.mrb[0].mxu0 %vm70_vm1, %v65_v7  ;;  %8556 = vmatprep.subr.bf16.mxu1 %v9651_v9  ;;  %v49_v12 = vld [vmem:[%s11648_s1] sm:$0xf]  ;;  %vm2397_vm9 = vcmask 1043459   ;;  %vm2400_vm10 = vcmask 1044484   ;;  %vm2403_vm11 = vcmask 1045509   ;;  %vm2406_vm12 = vcmask 1046534  }
  0x2b   :  { %v69_v16 = vrot.slane %v58_v15, %v9931_v14  ;;  %8568 = vmatprep.mubr.msk.bf16.mxu0 %vm9860_vm3, %v9859_v63  ;;  %v180_v1 = vrot.slane %v58_v15, %v179_v0  ;;  %v7928_v15 = vld [vmem:[%s11648_s1 + $0x8] sm:$0xf]  ;;  %vm2409_vm13 = vcmask 1047559   ;;  %vm2416_vm14 = vcmask 1043456  }
  0x2c   :  { %vm2412_vm15 = vcmask 64512  }
  0x2d   :  { %8557 = vmatpush3.bf16.msra.mxu1 %v9651_v9 }
  0x2e   :  { %8558 = vmatprep.subr.bf16.mxu1 %v9652_v10 }
  0x31   :  { %8559 = vmatpush3.bf16.msra.mxu1 %v9652_v10 }
  0x32   :  { %8560 = vmatprep.subr.bf16.mxu1 %v9653_v11 }
  0x35   :  { %8561 = vmatpush3.bf16.msra.mxu1 %v9653_v11 }
  0x36   :  { %8590 = vmatprep.subr.bf16.mxu1 %v9859_v63 }
  0xfd   :  { %v8552_v17 = vpop.f32.mrb[0].mxu0 }
  0xfe   :  { %v124_v18 = vadd.f32 %v8552_v17, %v69_v16  ;;  %v115_v19 = vpop.f32.mrb[1].mxu0  ;;  %v9979_v17 = vld [vmem:[#allocation2 + $0x10] sm:$0xff]  }
  0xff   :  { %v116_v20 = vadd.f32 %v115_v19, %v69_v16  ;;  %v8553_v21 = vpop.f32.mrb[2].mxu0  ;;  %v9987_v19 = vld [vmem:[#allocation2 + $0x18] sm:$0xff]  }
 0x100   :  { %v132_v22 = vmul.f32 %v124_v18, %v124_v18  ;;  %v127_v23 = vadd.f32 %v8553_v21, %v69_v16  ;;  %v118_v24 = vpop.f32.mrb[3].mxu0 }
 0x101   :  { %v130_v25 = vmul.f32 %v116_v20, %v116_v20  ;;  %v119_v26 = vadd.f32 %v118_v24, %v69_v16  ;;  %v9976_v16 = vld [vmem:[#allocation2] sm:$0xff]  }
 0x102   :  { %v136_v27 = vmul.f32 %v132_v22, %v124_v18  ;;  %v133_v28 = vmul.f32 %v127_v23, %v127_v23 }
 0x103   :  { %v134_v29 = vmul.f32 %v130_v25, %v116_v20  ;;  %v131_v30 = vmul.f32 %v119_v26, %v119_v26 }
 0x104   :  { %v140_v31 = vmul.f32 0.044715, %v136_v27  ;;  %v137_v32 = vmul.f32 %v133_v28, %v127_v23 }
 0x105   :  { %v138_v33 = vmul.f32 0.044715, %v134_v29  ;;  %v135_v34 = vmul.f32 %v131_v30, %v119_v26 }
 0x106   :  { %v144_v35 = vadd.f32 %v140_v31, %v124_v18  ;;  %v141_v36 = vmul.f32 0.044715, %v137_v32 }
 0x107   :  { %v142_v37 = vadd.f32 %v138_v33, %v116_v20  ;;  %v139_v38 = vmul.f32 0.044715, %v135_v34 }
 0x108   :  { %v148_v39 = vmul.f32 0.7978846, %v144_v35  ;;  %v145_v40 = vadd.f32 %v141_v36, %v127_v23 }
 0x109   :  { %v146_v41 = vmul.f32 0.7978846, %v142_v37  ;;  %v143_v42 = vadd.f32 %v139_v38, %v119_v26 }
 0x10a   :  { %9764 = vtanh.f32 %v148_v39  ;;  %v149_v43 = vmul.f32 0.7978846, %v145_v40 }
 0x10b   :  { %v147_v44 = vmul.f32 0.7978846, %v143_v42  ;;  %9766 = vtanh.f32 %v146_v41 }
 0x10c   :  { %9768 = vtanh.f32 %v149_v43 }
 0x10d   :  { %9770 = vtanh.f32 %v147_v44 }
 0x114   :  { %v9765_v45 = vpop.eup %9764 }
 0x115   :  { %v9767_v46 = vpop.eup %9766  ;;  %v156_v47 = vadd.f32 1.0, %v9765_v45 }
 0x116   :  { %v9769_v48 = vpop.eup %9768  ;;  %v154_v49 = vadd.f32 1.0, %v9767_v46 }
 0x117   :  { %v9771_v50 = vpop.eup %9770  ;;  %v160_v51 = vmul.f32 0.5, %v156_v47  ;;  %v157_v52 = vadd.f32 1.0, %v9769_v48 }
 0x118   :  { %v155_v53 = vadd.f32 1.0, %v9771_v50  ;;  %v158_v54 = vmul.f32 0.5, %v154_v49 }
 0x119   :  { %v161_v55 = vmul.f32 0.5, %v157_v52  ;;  %v164_v57 = vmul.f32 %v160_v51, %v124_v18  ;;  %v9983_v18 = vld [vmem:[#allocation2 + $0x8] sm:$0xff]  }
 0x11a   :  { %v159_v56 = vmul.f32 0.5, %v155_v53  ;;  %v162_v59 = vmul.f32 %v158_v54, %v116_v20  ;;  %v9861_v20 = vmov 1966171168  }
 0x11b   :  { %v165_v58 = vmul.f32 %v161_v55, %v127_v23  ;;  %v498_v21 = vunpack.c.l.s4 %v9861_v20 }
 0x11c   :  { %v163_v60 = vmul.f32 %v159_v56, %v119_v26 }
 0x11d   :  { %v176_v61 = vpack.c.bf16 %v165_v58, %v164_v57  ;;  %v499_v24 = vunpack.c.0.s8 %v498_v21 }
 0x11e   :  { %v175_v62 = vpack.c.bf16 %v163_v60, %v162_v59 }
 0x11f   :  { %v9993_v27 = vsub.s32 %v499_v24, %v9928_v13  ;;  %v10038_v24 = vld [vmem:[#allocation2 + $0x20] sm:$0xff]  }
 0x120   :  { %8562 = vmatprep.mubr.msk.bf16.mxu1 %vm205_vm2, %v175_v62 }
 0x121   :  { %8563 = vmatmul.mubr.msk.bf16.vlgmr.msra.gmra.mrb[0].mxu1 %vm205_vm2, %v176_v61 }
 0x122   :  { %8594 = vmatprep.mubr.msk.bf16.mxu1 %vm9860_vm3, %v9859_v63  ;;  %8591 = vmatpush3.bf16.msra.mxu1 %v9976_v16 }
 0x123   :  { %8592 = vmatprep.subr.bf16.mxu1 %v9859_v63 }
 0x126   :  { %8593 = vmatpush3.bf16.msra.mxu1 %v9983_v18 }
 0x127   :  { %8606 = vmatprep.subr.bf16.mxu1 %v9859_v63 }
 0x1f4   :  { %v8564_v2 = vpop.f32.mrb[0].mxu1 }
 0x1f5   :  { %v246_v3 = vpop.f32.mrb[1].mxu1  ;;  %v255_v5 = vadd.f32 %v8564_v2, %v180_v1 }
 0x1f6   :  { %v8565_v4 = vpop.f32.mrb[2].mxu1  ;;  %v247_v8 = vadd.f32 %v246_v3, %v180_v1 }
 0x1f7   :  { %v258_v6 = vadd.f32 %v8565_v4, %v180_v1  ;;  %v249_v7 = vpop.f32.mrb[3].mxu1 }
 0x1f8   :  { %v250_v9 = vadd.f32 %v249_v7, %v180_v1 }
 0x1f9   :  { %v9946_v10 = vpack.c.bf16 %v258_v6, %v255_v5 }
 0x1fa   :  { %v9948_v11 = vpack.c.bf16 %v250_v9, %v247_v8 }
 0x1fc   :  { %8567 = vmatpush3.bf16.msra.mxu0 %v9948_v11 }
 0x1fd   :  { %8572 = vmatprep.subr.bf16.mxu0 %v9859_v63 }
 0x1ff   :  { %8569 = vmatmul.mubr.msk.bf16.vlgmr.msra.gmra.mrb[4].mxu0 %vm327_vm4, %v49_v12 }
 0x200   :  { %8573 = vmatpush3.bf16.msra.mxu0 %v9948_v11  ;;  %8574 = vmatprep.mubr.msk.bf16.mxu0 %vm9860_vm3, %v9859_v63 }
 0x201   :  { %8578 = vmatprep.subr.bf16.mxu0 %v9859_v63 }
 0x207   :  { %8575 = vmatmul.mubr.msk.bf16.vlgmr.msra.gmra.mrb[8].mxu0 %vm327_vm4, %v7928_v15 }
 0x208   :  { %8579 = vmatpush3.bf16.msra.mxu0 %v9946_v10  ;;  %8580 = vmatprep.mubr.msk.bf16.mxu0 %vm9860_vm3, %v9859_v63 }
 0x209   :  { %8584 = vmatprep.subr.bf16.mxu0 %v9859_v63 }
 0x20f   :  { %8581 = vmatmul.mubr.msk.bf16.vlgmr.msra.gmra.mrb[12].mxu0 %vm327_vm4, %v49_v12 }
 0x210   :  { %8585 = vmatpush3.bf16.msra.mxu0 %v9946_v10  ;;  %8586 = vmatprep.mubr.msk.bf16.mxu0 %vm9860_vm3, %v9859_v63 }
 0x211   :  { %8598 = vmatprep.subr.bf16.mxu0 %v9859_v63 }
 0x217   :  { %8587 = vmatmul.mubr.msk.bf16.vlgmr.msra.gmra.mrb[16].mxu0 %vm327_vm4, %v7928_v15 }
 0x218   :  { %8602 = vmatprep.mubr.msk.bf16.mxu0 %vm9860_vm3, %v9859_v63  ;;  %8599 = vmatpush3.bf16.msra.mxu0 %v9979_v17 }
 0x219   :  { %8600 = vmatprep.subr.bf16.mxu0 %v9859_v63 }
 0x21c   :  { %8601 = vmatpush3.bf16.msra.mxu0 %v9987_v19 }
 0x21d   :  { %8614 = vmatprep.subr.bf16.mxu0 %v9859_v63 }
 0x2d2   :  { %v365_v22 = vpop.f32.mrb[4].mxu0 }
 0x2d3   :  { %v8570_v23 = vpop.f32.mrb[5].mxu0  ;;  %v496_v28 = vcombine.high %v365_v22, %v365_v22  ;;  %v503_v31 = vrot.slane %v365_v22, %v9993_v27 }
 0x2d4   :  { %v368_v25 = vpop.f32.mrb[6].mxu0 }
 0x2d5   :  { %v8571_v26 = vpop.f32.mrb[7].mxu0  ;;  %v510_v32 = vrot.slane %v496_v28, %v9993_v27  ;;  %v511_v36 = vcombine.high %v503_v31, %v503_v31  ;;  %v519_v39 = vrot.slane %v503_v31, %v9993_v27  ;;  %v10044_v31 = vld [vmem:[#allocation2 + $0x30] sm:$0xff]  }
 0x2d7   :  { %v512_v37 = vcombine.high %v510_v32, %v510_v32  ;;  %v10000_v40 = vrot.slane %v510_v32, %v9993_v27  ;;  %v533_v46 = vrot.slane %v511_v36, %v9993_v27  ;;  %v541_v54 = vcombine.high %v519_v39, %v519_v39 }
 0x2d9   :  { %v10006_v47 = vrot.slane %v512_v37, %v9993_v27  ;;  %v542_v55 = vcombine.high %v10000_v40, %v10000_v40  ;;  %v543_v62 = vcombine.high %v533_v46, %v533_v46 }
 0x2da   :  { %v408_v29 = vpop.f32.mrb[8].mxu0 }
 0x2db   :  { %v8576_v30 = vpop.f32.mrb[9].mxu0  ;;  %v653_v35 = vcombine.high %v408_v29, %v408_v29  ;;  %v660_v38 = vrot.slane %v408_v29, %v9993_v27  ;;  %v544_v0 = vcombine.high %v10006_v47, %v10006_v47 }
 0x2dc   :  { %v411_v33 = vpop.f32.mrb[10].mxu0 }
 0x2dd   :  { %v8577_v34 = vpop.f32.mrb[11].mxu0  ;;  %v667_v41 = vrot.slane %v653_v35, %v9993_v27  ;;  %v668_v49 = vcombine.high %v660_v38, %v660_v38  ;;  %v10013_v57 = vrot.slane %v660_v38, %v9993_v27 }
 0x2df   :  { %v669_v56 = vcombine.high %v667_v41, %v667_v41  ;;  %v10020_v1 = vrot.slane %v667_v41, %v9993_v27  ;;  %v10024_v3 = vrot.slane %v668_v49, %v9993_v27  ;;  %v698_v8 = vcombine.high %v10013_v57, %v10013_v57 }
 0x2e1   :  { %v10029_v7 = vrot.slane %v669_v56, %v9993_v27  ;;  %v700_v38 = vcombine.high %v10024_v3, %v10024_v3 }
 0x2e2   :  { %v449_v42 = vpop.f32.mrb[12].mxu0 }
 0x2e3   :  { %v554_v43 = vcombine.high %v449_v42, %v449_v42  ;;  %v561_v44 = vrot.slane %v449_v42, %v9993_v27  ;;  %v8582_v45 = vpop.f32.mrb[13].mxu0 }
 0x2e4   :  { %v452_v48 = vpop.f32.mrb[14].mxu0 }
 0x2e5   :  { %v568_v50 = vrot.slane %v554_v43, %v9993_v27  ;;  %v569_v51 = vcombine.high %v561_v44, %v561_v44  ;;  %v577_v52 = vrot.slane %v561_v44, %v9993_v27  ;;  %v8583_v53 = vpop.f32.mrb[15].mxu0  ;;  %v10060_v44 = vld [vmem:[#allocation2 + $0x28] sm:$0xff]  }
 0x2e7   :  { %v570_v58 = vcombine.high %v568_v50, %v568_v50  ;;  %v584_v59 = vrot.slane %v568_v50, %v9993_v27  ;;  %v591_v60 = vrot.slane %v569_v51, %v9993_v27  ;;  %v599_v61 = vcombine.high %v577_v52, %v577_v52 }
 0x2e8   :  { %v606_v2 = vrot.slane %v577_v52, %v9931_v14  ;;  %v10069_v52 = vld [vmem:[#allocation2 + $0x38] sm:$0xff]  }
 0x2e9   :  { %v598_v4 = vrot.slane %v570_v58, %v9993_v27  ;;  %v601_v5 = vcombine.high %v591_v60, %v591_v60  ;;  %v610_v6 = vrot.slane %v591_v60, %v9931_v14  ;;  %v614_v9 = vrot.slane %v599_v61, %v9931_v14 }
 0x2ea   :  { %v644_v12 = vsel %vm643_vm5, %v519_v39, %v606_v2  ;;  %v489_v15 = vpop.f32.mrb[16].mxu0  ;;  %v600_v20 = vcombine.high %v584_v59, %v584_v59  ;;  %v622_v22 = vrot.slane %v584_v59, %v9931_v14 }
 0x2eb   :  { %v618_v21 = vrot.slane %v601_v5, %v9931_v14  ;;  %v626_v23 = vrot.slane %v598_v4, %v9931_v14  ;;  %v8588_v25 = vpop.f32.mrb[17].mxu0  ;;  %v10040_v26 = vpack.c.bf16 %v644_v12, %v644_v12  ;;  %v711_v28 = vcombine.high %v489_v15, %v489_v15 }
 0x2ec   :  { %v718_v29 = vrot.slane %v489_v15, %v9993_v27  ;;  %v645_v30 = vsel %vm643_vm5, %v533_v46, %v610_v6  ;;  %v492_v32 = vpop.f32.mrb[18].mxu0  ;;  %v602_v33 = vcombine.high %v598_v4, %v598_v4  ;;  %v646_v35 = vsel %vm643_vm5, %v541_v54, %v614_v9  ;;  %v10089_v4 = vld [vmem:[#allocation2 + $0x40] sm:$0xff]  }
 0x2ed   :  { %v10046_v34 = vpack.c.bf16 %v645_v30, %v645_v30  ;;  %v647_v36 = vsel %vm643_vm5, %v543_v62, %v618_v21  ;;  %v8589_v37 = vpop.f32.mrb[19].mxu0  ;;  %v725_v39 = vrot.slane %v711_v28, %v9993_v27  ;;  %8595 = vmatmul.mubr.msk.bf16.vlgmr.msra.gmra.mrb[4].mxu1 %vm828_vm6, %v10040_v26  ;;  %v630_v43 = vrot.slane %v600_v20, %v9931_v14  ;;  %v10097_v20 = vld [vmem:[#allocation2 + $0x50] sm:$0xff]  }
 0x2ee   :  { %v726_v41 = vcombine.high %v718_v29, %v718_v29  ;;  %v734_v42 = vrot.slane %v718_v29, %v9993_v27  ;;  %8607 = vmatpush3.bf16.msra.mxu1 %v10038_v24  ;;  %v648_v45 = vsel %vm643_vm5, %v10000_v40, %v622_v22  ;;  %v649_v46 = vsel %vm643_vm5, %v10006_v47, %v626_v23  ;;  %v10120_v40 = vld [vmem:[#allocation2 + $0x48] sm:$0xff]   ;;  %v10177_v37 = vld [vmem:[#allocation2 + $0x78] sm:$0xff]  }
 0x2ef   :  { %8603 = vmatmul.mubr.msk.bf16.vlgmr.msra.gmra.mrb[20].mxu0 %vm828_vm6, %v10046_v34  ;;  %v727_v48 = vcombine.high %v725_v39, %v725_v39  ;;  %v741_v49 = vrot.slane %v725_v39, %v9993_v27  ;;  %v634_v53 = vrot.slane %v602_v33, %v9931_v14  ;;  %8608 = vmatprep.subr.bf16.mxu1 %v9859_v63 }
 0x2f0   :  { %v748_v50 = vrot.slane %v726_v41, %v9993_v27  ;;  %v756_v51 = vcombine.high %v734_v42, %v734_v42  ;;  %8615 = vmatpush3.bf16.msra.mxu0 %v10044_v31  ;;  %v763_v54 = vrot.slane %v734_v42, %v9931_v14  ;;  %v10075_v56 = vpack.c.bf16 %v646_v35, %v646_v35  ;;  %v10191_v41 = vld [vmem:[#allocation2 + $0x90] sm:$0xff]  }
 0x2f1   :  { %8616 = vmatprep.subr.bf16.mxu0 %v9859_v63  ;;  %v755_v58 = vrot.slane %v727_v48, %v9993_v27  ;;  %v757_v59 = vcombine.high %v741_v49, %v741_v49  ;;  %8610 = vmatprep.mubr.msk.bf16.mxu1 %vm9860_vm3, %v9859_v63  ;;  %v10091_v5 = vpack.c.bf16 %v647_v36, %v647_v36  ;;  %v10173_v36 = vld [vmem:[#allocation2 + $0x68] sm:$0xff]  }
 0x2f2   :  { %v758_v60 = vcombine.high %v748_v50, %v748_v50  ;;  %v767_v61 = vrot.slane %v748_v50, %v9931_v14  ;;  %v771_v62 = vrot.slane %v756_v51, %v9931_v14  ;;  %v10084_v2 = vsel %vm643_vm5, %v10013_v57, %v763_v54  ;;  %8609 = vmatpush3.bf16.msra.mxu1 %v10060_v44  ;;  %v10231_v51 = vld [vmem:[#allocation2 + $0xa8] sm:$0xff]   ;;  %v10243_v54 = vld [vmem:[#allocation2 + $0xc0] sm:$0xff]  }
 0x2f3   :  { %8618 = vmatprep.mubr.msk.bf16.mxu0 %vm9860_vm3, %v9859_v63  ;;  %v759_v6 = vcombine.high %v755_v58, %v755_v58  ;;  %v779_v12 = vrot.slane %v741_v49, %v9931_v14  ;;  %v783_v15 = vrot.slane %v755_v58, %v9931_v14  ;;  %v787_v21 = vrot.slane %v757_v59, %v9931_v14  ;;  %v10221_v49 = vld [vmem:[#allocation2 + $0xb0] sm:$0xff]  }
 0x2f4   :  { %v775_v9 = vrot.slane %v758_v60, %v9931_v14  ;;  %8617 = vmatpush3.bf16.msra.mxu0 %v10069_v52  ;;  %8622 = vmatprep.subr.bf16.mxu1 %v9859_v63  ;;  %v650_v22 = vsel %vm643_vm5, %v542_v55, %v630_v43  ;;  %v651_v23 = vsel %vm643_vm5, %v544_v0, %v634_v53  ;;  %v10201_v43 = vld [vmem:[#allocation2 + $0x88] sm:$0xff]   ;;  %v10235_v53 = vld [vmem:[#allocation2 + $0xb8] sm:$0xff]   ;;  %v10251_v59 = vld [vmem:[#allocation2 + $0xd0] sm:$0xff]  }
 0x2f5   :  { %8630 = vmatprep.subr.bf16.mxu0 %v9859_v63  ;;  %v791_v25 = vrot.slane %v759_v6, %v9931_v14  ;;  %8611 = vmatmul.mubr.msk.bf16.vlgmr.msra.gmra.mrb[8].mxu1 %vm828_vm6, %v10075_v56  ;;  %v801_v28 = vsel %vm643_vm5, %v10024_v3, %v767_v61  ;;  %v699_v29 = vcombine.high %v10020_v1, %v10020_v1  ;;  %v10135_v3 = vld [vmem:[#allocation2 + $0x58] sm:$0xff]   ;;  %v10260_v61 = vld [vmem:[#allocation2 + $0xc8] sm:$0xff]  }
 0x2f6   :  { %8623 = vmatpush3.bf16.msra.mxu1 %v10089_v4  ;;  %v10126_v47 = vsel %vm643_vm5, %v698_v8, %v771_v62  ;;  %v10129_v55 = vsel %vm643_vm5, %v700_v38, %v775_v9  ;;  %v701_v0 = vcombine.high %v10029_v7, %v10029_v7  ;;  %v10139_v30 = vsel %vm643_vm5, %v10020_v1, %v779_v12  ;;  %v10157_v1 = vld [vmem:[#allocation2 + $0x60] sm:$0xff]   ;;  %v10264_v62 = vld [vmem:[#allocation2 + $0xd8] sm:$0xff]   ;;  %v10278_v9 = vld [vmem:[#allocation2 + $0xf0] sm:$0xff]  }
 0x2f7   :  { %8619 = vmatmul.mubr.msk.bf16.vlgmr.msra.gmra.mrb[24].mxu0 %vm828_vm6, %v10091_v5  ;;  %8624 = vmatprep.subr.bf16.mxu1 %v9859_v63  ;;  %v10146_v57 = vsel %vm643_vm5, %v10029_v7, %v783_v15  ;;  %v10149_v8 = vsel %vm643_vm5, %v699_v29, %v787_v21  ;;  %v10160_v33 = vpack.c.bf16 %v648_v45, %v648_v45  ;;  %v10163_v7 = vld [vmem:[#allocation2 + $0x70] sm:$0xff]   ;;  %v10185_v38 = vld [vmem:[#allocation2 + $0x80] sm:$0xff]   ;;  %v10205_v45 = vld [vmem:[#allocation2 + $0x98] sm:$0xff]  }
 0x2f8   :  { %8631 = vmatpush3.bf16.msra.mxu0 %v10097_v20  ;;  %8626 = vmatprep.mubr.msk.bf16.mxu1 %vm9860_vm3, %v9859_v63  ;;  %v10154_v32 = vsel %vm643_vm5, %v701_v0, %v791_v25  ;;  %v10165_v35 = vpack.c.bf16 %v649_v46, %v649_v46  ;;  %v10188_v39 = vpack.c.bf16 %v650_v22, %v650_v22  ;;  %v10213_v46 = vld [vmem:[#allocation2 + $0xa0] sm:$0xff]   ;;  %v10286_v15 = vld [vmem:[#allocation2 + $0xe8] sm:$0xff]   ;;  %v10290_v21 = vld [vmem:[#allocation2 + $0xf8] sm:$0xff]  }
 0x2f9   :  { %8632 = vmatprep.subr.bf16.mxu0 %v9859_v63  ;;  %8634 = vmatprep.mubr.msk.bf16.mxu0 %vm9860_vm3, %v9859_v63  ;;  %v10193_v42 = vpack.c.bf16 %v651_v23, %v651_v23  ;;  %v10217_v48 = vpack.c.bf16 %v10084_v2, %v10084_v2  ;;  %v10223_v50 = vpack.c.bf16 %v801_v28, %v801_v28  ;;  %v10272_v2 = vld [vmem:[#allocation2 + $0xe0] sm:$0xff]  }
 0x2fa   :  { %8625 = vmatpush3.bf16.msra.mxu1 %v10120_v40  ;;  %v10248_v58 = vpack.c.bf16 %v10126_v47, %v10126_v47  ;;  %v1260_v60 = vpack.c.bf16 %v10129_v55, %v10129_v55  ;;  %v1261_v6 = vpack.c.bf16 %v10139_v30, %v10139_v30  ;;  %v1262_v12 = vpack.c.bf16 %v10146_v57, %v10146_v57 }
 0x2fb   :  { %8638 = vmatprep.subr.bf16.mxu1 %v9859_v63  ;;  %v1263_v22 = vpack.c.bf16 %v10149_v8, %v10149_v8  ;;  %v1264_v23 = vpack.c.bf16 %v10154_v32, %v10154_v32 }
 0x2fc   :  { %8633 = vmatpush3.bf16.msra.mxu0 %v10135_v3 }
 0x2fd   :  { %8646 = vmatprep.subr.bf16.mxu0 %v9859_v63  ;;  %8627 = vmatmul.mubr.msk.bf16.vlgmr.msra.gmra.mrb[12].mxu1 %vm828_vm6, %v10160_v33 }
 0x2fe   :  { %8639 = vmatpush3.bf16.msra.mxu1 %v10157_v1  ;;  %8642 = vmatprep.mubr.msk.bf16.mxu1 %vm9860_vm3, %v9859_v63 }
 0x2ff   :  { %8635 = vmatmul.mubr.msk.bf16.vlgmr.msra.gmra.mrb[28].mxu0 %vm828_vm6, %v10165_v35  ;;  %8640 = vmatprep.subr.bf16.mxu1 %v9859_v63 }
 0x300   :  { %8647 = vmatpush3.bf16.msra.mxu0 %v10163_v7  ;;  %8650 = vmatprep.mubr.msk.bf16.mxu0 %vm9860_vm3, %v9859_v63 }
 0x301   :  { %8648 = vmatprep.subr.bf16.mxu0 %v9859_v63 }
 0x302   :  { %8641 = vmatpush3.bf16.msra.mxu1 %v10173_v36 }
 0x303   :  { %8654 = vmatprep.subr.bf16.mxu1 %v9859_v63 }
 0x304   :  { %8649 = vmatpush3.bf16.msra.mxu0 %v10177_v37 }
 0x305   :  { %8662 = vmatprep.subr.bf16.mxu0 %v9859_v63  ;;  %8643 = vmatmul.mubr.msk.bf16.vlgmr.msra.gmra.mrb[16].mxu1 %vm828_vm6, %v10188_v39 }
 0x306   :  { %8655 = vmatpush3.bf16.msra.mxu1 %v10185_v38  ;;  %8658 = vmatprep.mubr.msk.bf16.mxu1 %vm9860_vm3, %v9859_v63 }
 0x307   :  { %8651 = vmatmul.mubr.msk.bf16.vlgmr.msra.gmra.mrb[32].mxu0 %vm828_vm6, %v10193_v42  ;;  %8656 = vmatprep.subr.bf16.mxu1 %v9859_v63 }
 0x308   :  { %8663 = vmatpush3.bf16.msra.mxu0 %v10191_v41  ;;  %8666 = vmatprep.mubr.msk.bf16.mxu0 %vm9860_vm3, %v9859_v63 }
 0x309   :  { %8664 = vmatprep.subr.bf16.mxu0 %v9859_v63 }
 0x30a   :  { %8657 = vmatpush3.bf16.msra.mxu1 %v10201_v43 }
 0x30b   :  { %8670 = vmatprep.subr.bf16.mxu1 %v9859_v63 }
 0x30c   :  { %8665 = vmatpush3.bf16.msra.mxu0 %v10205_v45 }
 0x30d   :  { %8678 = vmatprep.subr.bf16.mxu0 %v9859_v63  ;;  %8659 = vmatmul.mubr.msk.bf16.vlgmr.msra.gmra.mrb[20].mxu1 %vm828_vm6, %v10217_v48 }
 0x30e   :  { %8671 = vmatpush3.bf16.msra.mxu1 %v10213_v46  ;;  %8674 = vmatprep.mubr.msk.bf16.mxu1 %vm9860_vm3, %v9859_v63 }
 0x30f   :  { %8667 = vmatmul.mubr.msk.bf16.vlgmr.msra.gmra.mrb[36].mxu0 %vm828_vm6, %v10223_v50  ;;  %8672 = vmatprep.subr.bf16.mxu1 %v9859_v63 }
 0x310   :  { %8679 = vmatpush3.bf16.msra.mxu0 %v10221_v49  ;;  %8682 = vmatprep.mubr.msk.bf16.mxu0 %vm9860_vm3, %v9859_v63 }
 0x311   :  { %8680 = vmatprep.subr.bf16.mxu0 %v9859_v63 }
 0x312   :  { %8673 = vmatpush3.bf16.msra.mxu1 %v10231_v51 }
 0x313   :  { %8686 = vmatprep.subr.bf16.mxu1 %v9859_v63 }
 0x314   :  { %8681 = vmatpush3.bf16.msra.mxu0 %v10235_v53 }
 0x315   :  { %8694 = vmatprep.subr.bf16.mxu0 %v9859_v63  ;;  %8675 = vmatmul.mubr.msk.bf16.vlgmr.msra.gmra.mrb[24].mxu1 %vm828_vm6, %v10248_v58 }
 0x316   :  { %8687 = vmatpush3.bf16.msra.mxu1 %v10243_v54  ;;  %8690 = vmatprep.mubr.msk.bf16.mxu1 %vm9860_vm3, %v9859_v63 }
 0x317   :  { %8683 = vmatmul.mubr.msk.bf16.vlgmr.msra.gmra.mrb[40].mxu0 %vm828_vm6, %v1260_v60  ;;  %8688 = vmatprep.subr.bf16.mxu1 %v9859_v63 }
 0x318   :  { %8695 = vmatpush3.bf16.msra.mxu0 %v10251_v59  ;;  %8698 = vmatprep.mubr.msk.bf16.mxu0 %vm9860_vm3, %v9859_v63 }
 0x319   :  { %8696 = vmatprep.subr.bf16.mxu0 %v9859_v63 }
 0x31a   :  { %8689 = vmatpush3.bf16.msra.mxu1 %v10260_v61 }
 0x31b   :  { %8702 = vmatprep.subr.bf16.mxu1 %v9859_v63 }
 0x31c   :  { %8697 = vmatpush3.bf16.msra.mxu0 %v10264_v62 }
 0x31d   :  { %8710 = vmatprep.subr.bf16.mxu0 %v9859_v63  ;;  %8691 = vmatmul.mubr.msk.bf16.vlgmr.msra.gmra.mrb[28].mxu1 %vm828_vm6, %v1261_v6 }
 0x31e   :  { %8703 = vmatpush3.bf16.msra.mxu1 %v10272_v2  ;;  %8706 = vmatprep.mubr.msk.bf16.mxu1 %vm9860_vm3, %v9859_v63 }
 0x31f   :  { %8699 = vmatmul.mubr.msk.bf16.vlgmr.msra.gmra.mrb[44].mxu0 %vm828_vm6, %v1262_v12  ;;  %8704 = vmatprep.subr.bf16.mxu1 %v9859_v63 }
 0x320   :  { %8711 = vmatpush3.bf16.msra.mxu0 %v10278_v9  ;;  %8714 = vmatprep.mubr.msk.bf16.mxu0 %vm9860_vm3, %v9859_v63 }
 0x321   :  { %8712 = vmatprep.subr.bf16.mxu0 %v9859_v63 }
 0x322   :  { %8705 = vmatpush3.bf16.msra.mxu1 %v10286_v15 }
 0x323   :  { %8718 = vmatprep.subr.bf16.mxu1 %v9859_v63 }
 0x324   :  { %8713 = vmatpush3.bf16.msra.mxu0 %v10290_v21 }
 0x325   :  { %8726 = vmatprep.subr.bf16.mxu0 %v9859_v63  ;;  %8707 = vmatmul.mubr.msk.bf16.vlgmr.msra.gmra.mrb[32].mxu1 %vm828_vm6, %v1263_v22 }
 0x326   :  { %8719 = vmatpush3.bf16.msra.mxu1 %v9976_v16  ;;  %8722 = vmatprep.mubr.msk.bf16.mxu1 %vm9860_vm3, %v9859_v63 }
 0x327   :  { %8715 = vmatmul.mubr.msk.bf16.vlgmr.msra.gmra.mrb[48].mxu0 %vm828_vm6, %v1264_v23  ;;  %8720 = vmatprep.subr.bf16.mxu1 %v9859_v63 }
 0x328   :  { %8727 = vmatpush3.bf16.msra.mxu0 %v9979_v17  ;;  %8730 = vmatprep.mubr.msk.bf16.mxu0 %vm9860_vm3, %v9859_v63 }
 0x329   :  { %8728 = vmatprep.subr.bf16.mxu0 %v9859_v63 }
 0x32a   :  { %8721 = vmatpush3.bf16.msra.mxu1 %v9983_v18 }
 0x32b   :  { %8734 = vmatprep.subr.bf16.mxu1 %v9859_v63 }
 0x32c   :  { %8729 = vmatpush3.bf16.msra.mxu0 %v9987_v19 }
 0x32d   :  { %8742 = vmatprep.subr.bf16.mxu0 %v9859_v63  ;;  %8723 = vmatmul.mubr.msk.bf16.vlgmr.msra.gmra.mrb[36].mxu1 %vm828_vm6, %v10217_v48 }
 0x32e   :  { %8735 = vmatpush3.bf16.msra.mxu1 %v10038_v24  ;;  %8738 = vmatprep.mubr.msk.bf16.mxu1 %vm9860_vm3, %v9859_v63 }
 0x32f   :  { %8731 = vmatmul.mubr.msk.bf16.vlgmr.msra.gmra.mrb[52].mxu0 %vm828_vm6, %v10223_v50  ;;  %8736 = vmatprep.subr.bf16.mxu1 %v9859_v63 }
 0x330   :  { %8743 = vmatpush3.bf16.msra.mxu0 %v10044_v31  ;;  %8746 = vmatprep.mubr.msk.bf16.mxu0 %vm9860_vm3, %v9859_v63 }
 0x331   :  { %8744 = vmatprep.subr.bf16.mxu0 %v9859_v63 }
 0x332   :  { %8737 = vmatpush3.bf16.msra.mxu1 %v10060_v44 }
 0x333   :  { %8750 = vmatprep.subr.bf16.mxu1 %v9859_v63 }
 0x334   :  { %8745 = vmatpush3.bf16.msra.mxu0 %v10069_v52 }
 0x335   :  { %8758 = vmatprep.subr.bf16.mxu0 %v9859_v63  ;;  %8739 = vmatmul.mubr.msk.bf16.vlgmr.msra.gmra.mrb[40].mxu1 %vm828_vm6, %v10248_v58 }
 0x336   :  { %8751 = vmatpush3.bf16.msra.mxu1 %v10089_v4  ;;  %8754 = vmatprep.mubr.msk.bf16.mxu1 %vm9860_vm3, %v9859_v63 }
 0x337   :  { %8747 = vmatmul.mubr.msk.bf16.vlgmr.msra.gmra.mrb[56].mxu0 %vm828_vm6, %v1260_v60  ;;  %8752 = vmatprep.subr.bf16.mxu1 %v9859_v63 }
 0x338   :  { %8759 = vmatpush3.bf16.msra.mxu0 %v10097_v20  ;;  %8762 = vmatprep.mubr.msk.bf16.mxu0 %vm9860_vm3, %v9859_v63 }
 0x339   :  { %8760 = vmatprep.subr.bf16.mxu0 %v9859_v63 }
 0x33a   :  { %8753 = vmatpush3.bf16.msra.mxu1 %v10120_v40 }
 0x33b   :  { %8766 = vmatprep.subr.bf16.mxu1 %v9859_v63 }
 0x33c   :  { %8761 = vmatpush3.bf16.msra.mxu0 %v10135_v3 }
 0x33d   :  { %8774 = vmatprep.subr.bf16.mxu0 %v9859_v63  ;;  %8755 = vmatmul.mubr.msk.bf16.vlgmr.msra.gmra.mrb[44].mxu1 %vm828_vm6, %v1261_v6 }
 0x33e   :  { %8767 = vmatpush3.bf16.msra.mxu1 %v10157_v1  ;;  %8770 = vmatprep.mubr.msk.bf16.mxu1 %vm9860_vm3, %v9859_v63 }
 0x33f   :  { %8763 = vmatmul.mubr.msk.bf16.vlgmr.msra.gmra.mrb[60].mxu0 %vm828_vm6, %v1262_v12  ;;  %8768 = vmatprep.subr.bf16.mxu1 %v9859_v63 }
 0x340   :  { %8775 = vmatpush3.bf16.msra.mxu0 %v10163_v7  ;;  %8778 = vmatprep.mubr.msk.bf16.mxu0 %vm9860_vm3, %v9859_v63 }
 0x341   :  { %8776 = vmatprep.subr.bf16.mxu0 %v9859_v63 }
 0x342   :  { %8769 = vmatpush3.bf16.msra.mxu1 %v10173_v36 }
 0x343   :  { %8782 = vmatprep.subr.bf16.mxu1 %v9859_v63 }
 0x344   :  { %8777 = vmatpush3.bf16.msra.mxu0 %v10177_v37 }
 0x345   :  { %8790 = vmatprep.subr.bf16.mxu0 %v9859_v63  ;;  %8771 = vmatmul.mubr.msk.bf16.vlgmr.msra.gmra.mrb[48].mxu1 %vm828_vm6, %v1263_v22 }
 0x346   :  { %8783 = vmatpush3.bf16.msra.mxu1 %v10185_v38  ;;  %8786 = vmatprep.mubr.msk.bf16.mxu1 %vm9860_vm3, %v9859_v63 }
 0x347   :  { %8779 = vmatmul.mubr.msk.bf16.vlgmr.msra.gmra.mrb[64].mxu0 %vm828_vm6, %v1264_v23  ;;  %8784 = vmatprep.subr.bf16.mxu1 %v9859_v63 }
 0x348   :  { %8791 = vmatpush3.bf16.msra.mxu0 %v10191_v41  ;;  %8794 = vmatprep.mubr.msk.bf16.mxu0 %vm9860_vm3, %v9859_v63 }
 0x349   :  { %8792 = vmatprep.subr.bf16.mxu0 %v9859_v63 }
 0x34a   :  { %8785 = vmatpush3.bf16.msra.mxu1 %v10201_v43 }
 0x34b   :  { %8798 = vmatprep.subr.bf16.mxu1 %v9859_v63 }
 0x34c   :  { %8793 = vmatpush3.bf16.msra.mxu0 %v10205_v45 }
 0x34d   :  { %8806 = vmatprep.subr.bf16.mxu0 %v9859_v63  ;;  %8787 = vmatmul.mubr.msk.bf16.vlgmr.msra.gmra.mrb[36].mxu1 %vm828_vm6, %v10040_v26 }
 0x34e   :  { %8799 = vmatpush3.bf16.msra.mxu1 %v10213_v46  ;;  %8802 = vmatprep.mubr.msk.bf16.mxu1 %vm9860_vm3, %v9859_v63 }
 0x34f   :  { %8795 = vmatmul.mubr.msk.bf16.vlgmr.msra.gmra.mrb[52].mxu0 %vm828_vm6, %v10046_v34  ;;  %8800 = vmatprep.subr.bf16.mxu1 %v9859_v63 }
 0x350   :  { %8807 = vmatpush3.bf16.msra.mxu0 %v10221_v49  ;;  %8810 = vmatprep.mubr.msk.bf16.mxu0 %vm9860_vm3, %v9859_v63 }
 0x351   :  { %8808 = vmatprep.subr.bf16.mxu0 %v9859_v63 }
 0x352   :  { %8801 = vmatpush3.bf16.msra.mxu1 %v10231_v51 }
 0x353   :  { %8814 = vmatprep.subr.bf16.mxu1 %v9859_v63 }
 0x354   :  { %8809 = vmatpush3.bf16.msra.mxu0 %v10235_v53 }
 0x355   :  { %8822 = vmatprep.subr.bf16.mxu0 %v9859_v63  ;;  %8803 = vmatmul.mubr.msk.bf16.vlgmr.msra.gmra.mrb[40].mxu1 %vm828_vm6, %v10075_v56 }
 0x356   :  { %8815 = vmatpush3.bf16.msra.mxu1 %v10243_v54  ;;  %8818 = vmatprep.mubr.msk.bf16.mxu1 %vm9860_vm3, %v9859_v63 }
 0x357   :  { %8811 = vmatmul.mubr.msk.bf16.vlgmr.msra.gmra.mrb[56].mxu0 %vm828_vm6, %v10091_v5  ;;  %8816 = vmatprep.subr.bf16.mxu1 %v9859_v63 }
 0x358   :  { %8823 = vmatpush3.bf16.msra.mxu0 %v10251_v59  ;;  %8826 = vmatprep.mubr.msk.bf16.mxu0 %vm9860_vm3, %v9859_v63 }
 0x359   :  { %8824 = vmatprep.subr.bf16.mxu0 %v9859_v63 }
 0x35a   :  { %8817 = vmatpush3.bf16.msra.mxu1 %v10260_v61 }
 0x35b   :  { %8830 = vmatprep.subr.bf16.mxu1 %v9859_v63 }
 0x35c   :  { %8825 = vmatpush3.bf16.msra.mxu0 %v10264_v62 }
 0x35d   :  { %8838 = vmatprep.subr.bf16.mxu0 %v9859_v63  ;;  %8819 = vmatmul.mubr.msk.bf16.vlgmr.msra.gmra.mrb[44].mxu1 %vm828_vm6, %v10160_v33 }
 0x35e   :  { %8831 = vmatpush3.bf16.msra.mxu1 %v10272_v2  ;;  %8834 = vmatprep.mubr.msk.bf16.mxu1 %vm9860_vm3, %v9859_v63 }
 0x35f   :  { %8827 = vmatmul.mubr.msk.bf16.vlgmr.msra.gmra.mrb[60].mxu0 %vm828_vm6, %v10165_v35  ;;  %8832 = vmatprep.subr.bf16.mxu1 %v9859_v63 }
 0x360   :  { %8839 = vmatpush3.bf16.msra.mxu0 %v10278_v9  ;;  %8842 = vmatprep.mubr.msk.bf16.mxu0 %vm9860_vm3, %v9859_v63 }
 0x361   :  { %8840 = vmatprep.subr.bf16.mxu0 %v9859_v63 }
 0x362   :  { %8833 = vmatpush3.bf16.msra.mxu1 %v10286_v15 }
 0x363   :  { %8846 = vmatprep.subr.bf16.mxu1 %v9859_v63 }
 0x364   :  { %8841 = vmatpush3.bf16.msra.mxu0 %v10290_v21 }
 0x365   :  { %8858 = vmatprep.subr.bf16.mxu0 %v9859_v63  ;;  %8835 = vmatmul.mubr.msk.bf16.vlgmr.msra.gmra.mrb[48].mxu1 %vm828_vm6, %v10188_v39 }
 0x366   :  { %8848 = vmatprep.mubr.msk.bf16.mxu1 %vm9860_vm3, %v9859_v63 }
 0x367   :  { %8843 = vmatmul.mubr.msk.bf16.vlgmr.msra.gmra.mrb[64].mxu0 %vm828_vm6, %v10193_v42 }
 0x368   :  { %8860 = vmatprep.mubr.msk.bf16.mxu0 %vm9860_vm3, %v9859_v63 }
 0x3c0   :  { %v866_v16 = vpop.f32.mrb[4].mxu1 }
 0x3c1   :  { %v8596_v17 = vpop.f32.mrb[5].mxu1 }
 0x3c2   :  { %v921_v18 = vpop.f32.mrb[20].mxu0  ;;  %v869_v19 = vpop.f32.mrb[6].mxu1 }
 0x3c3   :  { %v8604_v24 = vpop.f32.mrb[21].mxu0  ;;  %v8597_v26 = vpop.f32.mrb[7].mxu1 }
 0x3c4   :  { %v924_v31 = vpop.f32.mrb[22].mxu0 }
 0x3c5   :  { %v8605_v34 = vpop.f32.mrb[23].mxu0 }
 0x3c8   :  { %v976_v44 = vpop.f32.mrb[8].mxu1 }
 0x3c9   :  { %v8612_v52 = vpop.f32.mrb[9].mxu1 }
 0x3ca   :  { %v1031_v56 = vpop.f32.mrb[24].mxu0  ;;  %v979_v4 = vpop.f32.mrb[10].mxu1 }
 0x3cb   :  { %v8620_v5 = vpop.f32.mrb[25].mxu0  ;;  %v8613_v20 = vpop.f32.mrb[11].mxu1 }
 0x3cc   :  { %v1034_v25 = vpop.f32.mrb[26].mxu0 }
 0x3cd   :  { %v8621_v28 = vpop.f32.mrb[27].mxu0 }
 0x3d0   :  { %v1086_v29 = vpop.f32.mrb[12].mxu1 }
 0x3d1   :  { %v8628_v40 = vpop.f32.mrb[13].mxu1 }
 0x3d2   :  { %v1141_v47 = vpop.f32.mrb[28].mxu0  ;;  %v1089_v55 = vpop.f32.mrb[14].mxu1 }
 0x3d3   :  { %v8636_v0 = vpop.f32.mrb[29].mxu0  ;;  %v8629_v3 = vpop.f32.mrb[15].mxu1 }
 0x3d4   :  { %v1144_v30 = vpop.f32.mrb[30].mxu0 }
 0x3d5   :  { %v8637_v57 = vpop.f32.mrb[31].mxu0 }
 0x3d8   :  { %v10434_v8 = vpop.f32.mrb[16].mxu1 }
 0x3d9   :  { %v8644_v32 = vpop.f32.mrb[17].mxu1 }
 0x3da   :  { %v10436_v1 = vpop.f32.mrb[32].mxu0  ;;  %v1199_v33 = vpop.f32.mrb[18].mxu1 }
 0x3db   :  { %v8652_v7 = vpop.f32.mrb[33].mxu0  ;;  %v8645_v35 = vpop.f32.mrb[19].mxu1 }
 0x3dc   :  { %v1254_v36 = vpop.f32.mrb[34].mxu0 }
 0x3dd   :  { %v8653_v37 = vpop.f32.mrb[35].mxu0 }
 0x3e0   :  { %v1314_v38 = vpop.f32.mrb[20].mxu1 }
 0x3e1   :  { %v1705_v39 = vsub.f32 %v866_v16, %v1314_v38  ;;  %v8660_v41 = vpop.f32.mrb[21].mxu1 }
 0x3e2   :  { %v1369_v42 = vpop.f32.mrb[36].mxu0  ;;  %v1317_v43 = vpop.f32.mrb[22].mxu1 }
 0x3e3   :  { %v1706_v45 = vsub.f32 %v921_v18, %v1369_v42  ;;  %v8668_v46 = vpop.f32.mrb[37].mxu0  ;;  %v2353_v48 = vpack.c.bf16 %v1705_v39, %v1705_v39  ;;  %v8661_v49 = vpop.f32.mrb[23].mxu1 }
 0x3e4   :  { %v1372_v50 = vpop.f32.mrb[38].mxu0 }
 0x3e5   :  { %v2354_v51 = vpack.c.bf16 %v1706_v45, %v1706_v45  ;;  %v8669_v53 = vpop.f32.mrb[39].mxu0  ;;  %v2474_v54 = vunpack.c.l.b16 %v2353_v48 }
 0x3e7   :  { %v2475_v58 = vunpack.c.l.b16 %v2354_v51  ;;  %v2603_v59 = vrot.slane %v2474_v54, 1 }
 0x3e8   :  { %v1424_v61 = vpop.f32.mrb[24].mxu1 }
 0x3e9   :  { %v2482_v60 = vrot.slane %v2475_v58, 7  ;;  %v2604_v62 = vsel %vm2391_vm7, %v2475_v58, %v2603_v59  ;;  %v1707_v2 = vsub.f32 %v976_v44, %v1424_v61  ;;  %v8676_v6 = vpop.f32.mrb[25].mxu1 }
 0x3ea   :  { %v1479_v9 = vpop.f32.mrb[40].mxu0  ;;  %v1427_v15 = vpop.f32.mrb[26].mxu1 }
 0x3eb   :  { %v2483_v12 = vsel %vm2391_vm7, %v2482_v60, %v2474_v54  ;;  %v1708_v21 = vsub.f32 %v1031_v56, %v1479_v9  ;;  %v8684_v22 = vpop.f32.mrb[41].mxu0  ;;  %v2355_v23 = vpack.c.bf16 %v1707_v2, %v1707_v2  ;;  %v8677_v16 = vpop.f32.mrb[27].mxu1 }
 0x3ec   :  { %v1482_v17 = vpop.f32.mrb[42].mxu0 }
 0x3ed   :  { %v2356_v18 = vpack.c.bf16 %v1708_v21, %v1708_v21  ;;  %v8685_v19 = vpop.f32.mrb[43].mxu0  ;;  %v2476_v24 = vunpack.c.l.b16 %v2355_v23 }
 0x3ef   :  { %v2477_v26 = vunpack.c.l.b16 %v2356_v18  ;;  %v2484_v31 = vrot.slane %v2476_v24, 6  ;;  %v2605_v34 = vrot.slane %v2476_v24, 7 }
 0x3f0   :  { %v1534_v4 = vpop.f32.mrb[28].mxu1 }
 0x3f1   :  { %v2486_v52 = vrot.slane %v2477_v26, 5  ;;  %v2607_v44 = vrot.slane %v2477_v26, 6  ;;  %v2485_v5 = vsel %vm2394_vm8, %v2484_v31, %v2483_v12  ;;  %v2606_v20 = vsel %vm2394_vm8, %v2605_v34, %v2604_v62  ;;  %v8692_v25 = vpop.f32.mrb[29].mxu1 }
 0x3f2   :  { %v1709_v56 = vsub.f32 %v1086_v29, %v1534_v4  ;;  %v1589_v28 = vpop.f32.mrb[44].mxu0  ;;  %v1537_v0 = vpop.f32.mrb[30].mxu1 }
 0x3f3   :  { %v2487_v40 = vsel %vm2397_vm9, %v2486_v52, %v2485_v5  ;;  %v2608_v55 = vsel %vm2397_vm9, %v2607_v44, %v2606_v20  ;;  %v1710_v3 = vsub.f32 %v1141_v47, %v1589_v28  ;;  %v8700_v30 = vpop.f32.mrb[45].mxu0  ;;  %v8693_v32 = vpop.f32.mrb[31].mxu1 }
 0x3f4   :  { %v2357_v57 = vpack.c.bf16 %v1709_v56, %v1709_v56  ;;  %v1592_v33 = vpop.f32.mrb[46].mxu0 }
 0x3f5   :  { %v2358_v7 = vpack.c.bf16 %v1710_v3, %v1710_v3  ;;  %v8701_v35 = vpop.f32.mrb[47].mxu0 }
 0x3f6   :  { %v2478_v36 = vunpack.c.l.b16 %v2357_v57 }
 0x3f7   :  { %v2479_v37 = vunpack.c.l.b16 %v2358_v7 }
 0x3f8   :  { %v2488_v38 = vrot.slane %v2478_v36, 4  ;;  %v2609_v39 = vrot.slane %v2478_v36, 5  ;;  %v1644_v42 = vpop.f32.mrb[32].mxu1 }
 0x3f9   :  { %v2490_v29 = vrot.slane %v2479_v37, 3  ;;  %v2611_v41 = vrot.slane %v2479_v37, 4  ;;  %v1711_v47 = vsub.f32 %v10434_v8, %v1644_v42  ;;  %v8708_v46 = vpop.f32.mrb[33].mxu1 }
 0x3fa   :  { %v2489_v43 = vsel %vm2400_vm10, %v2488_v38, %v2487_v40  ;;  %v2610_v45 = vsel %vm2400_vm10, %v2609_v39, %v2608_v55  ;;  %v1699_v48 = vpop.f32.mrb[48].mxu0  ;;  %v1647_v51 = vpop.f32.mrb[34].mxu1 }
 0x3fb   :  { %v2491_v49 = vsel %vm2403_vm11, %v2490_v29, %v2489_v43  ;;  %v2612_v50 = vsel %vm2403_vm11, %v2611_v41, %v2610_v45  ;;  %v1712_v53 = vsub.f32 %v10436_v1, %v1699_v48  ;;  %v8716_v54 = vpop.f32.mrb[49].mxu0  ;;  %v2359_v58 = vpack.c.bf16 %v1711_v47, %v1711_v47  ;;  %v8709_v59 = vpop.f32.mrb[35].mxu1 }
 0x3fc   :  { %v1702_v60 = vpop.f32.mrb[50].mxu0 }
 0x3fd   :  { %v2360_v61 = vpack.c.bf16 %v1712_v53, %v1712_v53  ;;  %v8717_v62 = vpop.f32.mrb[51].mxu0  ;;  %v2480_v2 = vunpack.c.l.b16 %v2359_v58 }
 0x3ff   :  { %v2481_v6 = vunpack.c.l.b16 %v2360_v61  ;;  %v2492_v9 = vrot.slane %v2480_v2, 2  ;;  %v2613_v8 = vrot.slane %v2480_v2, 3 }
 0x401   :  { %v2494_v12 = vrot.slane %v2481_v6, 1  ;;  %v2615_v15 = vrot.slane %v2481_v6, 2  ;;  %v2493_v21 = vsel %vm2406_vm12, %v2492_v9, %v2491_v49  ;;  %v2614_v22 = vsel %vm2406_vm12, %v2613_v8, %v2612_v50 }
 0x403   :  { %v10453_v1 = vsel %vm2409_vm13, %v2494_v12, %v2493_v21  ;;  %v10456_v23 = vsel %vm2409_vm13, %v2615_v15, %v2614_v22 }
 0x420   :  { %v2067_v16 = vpop.f32.mrb[36].mxu1 }
 0x421   :  { %v2361_v17 = vpack.c.bf16 %v2067_v16, %v2067_v16  ;;  %v8788_v18 = vpop.f32.mrb[37].mxu1 }
 0x422   :  { %v2107_v19 = vpop.f32.mrb[52].mxu0  ;;  %v2070_v24 = vpop.f32.mrb[38].mxu1 }
 0x423   :  { %v2362_v26 = vpack.c.bf16 %v2107_v19, %v2107_v19  ;;  %v8796_v31 = vpop.f32.mrb[53].mxu0  ;;  %v2382_v34 = vunpack.c.l.b16 %v2361_v17  ;;  %v8789_v52 = vpop.f32.mrb[39].mxu1 }
 0x424   :  { %v2110_v44 = vpop.f32.mrb[54].mxu0 }
 0x425   :  { %v2383_v4 = vunpack.c.l.b16 %v2362_v26  ;;  %v8797_v5 = vpop.f32.mrb[55].mxu0  ;;  %v2544_v20 = vrot.slane %v2382_v34, 1 }
 0x427   :  { %v2390_v56 = vrot.slane %v2383_v4, 7  ;;  %v2545_v25 = vsel %vm2391_vm7, %v2383_v4, %v2544_v20 }
 0x428   :  { %v2147_v40 = vpop.f32.mrb[40].mxu1 }
 0x429   :  { %v2392_v28 = vsel %vm2391_vm7, %v2390_v56, %v2382_v34  ;;  %v2363_v55 = vpack.c.bf16 %v2147_v40, %v2147_v40  ;;  %v8804_v0 = vpop.f32.mrb[41].mxu1 }
 0x42a   :  { %v2187_v3 = vpop.f32.mrb[56].mxu0  ;;  %v2150_v30 = vpop.f32.mrb[42].mxu1 }
 0x42b   :  { %v2364_v57 = vpack.c.bf16 %v2187_v3, %v2187_v3  ;;  %v8812_v32 = vpop.f32.mrb[57].mxu0  ;;  %v2384_v33 = vunpack.c.l.b16 %v2363_v55  ;;  %v8805_v7 = vpop.f32.mrb[43].mxu1 }
 0x42c   :  { %v2190_v35 = vpop.f32.mrb[58].mxu0  ;;  %v9686_v7 = vld [vmem:[%s11648_s1 + $0x18] sm:$0xff]  }
 0x42d   :  { %v2385_v36 = vunpack.c.l.b16 %v2364_v57  ;;  %v8813_v37 = vpop.f32.mrb[59].mxu0  ;;  %v2393_v38 = vrot.slane %v2384_v33, 6  ;;  %v2546_v39 = vrot.slane %v2384_v33, 7  ;;  %v2496_v35 = vpack.c.b16 %v10453_v1, %v10453_v1  ;;  %v9687_v1 = vld [vmem:[%s11648_s1 + $0x10] sm:$0xff]  }
 0x42e   :  { %v9688_v37 = vld [vmem:[#allocation4 + $0x40] sm:$0xff]  }
 0x42f   :  { %v2396_v29 = vrot.slane %v2385_v36, 5  ;;  %v2548_v41 = vrot.slane %v2385_v36, 6  ;;  %v2395_v42 = vsel %vm2394_vm8, %v2393_v38, %v2392_v28  ;;  %v2547_v43 = vsel %vm2394_vm8, %v2546_v39, %v2545_v25 }
 0x430   :  { %v2227_v46 = vpop.f32.mrb[44].mxu1  ;;  %v2617_v36 = vpack.c.b16 %v10456_v23, %v10456_v23  ;;  %v2501_v38 = vsel %vm2416_vm14, %v2496_v35, 0  ;;  %v9689_v23 = vld [vmem:[#allocation4 + $0x48] sm:$0xff]  }
 0x431   :  { %v2398_v45 = vsel %vm2397_vm9, %v2396_v29, %v2395_v42  ;;  %v2549_v47 = vsel %vm2397_vm9, %v2548_v41, %v2547_v43  ;;  %v2365_v48 = vpack.c.bf16 %v2227_v46, %v2227_v46  ;;  %v8820_v49 = vpop.f32.mrb[45].mxu1 }
 0x432   :  { %v2267_v50 = vpop.f32.mrb[60].mxu0  ;;  %v2230_v51 = vpop.f32.mrb[46].mxu1  ;;  %v2619_v39 = vsel %vm2416_vm14, %v2617_v36, 0  ;;  %v9796_v49 = vld [vmem:[%s11651_s4] sm:$0x7f] }
 0x433   :  { %v2366_v53 = vpack.c.bf16 %v2267_v50, %v2267_v50  ;;  %v8828_v54 = vpop.f32.mrb[61].mxu0  ;;  %v2386_v58 = vunpack.c.l.b16 %v2365_v48  ;;  %v8821_v59 = vpop.f32.mrb[47].mxu1 }
 0x434   :  { %v2270_v60 = vpop.f32.mrb[62].mxu0 }
 0x435   :  { %v2387_v61 = vunpack.c.l.b16 %v2366_v53  ;;  %v8829_v62 = vpop.f32.mrb[63].mxu0  ;;  %v2399_v2 = vrot.slane %v2386_v58, 4  ;;  %v2550_v6 = vrot.slane %v2386_v58, 5 }
 0x437   :  { %v2402_v9 = vrot.slane %v2387_v61, 3  ;;  %v2552_v8 = vrot.slane %v2387_v61, 4  ;;  %v2401_v12 = vsel %vm2400_vm10, %v2399_v2, %v2398_v45  ;;  %v2551_v15 = vsel %vm2400_vm10, %v2550_v6, %v2549_v47 }
 0x438   :  { %v2307_v16 = vpop.f32.mrb[48].mxu1  ;;  %v2669_v45 = vsub.s32 2, %v9928_v13 }
 0x439   :  { %v2404_v21 = vsel %vm2403_vm11, %v2402_v9, %v2401_v12  ;;  %v2553_v22 = vsel %vm2403_vm11, %v2552_v8, %v2551_v15  ;;  %v2367_v17 = vpack.c.bf16 %v2307_v16, %v2307_v16  ;;  %v8836_v18 = vpop.f32.mrb[49].mxu1 }
 0x43a   :  { %v2347_v19 = vpop.f32.mrb[64].mxu0  ;;  %v2310_v24 = vpop.f32.mrb[50].mxu1  ;;  %v2670_v50 = vrot.slane %v9796_v49, %v2669_v45  ;;  %v10543_v45 = vld [vmem:[#allocation2 + $0x110] sm:$0xff]  }
 0x43b   :  { %v2368_v26 = vpack.c.bf16 %v2347_v19, %v2347_v19  ;;  %v8844_v31 = vpop.f32.mrb[65].mxu0  ;;  %v2388_v34 = vunpack.c.l.b16 %v2367_v17  ;;  %v8837_v52 = vpop.f32.mrb[51].mxu1 }
 0x43c   :  { %v2350_v44 = vpop.f32.mrb[66].mxu0 }
 0x43d   :  { %v2389_v4 = vunpack.c.l.b16 %v2368_v26  ;;  %v8845_v5 = vpop.f32.mrb[67].mxu0  ;;  %v2405_v20 = vrot.slane %v2388_v34, 2  ;;  %v2554_v56 = vrot.slane %v2388_v34, 3 }
 0x43f   :  { %v2408_v25 = vrot.slane %v2389_v4, 1  ;;  %v2556_v28 = vrot.slane %v2389_v4, 2  ;;  %v2407_v40 = vsel %vm2406_vm12, %v2405_v20, %v2404_v21  ;;  %v2555_v55 = vsel %vm2406_vm12, %v2554_v56, %v2553_v22 }
 0x441   :  { %v2410_v0 = vsel %vm2409_vm13, %v2408_v25, %v2407_v40  ;;  %v2557_v3 = vsel %vm2409_vm13, %v2556_v28, %v2555_v55 }
 0x442   :  { %v2411_v30 = vpack.c.b16 %v2410_v0, %v2410_v0  ;;  %v2558_v57 = vpack.c.b16 %v2557_v3, %v2557_v3 }
 0x444   :  { %v2418_v32 = vsel %vm2416_vm14, %v2411_v30, 0  ;;  %v2560_v33 = vsel %vm2416_vm14, %v2558_v57, 0 }
 0x445   :  { %8847 = vmatpush3.bf16.msra.mxu1 %v2418_v32  ;;  %8859 = vmatpush3.bf16.msra.mxu0 %v2560_v33 }
 0x446   :  { %8852 = vmatprep.subr.bf16.mxu1 %v9859_v63  ;;  %8864 = vmatprep.subr.bf16.mxu0 %v9859_v63 }
 0x448   :  { %8849 = vmatmul.mubr.msk.bf16.vlgmr.msra.gmra.mrb[52].mxu1 %vm2412_vm15, %v9686_v7  ;;  %8861 = vmatmul.mubr.msk.bf16.vlgmr.msra.gmra.mrb[68].mxu0 %vm2412_vm15, %v9686_v7 }
 0x449   :  { %8853 = vmatpush3.bf16.msra.mxu1 %v2501_v38  ;;  %8865 = vmatpush3.bf16.msra.mxu0 %v2619_v39 }
 0x44a   :  { %8854 = vmatprep.mubr.msk.bf16.mxu1 %vm9860_vm3, %v9859_v63  ;;  %8870 = vmatprep.subr.bf16.mxu1 %v9688_v37 }
 0x44b   :  { %8866 = vmatprep.mubr.msk.bf16.mxu0 %vm9860_vm3, %v9859_v63  ;;  %8878 = vmatprep.subr.bf16.mxu0 %v9859_v63 }
 0x454   :  { %8855 = vmatmul.mubr.msk.bf16.vlgmr.msra.gmra.mrb[52].mxu1 %vm2412_vm15, %v9687_v1  ;;  %8867 = vmatmul.mubr.msk.bf16.vlgmr.msra.gmra.mrb[68].mxu0 %vm2412_vm15, %v9687_v1 }
 0x455   :  { %8871 = vmatpush3.bf16.msra.mxu1 %v9688_v37  ;;  %8874 = vmatprep.mubr.msk.bf16.mxu1 %vm828_vm6, %v9948_v11 }
 0x456   :  { %8872 = vmatprep.subr.bf16.mxu1 %v9689_v23  ;;  %8880 = vmatprep.mubr.msk.bf16.mxu0 %vm9860_vm3, %v9859_v63 }
 0x459   :  { %8873 = vmatpush3.bf16.msra.mxu1 %v9689_v23 }
 0x45a   :  { %8884 = vmatprep.subr.bf16.mxu1 %v9859_v63 }
 0x45c   :  { %8875 = vmatmul.mubr.msk.bf16.vlgmr.msra.gmra.mrb[56].mxu1 %vm828_vm6, %v9946_v10 }
 0x45d   :  { %8886 = vmatprep.mubr.msk.bf16.mxu1 %vm9860_vm3, %v9859_v63 }
 0x527   :  { %v2537_v29 = vpop.f32.mrb[52].mxu1  ;;  %v2655_v41 = vpop.f32.mrb[68].mxu0 }
 0x528   :  { %v8856_v42 = vpop.f32.mrb[53].mxu1  ;;  %v8868_v43 = vpop.f32.mrb[69].mxu0 }
 0x529   :  { %v2540_v11 = vpop.f32.mrb[54].mxu1  ;;  %v2658_v47 = vpop.f32.mrb[70].mxu0  ;;  %v9798_v42 = vld [vmem:[%s11648_s1 + $0x8] sm:$0xf] }
 0x52a   :  { %v8857_v46 = vpop.f32.mrb[55].mxu1  ;;  %v8869_v48 = vpop.f32.mrb[71].mxu0  ;;  %v10540_v43 = vld [vmem:[#allocation2 + $0x100] sm:$0xff]  }
 0x52f   :  { %v8876_v51 = vpop.f32.mrb[56].mxu1 }
 0x530   :  { %v2732_v10 = vadd.f32 %v8876_v51, %v2670_v50  ;;  %v2723_v53 = vpop.f32.mrb[57].mxu1 }
 0x531   :  { %v2724_v54 = vadd.f32 %v2723_v53, %v2670_v50  ;;  %v8877_v58 = vpop.f32.mrb[58].mxu1 }
 0x532   :  { %v2740_v59 = vadd.f32 %v2732_v10, %v2655_v41  ;;  %v2735_v60 = vadd.f32 %v8877_v58, %v2670_v50  ;;  %v2726_v61 = vpop.f32.mrb[59].mxu1  ;;  %v9797_v41 = vld [vmem:[%s11648_s1] sm:$0xf] }
 0x533   :  { %v2738_v62 = vadd.f32 %v2724_v54, %v2537_v29  ;;  %v2727_v2 = vadd.f32 %v2726_v61, %v2670_v50 }
 0x534   :  { %v2744_v6 = vmul.f32 %v2740_v59, %v2740_v59  ;;  %v2741_v9 = vadd.f32 %v2735_v60, %v2658_v47  ;;  %v10549_v47 = vld [vmem:[#allocation2 + $0x118] sm:$0xff]  }
 0x535   :  { %v2742_v8 = vmul.f32 %v2738_v62, %v2738_v62  ;;  %v2739_v12 = vadd.f32 %v2727_v2, %v2540_v11  ;;  %v10546_v11 = vld [vmem:[#allocation2 + $0x108] sm:$0xff]  }
 0x536   :  { %v2748_v15 = vmul.f32 %v2744_v6, %v2740_v59  ;;  %v2745_v21 = vmul.f32 %v2741_v9, %v2741_v9 }
 0x537   :  { %v2746_v22 = vmul.f32 %v2742_v8, %v2738_v62  ;;  %v2743_v16 = vmul.f32 %v2739_v12, %v2739_v12 }
 0x538   :  { %v2752_v17 = vmul.f32 0.044715, %v2748_v15  ;;  %v2749_v18 = vmul.f32 %v2745_v21, %v2741_v9 }
 0x539   :  { %v2750_v19 = vmul.f32 0.044715, %v2746_v22  ;;  %v2747_v24 = vmul.f32 %v2743_v16, %v2739_v12 }
 0x53a   :  { %v2756_v26 = vadd.f32 %v2752_v17, %v2740_v59  ;;  %v2753_v31 = vmul.f32 0.044715, %v2749_v18 }
 0x53b   :  { %v2754_v34 = vadd.f32 %v2750_v19, %v2738_v62  ;;  %v2751_v52 = vmul.f32 0.044715, %v2747_v24 }
 0x53c   :  { %v2760_v44 = vmul.f32 0.7978846, %v2756_v26  ;;  %v2757_v4 = vadd.f32 %v2753_v31, %v2741_v9 }
 0x53d   :  { %v2758_v5 = vmul.f32 0.7978846, %v2754_v34  ;;  %v2755_v20 = vadd.f32 %v2751_v52, %v2739_v12 }
 0x53e   :  { %9772 = vtanh.f32 %v2760_v44  ;;  %v2761_v56 = vmul.f32 0.7978846, %v2757_v4 }
 0x53f   :  { %9774 = vtanh.f32 %v2758_v5  ;;  %v2759_v25 = vmul.f32 0.7978846, %v2755_v20 }
 0x540   :  { %9776 = vtanh.f32 %v2761_v56 }
 0x541   :  { %9778 = vtanh.f32 %v2759_v25 }
 0x548   :  { %v9773_v28 = vpop.eup %9772 }
 0x549   :  { %v9775_v40 = vpop.eup %9774  ;;  %v2768_v55 = vadd.f32 1.0, %v9773_v28 }
 0x54a   :  { %v9777_v0 = vpop.eup %9776  ;;  %v2766_v3 = vadd.f32 1.0, %v9775_v40 }
 0x54b   :  { %v9779_v30 = vpop.eup %9778  ;;  %v2769_v57 = vadd.f32 1.0, %v9777_v0  ;;  %v2772_v32 = vmul.f32 0.5, %v2768_v55 }
 0x54c   :  { %v2767_v33 = vadd.f32 1.0, %v9779_v30  ;;  %v2770_v7 = vmul.f32 0.5, %v2766_v3 }
 0x54d   :  { %v2773_v35 = vmul.f32 0.5, %v2769_v57  ;;  %v2776_v37 = vmul.f32 %v2772_v32, %v2740_v59 }
 0x54e   :  { %v2771_v36 = vmul.f32 0.5, %v2767_v33  ;;  %v2774_v39 = vmul.f32 %v2770_v7, %v2738_v62 }
 0x54f   :  { %v2777_v38 = vmul.f32 %v2773_v35, %v2741_v9 }
 0x550   :  { %v2775_v1 = vmul.f32 %v2771_v36, %v2739_v12 }
 0x551   :  { %v10510_v23 = vpack.c.bf16 %v2777_v38, %v2776_v37 }
 0x552   :  { %v10512_v29 = vpack.c.bf16 %v2775_v1, %v2774_v39 }
 0x554   :  { %8879 = vmatpush3.bf16.msra.mxu0 %v10512_v29  ;;  %8885 = vmatpush3.bf16.msra.mxu1 %v10512_v29 }
 0x555   :  { %8890 = vmatprep.subr.bf16.mxu0 %v9859_v63  ;;  %8896 = vmatprep.subr.bf16.mxu1 %v9859_v63 }
 0x557   :  { %8881 = vmatmul.mubr.msk.bf16.vlgmr.msra.gmra.mrb[72].mxu0 %vm327_vm4, %v9797_v41  ;;  %8887 = vmatmul.mubr.msk.bf16.vlgmr.msra.gmra.mrb[60].mxu1 %vm327_vm4, %v9798_v42 }
 0x558   :  { %8891 = vmatpush3.bf16.msra.mxu0 %v10510_v23  ;;  %8897 = vmatpush3.bf16.msra.mxu1 %v10510_v23 }
 0x559   :  { %8892 = vmatprep.mubr.msk.bf16.mxu0 %vm9860_vm3, %v9859_v63  ;;  %8898 = vmatprep.mubr.msk.bf16.mxu1 %vm9860_vm3, %v9859_v63 }
 0x55a   :  { %8902 = vmatprep.subr.bf16.mxu0 %v9859_v63  ;;  %8910 = vmatprep.subr.bf16.mxu1 %v9859_v63 }
 0x55f   :  { %8893 = vmatmul.mubr.msk.bf16.vlgmr.msra.gmra.mrb[76].mxu0 %vm327_vm4, %v9797_v41  ;;  %8899 = vmatmul.mubr.msk.bf16.vlgmr.msra.gmra.mrb[64].mxu1 %vm327_vm4, %v9798_v42 }
 0x560   :  { %8906 = vmatprep.mubr.msk.bf16.mxu0 %vm9860_vm3, %v9859_v63  ;;  %8914 = vmatprep.mubr.msk.bf16.mxu1 %vm9860_vm3, %v9859_v63 }
 0x561   :  { %8903 = vmatpush3.bf16.msra.mxu0 %v10540_v43  ;;  %8911 = vmatpush3.bf16.msra.mxu1 %v10543_v45 }
 0x562   :  { %8904 = vmatprep.subr.bf16.mxu0 %v9859_v63  ;;  %8912 = vmatprep.subr.bf16.mxu1 %v9859_v63 }
 0x565   :  { %8905 = vmatpush3.bf16.msra.mxu0 %v10546_v11  ;;  %8913 = vmatpush3.bf16.msra.mxu1 %v10549_v47 }
 0x566   :  { %8918 = vmatprep.subr.bf16.mxu0 %v9859_v63  ;;  %8926 = vmatprep.subr.bf16.mxu1 %v9859_v63 }
 0x62a   :  { %v2879_v46 = vpop.f32.mrb[72].mxu0  ;;  %v2919_v48 = vpop.f32.mrb[60].mxu1 }
 0x62b   :  { %v3007_v49 = vcombine.high %v2879_v46, %v2879_v46  ;;  %v3014_v50 = vrot.slane %v2879_v46, %v9993_v27  ;;  %v8882_v51 = vpop.f32.mrb[73].mxu0  ;;  %v3163_v10 = vcombine.high %v2919_v48, %v2919_v48  ;;  %v8888_v53 = vpop.f32.mrb[61].mxu1  ;;  %v3170_v58 = vrot.slane %v2919_v48, %v9993_v27 }
 0x62c   :  { %v2882_v54 = vpop.f32.mrb[74].mxu0  ;;  %v2922_v59 = vpop.f32.mrb[62].mxu1 }
 0x62d   :  { %v3021_v60 = vrot.slane %v3007_v49, %v9993_v27  ;;  %v8883_v61 = vpop.f32.mrb[75].mxu0  ;;  %v8889_v62 = vpop.f32.mrb[63].mxu1  ;;  %v3022_v2 = vcombine.high %v3014_v50, %v3014_v50  ;;  %v3030_v6 = vrot.slane %v3014_v50, %v9993_v27  ;;  %v3177_v9 = vrot.slane %v3163_v10, %v9993_v27 }
 0x62e   :  { %v3178_v12 = vcombine.high %v3170_v58, %v3170_v58  ;;  %v10562_v15 = vrot.slane %v3170_v58, %v9993_v27  ;;  %v10602_v61 = vld [vmem:[#allocation2 + $0x120] sm:$0xff]  }
 0x62f   :  { %v3023_v8 = vcombine.high %v3021_v60, %v3021_v60  ;;  %v10565_v21 = vrot.slane %v3021_v60, %v9993_v27  ;;  %v3044_v22 = vrot.slane %v3022_v2, %v9993_v27  ;;  %v3052_v16 = vcombine.high %v3030_v6, %v3030_v6 }
 0x630   :  { %v3179_v18 = vcombine.high %v3177_v9, %v3177_v9  ;;  %v10570_v34 = vrot.slane %v3177_v9, %v9993_v27  ;;  %v10576_v20 = vrot.slane %v3178_v12, %v9993_v27  ;;  %v3208_v56 = vcombine.high %v10562_v15, %v10562_v15  ;;  %v10610_v12 = vld [vmem:[#allocation2 + $0x130] sm:$0xff]  }
 0x631   :  { %v10573_v4 = vrot.slane %v3023_v8, %v9993_v27  ;;  %v3053_v32 = vcombine.high %v10565_v21, %v10565_v21  ;;  %v3054_v33 = vcombine.high %v3044_v22, %v3044_v22 }
 0x632   :  { %v2960_v17 = vpop.f32.mrb[76].mxu0  ;;  %v3000_v19 = vpop.f32.mrb[64].mxu1  ;;  %v10587_v7 = vrot.slane %v3179_v18, %v9993_v27  ;;  %v3209_v41 = vcombine.high %v10570_v34, %v10570_v34  ;;  %v3210_v62 = vcombine.high %v10576_v20, %v10576_v20 }
 0x633   :  { %v3065_v24 = vcombine.high %v2960_v17, %v2960_v17  ;;  %v3072_v26 = vrot.slane %v2960_v17, %v9993_v27  ;;  %v8894_v31 = vpop.f32.mrb[77].mxu0  ;;  %v3221_v52 = vcombine.high %v3000_v19, %v3000_v19  ;;  %v8900_v44 = vpop.f32.mrb[65].mxu1  ;;  %v3228_v25 = vrot.slane %v3000_v19, %v9993_v27 }
 0x634   :  { %v2963_v5 = vpop.f32.mrb[78].mxu0  ;;  %v3003_v28 = vpop.f32.mrb[66].mxu1  ;;  %v3055_v18 = vcombine.high %v10573_v4, %v10573_v4 }
 0x635   :  { %v3079_v40 = vrot.slane %v3065_v24, %v9993_v27  ;;  %v3080_v55 = vcombine.high %v3072_v26, %v3072_v26  ;;  %v3088_v0 = vrot.slane %v3072_v26, %v9993_v27  ;;  %v8895_v3 = vpop.f32.mrb[79].mxu0  ;;  %v3235_v30 = vrot.slane %v3221_v52, %v9993_v27  ;;  %v8901_v57 = vpop.f32.mrb[67].mxu1  ;;  %v10627_v5 = vld [vmem:[#allocation2 + $0x128] sm:$0xff]  }
 0x636   :  { %v3236_v35 = vcombine.high %v3228_v25, %v3228_v25  ;;  %v3244_v46 = vrot.slane %v3228_v25, %v9993_v27 }
 0x637   :  { %v3081_v36 = vcombine.high %v3079_v40, %v3079_v40  ;;  %v3095_v37 = vrot.slane %v3079_v40, %v9993_v27  ;;  %v3102_v38 = vrot.slane %v3080_v55, %v9993_v27  ;;  %v3110_v39 = vcombine.high %v3088_v0, %v3088_v0  ;;  %v10632_v40 = vld [vmem:[#allocation2 + $0x138] sm:$0xff]  }
 0x638   :  { %v3117_v1 = vrot.slane %v3088_v0, %v9931_v14  ;;  %v3237_v42 = vcombine.high %v3235_v30, %v3235_v30  ;;  %v3251_v51 = vrot.slane %v3235_v30, %v9993_v27  ;;  %v3258_v58 = vrot.slane %v3236_v35, %v9993_v27 }
 0x639   :  { %v3109_v48 = vrot.slane %v3081_v36, %v9993_v27  ;;  %v3112_v49 = vcombine.high %v3102_v38, %v3102_v38  ;;  %v3121_v50 = vrot.slane %v3102_v38, %v9931_v14  ;;  %v3111_v10 = vcombine.high %v3095_v37, %v3095_v37 }
 0x63a   :  { %v3125_v53 = vrot.slane %v3110_v39, %v9931_v14  ;;  %v3154_v54 = vsel %vm643_vm5, %v3030_v6, %v3117_v1  ;;  %v3265_v2 = vrot.slane %v3237_v42, %v9993_v27  ;;  %v3266_v17 = vcombine.high %v3244_v46, %v3244_v46  ;;  %v10657_v1 = vld [vmem:[#allocation2 + $0x140] sm:$0xff]  }
 0x63b   :  { %v3113_v59 = vcombine.high %v3109_v48, %v3109_v48  ;;  %v3129_v60 = vrot.slane %v3112_v49, %v9931_v14  ;;  %v10607_v9 = vpack.c.bf16 %v3154_v54, %v3154_v54  ;;  %v3155_v8 = vsel %vm643_vm5, %v3044_v22, %v3121_v50 }
 0x63c   :  { %v3156_v6 = vsel %vm643_vm5, %v3052_v16, %v3125_v53  ;;  %v3133_v19 = vrot.slane %v3095_v37, %v9931_v14  ;;  %v10616_v24 = vpack.c.bf16 %v3155_v8, %v3155_v8  ;;  %v3137_v31 = vrot.slane %v3109_v48, %v9931_v14  ;;  %v10721_v53 = vld [vmem:[#allocation2 + $0x170] sm:$0xff]  }
 0x63d   :  { %v3157_v26 = vsel %vm643_vm5, %v3054_v33, %v3129_v60  ;;  %v3141_v52 = vrot.slane %v3111_v10, %v9931_v14  ;;  %8907 = vmatmul.mubr.msk.bf16.vlgmr.msra.gmra.mrb[80].mxu0 %vm828_vm6, %v10607_v9  ;;  %v3267_v22 = vcombine.high %v3251_v51, %v3251_v51  ;;  %v3268_v44 = vcombine.high %v3258_v58, %v3258_v58  ;;  %v10743_v60 = vld [vmem:[#allocation2 + $0x180] sm:$0xff]  }
 0x63e   :  { %v3145_v16 = vrot.slane %v3113_v59, %v9931_v14  ;;  %8919 = vmatpush3.bf16.msra.mxu0 %v10602_v61  ;;  %8915 = vmatmul.mubr.msk.bf16.vlgmr.msra.gmra.mrb[68].mxu1 %vm828_vm6, %v10616_v24  ;;  %v3269_v25 = vcombine.high %v3265_v2, %v3265_v2  ;;  %v3273_v28 = vrot.slane %v3244_v46, %v9931_v14  ;;  %v10735_v59 = vld [vmem:[#allocation2 + $0x178] sm:$0xff]  }
 0x63f   :  { %8927 = vmatpush3.bf16.msra.mxu1 %v10610_v12  ;;  %8920 = vmatprep.subr.bf16.mxu0 %v9859_v63  ;;  %v3277_v55 = vrot.slane %v3258_v58, %v9931_v14  ;;  %v3281_v0 = vrot.slane %v3266_v17, %v9931_v14  ;;  %v3285_v3 = vrot.slane %v3268_v44, %v9931_v14  ;;  %v10731_v58 = vld [vmem:[#allocation2 + $0x168] sm:$0xff]   ;;  %v10763_v17 = vld [vmem:[#allocation2 + $0x198] sm:$0xff]   ;;  %v10801_v44 = vld [vmem:[#allocation2 + $0x1c0] sm:$0xff]  }
 0x640   :  { %8928 = vmatprep.subr.bf16.mxu1 %v9859_v63  ;;  %8922 = vmatprep.mubr.msk.bf16.mxu0 %vm9860_vm3, %v9859_v63  ;;  %v3289_v30 = vrot.slane %v3251_v51, %v9931_v14  ;;  %v3293_v57 = vrot.slane %v3265_v2, %v9931_v14  ;;  %v10644_v33 = vsel %vm643_vm5, %v10562_v15, %v3273_v28  ;;  %v10749_v2 = vld [vmem:[#allocation2 + $0x190] sm:$0xff]  }
 0x641   :  { %8930 = vmatprep.mubr.msk.bf16.mxu1 %vm9860_vm3, %v9859_v63  ;;  %v3297_v35 = vrot.slane %v3267_v22, %v9931_v14  ;;  %v3158_v36 = vsel %vm643_vm5, %v10565_v21, %v3133_v19  ;;  %v3159_v37 = vsel %vm643_vm5, %v10573_v4, %v3137_v31  ;;  %v3160_v38 = vsel %vm643_vm5, %v3053_v32, %v3141_v52  ;;  %v10665_v21 = vld [vmem:[#allocation2 + $0x150] sm:$0xff]   ;;  %v10789_v52 = vld [vmem:[#allocation2 + $0x1a8] sm:$0xff]   ;;  %v10793_v22 = vld [vmem:[#allocation2 + $0x1b8] sm:$0xff]  }
 0x642   :  { %8921 = vmatpush3.bf16.msra.mxu0 %v10627_v5  ;;  %v3211_v39 = vcombine.high %v10587_v7, %v10587_v7  ;;  %v3301_v42 = vrot.slane %v3269_v25, %v9931_v14  ;;  %v3161_v46 = vsel %vm643_vm5, %v3055_v18, %v3145_v16  ;;  %v10662_v48 = vpack.c.bf16 %v3156_v6, %v3156_v6  ;;  %v10759_v6 = vld [vmem:[#allocation2 + $0x188] sm:$0xff]   ;;  %v10771_v18 = vld [vmem:[#allocation2 + $0x1a0] sm:$0xff]   ;;  %v10809_v25 = vld [vmem:[#allocation2 + $0x1d0] sm:$0xff]  }
 0x643   :  { %8929 = vmatpush3.bf16.msra.mxu1 %v10632_v40  ;;  %8934 = vmatprep.subr.bf16.mxu0 %v9859_v63  ;;  %v3311_v4 = vsel %vm643_vm5, %v10576_v20, %v3277_v55  ;;  %v10673_v32 = vsel %vm643_vm5, %v3208_v56, %v3281_v0  ;;  %v10675_v49 = vpack.c.bf16 %v3157_v26, %v3157_v26  ;;  %v10700_v56 = vld [vmem:[#allocation2 + $0x148] sm:$0xff]   ;;  %v10779_v26 = vld [vmem:[#allocation2 + $0x1b0] sm:$0xff]   ;;  %v10822_v0 = vld [vmem:[#allocation2 + $0x1d8] sm:$0xff]  }
 0x644   :  { %8942 = vmatprep.subr.bf16.mxu1 %v9859_v63  ;;  %v10679_v50 = vsel %vm643_vm5, %v3210_v62, %v3285_v3  ;;  %v10683_v51 = vsel %vm643_vm5, %v10570_v34, %v3289_v30  ;;  %v10689_v15 = vsel %vm643_vm5, %v10587_v7, %v3293_v57  ;;  %v10695_v20 = vsel %vm643_vm5, %v3209_v41, %v3297_v35  ;;  %v10707_v7 = vld [vmem:[#allocation2 + $0x158] sm:$0xff]   ;;  %v10715_v34 = vld [vmem:[#allocation2 + $0x160] sm:$0xff]   ;;  %v10818_v55 = vld [vmem:[#allocation2 + $0x1c8] sm:$0xff]  }
 0x645   :  { %8923 = vmatmul.mubr.msk.bf16.vlgmr.msra.gmra.mrb[84].mxu0 %vm828_vm6, %v10662_v48  ;;  %v10703_v10 = vsel %vm643_vm5, %v3211_v39, %v3301_v42  ;;  %v10718_v41 = vpack.c.bf16 %v3158_v36, %v3158_v36  ;;  %v10723_v54 = vpack.c.bf16 %v3159_v37, %v3159_v37  ;;  %v10746_v62 = vpack.c.bf16 %v3160_v38, %v3160_v38  ;;  %v10830_v3 = vld [vmem:[#allocation2 + $0x1e0] sm:$0xff]   ;;  %v10836_v57 = vld [vmem:[#allocation2 + $0x1f0] sm:$0xff]   ;;  %v10844_v35 = vld [vmem:[#allocation2 + $0x1e8] sm:$0xff]  }
 0x646   :  { %8935 = vmatpush3.bf16.msra.mxu0 %v10657_v1  ;;  %8931 = vmatmul.mubr.msk.bf16.vlgmr.msra.gmra.mrb[72].mxu1 %vm828_vm6, %v10675_v49  ;;  %v10751_v8 = vpack.c.bf16 %v3161_v46, %v3161_v46  ;;  %v10775_v19 = vpack.c.bf16 %v10644_v33, %v10644_v33  ;;  %v10781_v31 = vpack.c.bf16 %v3311_v4, %v3311_v4  ;;  %v10848_v36 = vld [vmem:[#allocation2 + $0x1f8] sm:$0xff]  }
 0x647   :  { %8943 = vmatpush3.bf16.msra.mxu1 %v10665_v21  ;;  %8936 = vmatprep.subr.bf16.mxu0 %v9859_v63  ;;  %v10806_v16 = vpack.c.bf16 %v10673_v32, %v10673_v32  ;;  %v3769_v28 = vpack.c.bf16 %v10679_v50, %v10679_v50  ;;  %v3770_v30 = vpack.c.bf16 %v10683_v51, %v10683_v51 }
 0x648   :  { %8944 = vmatprep.subr.bf16.mxu1 %v9859_v63  ;;  %8938 = vmatprep.mubr.msk.bf16.mxu0 %vm9860_vm3, %v9859_v63  ;;  %v3771_v33 = vpack.c.bf16 %v10689_v15, %v10689_v15  ;;  %v3772_v37 = vpack.c.bf16 %v10695_v20, %v10695_v20  ;;  %v3773_v38 = vpack.c.bf16 %v10703_v10, %v10703_v10 }
 0x649   :  { %8946 = vmatprep.mubr.msk.bf16.mxu1 %vm9860_vm3, %v9859_v63 }
 0x64a   :  { %8937 = vmatpush3.bf16.msra.mxu0 %v10700_v56 }
 0x64b   :  { %8945 = vmatpush3.bf16.msra.mxu1 %v10707_v7  ;;  %8950 = vmatprep.subr.bf16.mxu0 %v9859_v63 }
 0x64c   :  { %8958 = vmatprep.subr.bf16.mxu1 %v9859_v63 }
 0x64d   :  { %8939 = vmatmul.mubr.msk.bf16.vlgmr.msra.gmra.mrb[88].mxu0 %vm828_vm6, %v10718_v41 }
 0x64e   :  { %8951 = vmatpush3.bf16.msra.mxu0 %v10715_v34  ;;  %8947 = vmatmul.mubr.msk.bf16.vlgmr.msra.gmra.mrb[76].mxu1 %vm828_vm6, %v10723_v54 }
 0x64f   :  { %8959 = vmatpush3.bf16.msra.mxu1 %v10721_v53  ;;  %8952 = vmatprep.subr.bf16.mxu0 %v9859_v63 }
 0x650   :  { %8960 = vmatprep.subr.bf16.mxu1 %v9859_v63  ;;  %8954 = vmatprep.mubr.msk.bf16.mxu0 %vm9860_vm3, %v9859_v63 }
 0x651   :  { %8962 = vmatprep.mubr.msk.bf16.mxu1 %vm9860_vm3, %v9859_v63 }
 0x652   :  { %8953 = vmatpush3.bf16.msra.mxu0 %v10731_v58 }
 0x653   :  { %8961 = vmatpush3.bf16.msra.mxu1 %v10735_v59  ;;  %8966 = vmatprep.subr.bf16.mxu0 %v9859_v63 }
 0x654   :  { %8974 = vmatprep.subr.bf16.mxu1 %v9859_v63 }
 0x655   :  { %8955 = vmatmul.mubr.msk.bf16.vlgmr.msra.gmra.mrb[92].mxu0 %vm828_vm6, %v10746_v62 }
 0x656   :  { %8967 = vmatpush3.bf16.msra.mxu0 %v10743_v60  ;;  %8963 = vmatmul.mubr.msk.bf16.vlgmr.msra.gmra.mrb[80].mxu1 %vm828_vm6, %v10751_v8 }
 0x657   :  { %8975 = vmatpush3.bf16.msra.mxu1 %v10749_v2  ;;  %8968 = vmatprep.subr.bf16.mxu0 %v9859_v63 }
 0x658   :  { %8976 = vmatprep.subr.bf16.mxu1 %v9859_v63  ;;  %8970 = vmatprep.mubr.msk.bf16.mxu0 %vm9860_vm3, %v9859_v63 }
 0x659   :  { %8978 = vmatprep.mubr.msk.bf16.mxu1 %vm9860_vm3, %v9859_v63 }
 0x65a   :  { %8969 = vmatpush3.bf16.msra.mxu0 %v10759_v6 }
 0x65b   :  { %8977 = vmatpush3.bf16.msra.mxu1 %v10763_v17  ;;  %8982 = vmatprep.subr.bf16.mxu0 %v9859_v63 }
 0x65c   :  { %8990 = vmatprep.subr.bf16.mxu1 %v9859_v63 }
 0x65d   :  { %8971 = vmatmul.mubr.msk.bf16.vlgmr.msra.gmra.mrb[96].mxu0 %vm828_vm6, %v10775_v19 }
 0x65e   :  { %8983 = vmatpush3.bf16.msra.mxu0 %v10771_v18  ;;  %8979 = vmatmul.mubr.msk.bf16.vlgmr.msra.gmra.mrb[84].mxu1 %vm828_vm6, %v10781_v31 }
 0x65f   :  { %8991 = vmatpush3.bf16.msra.mxu1 %v10779_v26  ;;  %8984 = vmatprep.subr.bf16.mxu0 %v9859_v63 }
 0x660   :  { %8992 = vmatprep.subr.bf16.mxu1 %v9859_v63  ;;  %8986 = vmatprep.mubr.msk.bf16.mxu0 %vm9860_vm3, %v9859_v63 }
 0x661   :  { %8994 = vmatprep.mubr.msk.bf16.mxu1 %vm9860_vm3, %v9859_v63 }
 0x662   :  { %8985 = vmatpush3.bf16.msra.mxu0 %v10789_v52 }
 0x663   :  { %8993 = vmatpush3.bf16.msra.mxu1 %v10793_v22  ;;  %8998 = vmatprep.subr.bf16.mxu0 %v9859_v63 }
 0x664   :  { %9006 = vmatprep.subr.bf16.mxu1 %v9859_v63 }
 0x665   :  { %8987 = vmatmul.mubr.msk.bf16.vlgmr.msra.gmra.mrb[100].mxu0 %vm828_vm6, %v10806_v16 }
 0x666   :  { %8999 = vmatpush3.bf16.msra.mxu0 %v10801_v44  ;;  %8995 = vmatmul.mubr.msk.bf16.vlgmr.msra.gmra.mrb[88].mxu1 %vm828_vm6, %v3769_v28 }
 0x667   :  { %9007 = vmatpush3.bf16.msra.mxu1 %v10809_v25  ;;  %9000 = vmatprep.subr.bf16.mxu0 %v9859_v63 }
 0x668   :  { %9008 = vmatprep.subr.bf16.mxu1 %v9859_v63  ;;  %9002 = vmatprep.mubr.msk.bf16.mxu0 %vm9860_vm3, %v9859_v63 }
 0x669   :  { %9010 = vmatprep.mubr.msk.bf16.mxu1 %vm9860_vm3, %v9859_v63 }
 0x66a   :  { %9001 = vmatpush3.bf16.msra.mxu0 %v10818_v55 }
 0x66b   :  { %9009 = vmatpush3.bf16.msra.mxu1 %v10822_v0  ;;  %9014 = vmatprep.subr.bf16.mxu0 %v9859_v63 }
 0x66c   :  { %9022 = vmatprep.subr.bf16.mxu1 %v9859_v63 }
 0x66d   :  { %9003 = vmatmul.mubr.msk.bf16.vlgmr.msra.gmra.mrb[104].mxu0 %vm828_vm6, %v3770_v30 }
 0x66e   :  { %9015 = vmatpush3.bf16.msra.mxu0 %v10830_v3  ;;  %9011 = vmatmul.mubr.msk.bf16.vlgmr.msra.gmra.mrb[92].mxu1 %vm828_vm6, %v3771_v33 }
 0x66f   :  { %9023 = vmatpush3.bf16.msra.mxu1 %v10836_v57  ;;  %9016 = vmatprep.subr.bf16.mxu0 %v9859_v63 }
 0x670   :  { %9024 = vmatprep.subr.bf16.mxu1 %v9859_v63  ;;  %9018 = vmatprep.mubr.msk.bf16.mxu0 %vm9860_vm3, %v9859_v63 }
 0x671   :  { %9026 = vmatprep.mubr.msk.bf16.mxu1 %vm9860_vm3, %v9859_v63 }
 0x672   :  { %9017 = vmatpush3.bf16.msra.mxu0 %v10844_v35 }
 0x673   :  { %9025 = vmatpush3.bf16.msra.mxu1 %v10848_v36  ;;  %9030 = vmatprep.subr.bf16.mxu0 %v9859_v63 }
 0x674   :  { %9038 = vmatprep.subr.bf16.mxu1 %v9859_v63 }
 0x675   :  { %9019 = vmatmul.mubr.msk.bf16.vlgmr.msra.gmra.mrb[108].mxu0 %vm828_vm6, %v3772_v37 }
 0x676   :  { %9031 = vmatpush3.bf16.msra.mxu0 %v10540_v43  ;;  %9027 = vmatmul.mubr.msk.bf16.vlgmr.msra.gmra.mrb[96].mxu1 %vm828_vm6, %v3773_v38 }
 0x677   :  { %9039 = vmatpush3.bf16.msra.mxu1 %v10543_v45  ;;  %9032 = vmatprep.subr.bf16.mxu0 %v9859_v63 }
 0x678   :  { %9040 = vmatprep.subr.bf16.mxu1 %v9859_v63  ;;  %9034 = vmatprep.mubr.msk.bf16.mxu0 %vm9860_vm3, %v9859_v63 }
 0x679   :  { %9042 = vmatprep.mubr.msk.bf16.mxu1 %vm9860_vm3, %v9859_v63 }
 0x67a   :  { %9033 = vmatpush3.bf16.msra.mxu0 %v10546_v11 }
 0x67b   :  { %9041 = vmatpush3.bf16.msra.mxu1 %v10549_v47  ;;  %9046 = vmatprep.subr.bf16.mxu0 %v9859_v63 }
 0x67c   :  { %9054 = vmatprep.subr.bf16.mxu1 %v9859_v63 }
 0x67d   :  { %9035 = vmatmul.mubr.msk.bf16.vlgmr.msra.gmra.mrb[112].mxu0 %vm828_vm6, %v10775_v19 }
 0x67e   :  { %9047 = vmatpush3.bf16.msra.mxu0 %v10602_v61  ;;  %9043 = vmatmul.mubr.msk.bf16.vlgmr.msra.gmra.mrb[100].mxu1 %vm828_vm6, %v10781_v31 }
 0x67f   :  { %9055 = vmatpush3.bf16.msra.mxu1 %v10610_v12  ;;  %9048 = vmatprep.subr.bf16.mxu0 %v9859_v63 }
 0x680   :  { %9056 = vmatprep.subr.bf16.mxu1 %v9859_v63  ;;  %9050 = vmatprep.mubr.msk.bf16.mxu0 %vm9860_vm3, %v9859_v63 }
 0x681   :  { %9058 = vmatprep.mubr.msk.bf16.mxu1 %vm9860_vm3, %v9859_v63 }
 0x682   :  { %9049 = vmatpush3.bf16.msra.mxu0 %v10627_v5 }
 0x683   :  { %9057 = vmatpush3.bf16.msra.mxu1 %v10632_v40  ;;  %9062 = vmatprep.subr.bf16.mxu0 %v9859_v63 }
 0x684   :  { %9070 = vmatprep.subr.bf16.mxu1 %v9859_v63 }
 0x685   :  { %9051 = vmatmul.mubr.msk.bf16.vlgmr.msra.gmra.mrb[116].mxu0 %vm828_vm6, %v10806_v16 }
 0x686   :  { %9063 = vmatpush3.bf16.msra.mxu0 %v10657_v1  ;;  %9059 = vmatmul.mubr.msk.bf16.vlgmr.msra.gmra.mrb[104].mxu1 %vm828_vm6, %v3769_v28 }
 0x687   :  { %9071 = vmatpush3.bf16.msra.mxu1 %v10665_v21  ;;  %9064 = vmatprep.subr.bf16.mxu0 %v9859_v63 }
 0x688   :  { %9072 = vmatprep.subr.bf16.mxu1 %v9859_v63  ;;  %9066 = vmatprep.mubr.msk.bf16.mxu0 %vm9860_vm3, %v9859_v63 }
 0x689   :  { %9074 = vmatprep.mubr.msk.bf16.mxu1 %vm9860_vm3, %v9859_v63 }
 0x68a   :  { %9065 = vmatpush3.bf16.msra.mxu0 %v10700_v56 }
 0x68b   :  { %9073 = vmatpush3.bf16.msra.mxu1 %v10707_v7  ;;  %9078 = vmatprep.subr.bf16.mxu0 %v9859_v63 }
 0x68c   :  { %9086 = vmatprep.subr.bf16.mxu1 %v9859_v63 }
 0x68d   :  { %9067 = vmatmul.mubr.msk.bf16.vlgmr.msra.gmra.mrb[120].mxu0 %vm828_vm6, %v3770_v30 }
 0x68e   :  { %9079 = vmatpush3.bf16.msra.mxu0 %v10715_v34  ;;  %9075 = vmatmul.mubr.msk.bf16.vlgmr.msra.gmra.mrb[108].mxu1 %vm828_vm6, %v3771_v33 }
 0x68f   :  { %9087 = vmatpush3.bf16.msra.mxu1 %v10721_v53  ;;  %9080 = vmatprep.subr.bf16.mxu0 %v9859_v63 }
 0x690   :  { %9088 = vmatprep.subr.bf16.mxu1 %v9859_v63  ;;  %9082 = vmatprep.mubr.msk.bf16.mxu0 %vm9860_vm3, %v9859_v63 }
 0x691   :  { %9090 = vmatprep.mubr.msk.bf16.mxu1 %vm9860_vm3, %v9859_v63 }
 0x692   :  { %9081 = vmatpush3.bf16.msra.mxu0 %v10731_v58 }
 0x693   :  { %9089 = vmatpush3.bf16.msra.mxu1 %v10735_v59  ;;  %9094 = vmatprep.subr.bf16.mxu0 %v9859_v63 }
 0x694   :  { %9102 = vmatprep.subr.bf16.mxu1 %v9859_v63 }
 0x695   :  { %9083 = vmatmul.mubr.msk.bf16.vlgmr.msra.gmra.mrb[124].mxu0 %vm828_vm6, %v3772_v37 }
 0x696   :  { %9095 = vmatpush3.bf16.msra.mxu0 %v10743_v60  ;;  %9091 = vmatmul.mubr.msk.bf16.vlgmr.msra.gmra.mrb[112].mxu1 %vm828_vm6, %v3773_v38 }
 0x697   :  { %9103 = vmatpush3.bf16.msra.mxu1 %v10749_v2  ;;  %9096 = vmatprep.subr.bf16.mxu0 %v9859_v63 }
 0x698   :  { %9104 = vmatprep.subr.bf16.mxu1 %v9859_v63  ;;  %9098 = vmatprep.mubr.msk.bf16.mxu0 %vm9860_vm3, %v9859_v63 }
 0x699   :  { %9106 = vmatprep.mubr.msk.bf16.mxu1 %vm9860_vm3, %v9859_v63 }
 0x69a   :  { %9097 = vmatpush3.bf16.msra.mxu0 %v10759_v6 }
 0x69b   :  { %9105 = vmatpush3.bf16.msra.mxu1 %v10763_v17  ;;  %9110 = vmatprep.subr.bf16.mxu0 %v9859_v63 }
 0x69c   :  { %9118 = vmatprep.subr.bf16.mxu1 %v9859_v63 }
 0x69d   :  { %9099 = vmatmul.mubr.msk.bf16.vlgmr.msra.gmra.mrb[112].mxu0 %vm828_vm6, %v10607_v9 }
 0x69e   :  { %9111 = vmatpush3.bf16.msra.mxu0 %v10771_v18  ;;  %9107 = vmatmul.mubr.msk.bf16.vlgmr.msra.gmra.mrb[100].mxu1 %vm828_vm6, %v10616_v24 }
 0x69f   :  { %9119 = vmatpush3.bf16.msra.mxu1 %v10779_v26  ;;  %9112 = vmatprep.subr.bf16.mxu0 %v9859_v63 }
 0x6a0   :  { %9120 = vmatprep.subr.bf16.mxu1 %v9859_v63  ;;  %9114 = vmatprep.mubr.msk.bf16.mxu0 %vm9860_vm3, %v9859_v63 }
 0x6a1   :  { %9122 = vmatprep.mubr.msk.bf16.mxu1 %vm9860_vm3, %v9859_v63 }
 0x6a2   :  { %9113 = vmatpush3.bf16.msra.mxu0 %v10789_v52 }
 0x6a3   :  { %9121 = vmatpush3.bf16.msra.mxu1 %v10793_v22  ;;  %9126 = vmatprep.subr.bf16.mxu0 %v9859_v63 }
 0x6a4   :  { %9134 = vmatprep.subr.bf16.mxu1 %v9859_v63 }
 0x6a5   :  { %9115 = vmatmul.mubr.msk.bf16.vlgmr.msra.gmra.mrb[116].mxu0 %vm828_vm6, %v10662_v48 }
 0x6a6   :  { %9127 = vmatpush3.bf16.msra.mxu0 %v10801_v44  ;;  %9123 = vmatmul.mubr.msk.bf16.vlgmr.msra.gmra.mrb[104].mxu1 %vm828_vm6, %v10675_v49 }
 0x6a7   :  { %9135 = vmatpush3.bf16.msra.mxu1 %v10809_v25  ;;  %9128 = vmatprep.subr.bf16.mxu0 %v9859_v63 }
 0x6a8   :  { %9136 = vmatprep.subr.bf16.mxu1 %v9859_v63  ;;  %9130 = vmatprep.mubr.msk.bf16.mxu0 %vm9860_vm3, %v9859_v63 }
 0x6a9   :  { %9138 = vmatprep.mubr.msk.bf16.mxu1 %vm9860_vm3, %v9859_v63 }
 0x6aa   :  { %9129 = vmatpush3.bf16.msra.mxu0 %v10818_v55 }
 0x6ab   :  { %9137 = vmatpush3.bf16.msra.mxu1 %v10822_v0  ;;  %9142 = vmatprep.subr.bf16.mxu0 %v9859_v63 }
 0x6ac   :  { %9150 = vmatprep.subr.bf16.mxu1 %v9859_v63 }
 0x6ad   :  { %9131 = vmatmul.mubr.msk.bf16.vlgmr.msra.gmra.mrb[120].mxu0 %vm828_vm6, %v10718_v41 }
 0x6ae   :  { %9143 = vmatpush3.bf16.msra.mxu0 %v10830_v3  ;;  %9139 = vmatmul.mubr.msk.bf16.vlgmr.msra.gmra.mrb[108].mxu1 %vm828_vm6, %v10723_v54 }
 0x6af   :  { %9151 = vmatpush3.bf16.msra.mxu1 %v10836_v57  ;;  %9144 = vmatprep.subr.bf16.mxu0 %v9859_v63 }
 0x6b0   :  { %9152 = vmatprep.subr.bf16.mxu1 %v9859_v63  ;;  %9146 = vmatprep.mubr.msk.bf16.mxu0 %vm9860_vm3, %v9859_v63 }
 0x6b1   :  { %9154 = vmatprep.mubr.msk.bf16.mxu1 %vm9860_vm3, %v9859_v63 }
 0x6b2   :  { %9145 = vmatpush3.bf16.msra.mxu0 %v10844_v35 }
 0x6b3   :  { %9153 = vmatpush3.bf16.msra.mxu1 %v10848_v36  ;;  %9158 = vmatprep.subr.bf16.mxu0 %v9859_v63 }
 0x6b4   :  { %9170 = vmatprep.subr.bf16.mxu1 %v9859_v63 }
 0x6b5   :  { %9147 = vmatmul.mubr.msk.bf16.vlgmr.msra.gmra.mrb[124].mxu0 %vm828_vm6, %v10746_v62 }
 0x6b6   :  { %9155 = vmatmul.mubr.msk.bf16.vlgmr.msra.gmra.mrb[112].mxu1 %vm828_vm6, %v10751_v8  ;;  %9160 = vmatprep.mubr.msk.bf16.mxu0 %vm9860_vm3, %v9859_v63 }
 0x6b7   :  { %9172 = vmatprep.mubr.msk.bf16.mxu1 %vm9860_vm3, %v9859_v63 }
 0x710   :  { %v3375_v43 = vpop.f32.mrb[80].mxu0 }
 0x711   :  { %v8908_v45 = vpop.f32.mrb[81].mxu0  ;;  %v3430_v11 = vpop.f32.mrb[68].mxu1 }
 0x712   :  { %v3378_v47 = vpop.f32.mrb[82].mxu0  ;;  %v8916_v61 = vpop.f32.mrb[69].mxu1 }
 0x713   :  { %v8909_v9 = vpop.f32.mrb[83].mxu0  ;;  %v3433_v12 = vpop.f32.mrb[70].mxu1 }
 0x714   :  { %v8917_v24 = vpop.f32.mrb[71].mxu1 }
 0x718   :  { %v3485_v5 = vpop.f32.mrb[84].mxu0 }
 0x719   :  { %v8924_v40 = vpop.f32.mrb[85].mxu0  ;;  %v3540_v39 = vpop.f32.mrb[72].mxu1 }
 0x71a   :  { %v3488_v1 = vpop.f32.mrb[86].mxu0  ;;  %v8932_v42 = vpop.f32.mrb[73].mxu1 }
 0x71b   :  { %v8925_v46 = vpop.f32.mrb[87].mxu0  ;;  %v3543_v48 = vpop.f32.mrb[74].mxu1 }
 0x71c   :  { %v8933_v21 = vpop.f32.mrb[75].mxu1 }
 0x720   :  { %v3595_v4 = vpop.f32.mrb[88].mxu0 }
 0x721   :  { %v8940_v32 = vpop.f32.mrb[89].mxu0  ;;  %v3650_v49 = vpop.f32.mrb[76].mxu1 }
 0x722   :  { %v3598_v50 = vpop.f32.mrb[90].mxu0  ;;  %v8948_v51 = vpop.f32.mrb[77].mxu1 }
 0x723   :  { %v8941_v15 = vpop.f32.mrb[91].mxu0  ;;  %v3653_v20 = vpop.f32.mrb[78].mxu1 }
 0x724   :  { %v8949_v56 = vpop.f32.mrb[79].mxu1 }
 0x728   :  { %v10992_v10 = vpop.f32.mrb[92].mxu0 }
 0x729   :  { %v8956_v7 = vpop.f32.mrb[93].mxu0  ;;  %v10994_v34 = vpop.f32.mrb[80].mxu1 }
 0x72a   :  { %v3708_v41 = vpop.f32.mrb[94].mxu0  ;;  %v8964_v53 = vpop.f32.mrb[81].mxu1 }
 0x72b   :  { %v8957_v54 = vpop.f32.mrb[95].mxu0  ;;  %v3763_v58 = vpop.f32.mrb[82].mxu1 }
 0x72c   :  { %v8965_v59 = vpop.f32.mrb[83].mxu1 }
 0x730   :  { %v3823_v60 = vpop.f32.mrb[96].mxu0 }
 0x731   :  { %v4214_v62 = vsub.f32 %v3375_v43, %v3823_v60  ;;  %v8972_v2 = vpop.f32.mrb[97].mxu0  ;;  %v3878_v8 = vpop.f32.mrb[84].mxu1 }
 0x732   :  { %v3826_v6 = vpop.f32.mrb[98].mxu0  ;;  %v4215_v17 = vsub.f32 %v3430_v11, %v3878_v8  ;;  %v8980_v18 = vpop.f32.mrb[85].mxu1 }
 0x733   :  { %v4862_v19 = vpack.c.bf16 %v4214_v62, %v4214_v62  ;;  %v8973_v26 = vpop.f32.mrb[99].mxu0  ;;  %v3881_v31 = vpop.f32.mrb[86].mxu1 }
 0x734   :  { %v4863_v52 = vpack.c.bf16 %v4215_v17, %v4215_v17  ;;  %v8981_v22 = vpop.f32.mrb[87].mxu1 }
 0x735   :  { %v4961_v44 = vunpack.c.l.b16 %v4862_v19 }
 0x736   :  { %v4962_v16 = vunpack.c.l.b16 %v4863_v52 }
 0x737   :  { %v5087_v25 = vrot.slane %v4961_v44, 1 }
 0x738   :  { %v4969_v28 = vrot.slane %v4962_v16, 7  ;;  %v3933_v55 = vpop.f32.mrb[100].mxu0 }
 0x739   :  { %v5088_v0 = vsel %vm2391_vm7, %v4962_v16, %v5087_v25  ;;  %v4216_v3 = vsub.f32 %v3485_v5, %v3933_v55  ;;  %v8988_v30 = vpop.f32.mrb[101].mxu0  ;;  %v3988_v57 = vpop.f32.mrb[88].mxu1 }
 0x73a   :  { %v4970_v33 = vsel %vm2391_vm7, %v4969_v28, %v4961_v44  ;;  %v3936_v35 = vpop.f32.mrb[102].mxu0  ;;  %v4217_v36 = vsub.f32 %v3540_v39, %v3988_v57  ;;  %v8996_v37 = vpop.f32.mrb[89].mxu1 }
 0x73b   :  { %v4864_v38 = vpack.c.bf16 %v4216_v3, %v4216_v3  ;;  %v8989_v43 = vpop.f32.mrb[103].mxu0  ;;  %v3991_v45 = vpop.f32.mrb[90].mxu1 }
 0x73c   :  { %v4865_v11 = vpack.c.bf16 %v4217_v36, %v4217_v36  ;;  %v8997_v47 = vpop.f32.mrb[91].mxu1 }
 0x73d   :  { %v4963_v61 = vunpack.c.l.b16 %v4864_v38 }
 0x73e   :  { %v4964_v9 = vunpack.c.l.b16 %v4865_v11 }
 0x73f   :  { %v4971_v12 = vrot.slane %v4963_v61, 6  ;;  %v5089_v24 = vrot.slane %v4963_v61, 7 }
 0x740   :  { %v4973_v40 = vrot.slane %v4964_v9, 5  ;;  %v5091_v1 = vrot.slane %v4964_v9, 6  ;;  %v4043_v42 = vpop.f32.mrb[104].mxu0 }
 0x741   :  { %v4972_v5 = vsel %vm2394_vm8, %v4971_v12, %v4970_v33  ;;  %v5090_v46 = vsel %vm2394_vm8, %v5089_v24, %v5088_v0  ;;  %v4218_v48 = vsub.f32 %v3595_v4, %v4043_v42  ;;  %v9004_v21 = vpop.f32.mrb[105].mxu0  ;;  %v4098_v39 = vpop.f32.mrb[92].mxu1 }
 0x742   :  { %v4974_v32 = vsel %vm2397_vm9, %v4973_v40, %v4972_v5  ;;  %v5092_v50 = vsel %vm2397_vm9, %v5091_v1, %v5090_v46  ;;  %v4046_v51 = vpop.f32.mrb[106].mxu0  ;;  %v4219_v15 = vsub.f32 %v3650_v49, %v4098_v39  ;;  %v9012_v20 = vpop.f32.mrb[93].mxu1 }
 0x743   :  { %v4866_v56 = vpack.c.bf16 %v4218_v48, %v4218_v48  ;;  %v9005_v7 = vpop.f32.mrb[107].mxu0  ;;  %v4101_v41 = vpop.f32.mrb[94].mxu1 }
 0x744   :  { %v4867_v53 = vpack.c.bf16 %v4219_v15, %v4219_v15  ;;  %v9013_v54 = vpop.f32.mrb[95].mxu1 }
 0x745   :  { %v4965_v58 = vunpack.c.l.b16 %v4866_v56 }
 0x746   :  { %v4966_v59 = vunpack.c.l.b16 %v4867_v53 }
 0x747   :  { %v4975_v60 = vrot.slane %v4965_v58, 4  ;;  %v5093_v62 = vrot.slane %v4965_v58, 5 }
 0x748   :  { %v4977_v2 = vrot.slane %v4966_v59, 3  ;;  %v5095_v4 = vrot.slane %v4966_v59, 4  ;;  %v4153_v8 = vpop.f32.mrb[108].mxu0 }
 0x749   :  { %v4976_v6 = vsel %vm2400_vm10, %v4975_v60, %v4974_v32  ;;  %v5094_v17 = vsel %vm2400_vm10, %v5093_v62, %v5092_v50  ;;  %v4220_v18 = vsub.f32 %v10992_v10, %v4153_v8  ;;  %v9020_v49 = vpop.f32.mrb[109].mxu0  ;;  %v4208_v19 = vpop.f32.mrb[96].mxu1 }
 0x74a   :  { %v4978_v26 = vsel %vm2403_vm11, %v4977_v2, %v4976_v6  ;;  %v5096_v31 = vsel %vm2403_vm11, %v5095_v4, %v5094_v17  ;;  %v4156_v52 = vpop.f32.mrb[110].mxu0  ;;  %v4221_v22 = vsub.f32 %v10994_v34, %v4208_v19  ;;  %v9028_v44 = vpop.f32.mrb[97].mxu1 }
 0x74b   :  { %v4868_v16 = vpack.c.bf16 %v4220_v18, %v4220_v18  ;;  %v9021_v25 = vpop.f32.mrb[111].mxu0  ;;  %v4211_v28 = vpop.f32.mrb[98].mxu1 }
 0x74c   :  { %v4869_v55 = vpack.c.bf16 %v4221_v22, %v4221_v22  ;;  %v9029_v0 = vpop.f32.mrb[99].mxu1 }
 0x74d   :  { %v4967_v3 = vunpack.c.l.b16 %v4868_v16 }
 0x74e   :  { %v4968_v30 = vunpack.c.l.b16 %v4869_v55 }
 0x74f   :  { %v4979_v57 = vrot.slane %v4967_v3, 2  ;;  %v5097_v33 = vrot.slane %v4967_v3, 3 }
 0x750   :  { %v4981_v10 = vrot.slane %v4968_v30, 1  ;;  %v5099_v35 = vrot.slane %v4968_v30, 2 }
 0x751   :  { %v4980_v36 = vsel %vm2406_vm12, %v4979_v57, %v4978_v26  ;;  %v5098_v37 = vsel %vm2406_vm12, %v5097_v33, %v5096_v31 }
 0x752   :  { %v11011_v38 = vsel %vm2409_vm13, %v4981_v10, %v4980_v36  ;;  %v11014_v34 = vsel %vm2409_vm13, %v5099_v35, %v5098_v37 }
 0x770   :  { %v4576_v43 = vpop.f32.mrb[112].mxu0 }
 0x771   :  { %v4870_v45 = vpack.c.bf16 %v4576_v43, %v4576_v43  ;;  %v9100_v11 = vpop.f32.mrb[113].mxu0  ;;  %v4616_v47 = vpop.f32.mrb[100].mxu1 }
 0x772   :  { %v4579_v61 = vpop.f32.mrb[114].mxu0  ;;  %v4871_v9 = vpack.c.bf16 %v4616_v47, %v4616_v47  ;;  %v9108_v12 = vpop.f32.mrb[101].mxu1 }
 0x773   :  { %v4886_v24 = vunpack.c.l.b16 %v4870_v45  ;;  %v9101_v40 = vpop.f32.mrb[115].mxu0  ;;  %v4619_v1 = vpop.f32.mrb[102].mxu1 }
 0x774   :  { %v4887_v42 = vunpack.c.l.b16 %v4871_v9  ;;  %v9109_v5 = vpop.f32.mrb[103].mxu1 }
 0x775   :  { %v5028_v46 = vrot.slane %v4886_v24, 1 }
 0x776   :  { %v4894_v48 = vrot.slane %v4887_v42, 7 }
 0x777   :  { %v5029_v21 = vsel %vm2391_vm7, %v4887_v42, %v5028_v46 }
 0x778   :  { %v4895_v39 = vsel %vm2391_vm7, %v4894_v48, %v4886_v24  ;;  %v4656_v32 = vpop.f32.mrb[116].mxu0 }
 0x779   :  { %v4872_v50 = vpack.c.bf16 %v4656_v32, %v4656_v32  ;;  %v9116_v51 = vpop.f32.mrb[117].mxu0  ;;  %v4696_v15 = vpop.f32.mrb[104].mxu1 }
 0x77a   :  { %v4659_v20 = vpop.f32.mrb[118].mxu0  ;;  %v4873_v56 = vpack.c.bf16 %v4696_v15, %v4696_v15  ;;  %v9124_v7 = vpop.f32.mrb[105].mxu1 }
 0x77b   :  { %v4888_v41 = vunpack.c.l.b16 %v4872_v50  ;;  %v9117_v53 = vpop.f32.mrb[119].mxu0  ;;  %v4699_v54 = vpop.f32.mrb[106].mxu1 }
 0x77c   :  { %v4889_v58 = vunpack.c.l.b16 %v4873_v56  ;;  %v9125_v59 = vpop.f32.mrb[107].mxu1  ;;  %v4983_v53 = vpack.c.b16 %v11011_v38, %v11011_v38  ;;  %v5101_v54 = vpack.c.b16 %v11014_v34, %v11014_v34  ;;  %v9723_v34 = vld [vmem:[#allocation4 + $0x68] sm:$0xff]  }
 0x77d   :  { %v4896_v60 = vrot.slane %v4888_v41, 6  ;;  %v5030_v62 = vrot.slane %v4888_v41, 7  ;;  %v9799_v59 = vld [vmem:[%s11648_s1 + $0x18] sm:$0xff]  }
 0x77e   :  { %v4898_v2 = vrot.slane %v4889_v58, 5  ;;  %v5032_v4 = vrot.slane %v4889_v58, 6  ;;  %v9722_v58 = vld [vmem:[#allocation4 + $0x60] sm:$0xff]   ;;  %v5103_v38 = vsel %vm2416_vm14, %v5101_v54, 0 }
 0x77f   :  { %v4897_v8 = vsel %vm2394_vm8, %v4896_v60, %v4895_v39  ;;  %v5031_v6 = vsel %vm2394_vm8, %v5030_v62, %v5029_v21  ;;  %v4985_v60 = vsel %vm2416_vm14, %v4983_v53, 0  ;;  %v9800_v62 = vld [vmem:[%s11648_s1 + $0x10] sm:$0xff]  }
 0x780   :  { %v4899_v17 = vsel %vm2397_vm9, %v4898_v2, %v4897_v8  ;;  %v5033_v18 = vsel %vm2397_vm9, %v5032_v4, %v5031_v6  ;;  %v4736_v49 = vpop.f32.mrb[120].mxu0 }
 0x781   :  { %v4874_v19 = vpack.c.bf16 %v4736_v49, %v4736_v49  ;;  %v9132_v26 = vpop.f32.mrb[121].mxu0  ;;  %v4776_v31 = vpop.f32.mrb[108].mxu1 }
 0x782   :  { %v4739_v52 = vpop.f32.mrb[122].mxu0  ;;  %v4875_v22 = vpack.c.bf16 %v4776_v31, %v4776_v31  ;;  %v9140_v44 = vpop.f32.mrb[109].mxu1  ;;  %v9801_v26 = vld [vmem:[%s11651_s4] sm:$0x7f] }
 0x783   :  { %v4890_v16 = vunpack.c.l.b16 %v4874_v19  ;;  %v9133_v25 = vpop.f32.mrb[123].mxu0  ;;  %v4779_v28 = vpop.f32.mrb[110].mxu1 }
 0x784   :  { %v4891_v55 = vunpack.c.l.b16 %v4875_v22  ;;  %v9141_v0 = vpop.f32.mrb[111].mxu1 }
 0x785   :  { %v4900_v3 = vrot.slane %v4890_v16, 4  ;;  %v5034_v30 = vrot.slane %v4890_v16, 5 }
 0x786   :  { %v4902_v57 = vrot.slane %v4891_v55, 3  ;;  %v5036_v33 = vrot.slane %v4891_v55, 4 }
 0x787   :  { %v4901_v10 = vsel %vm2400_vm10, %v4900_v3, %v4899_v17  ;;  %v5035_v35 = vsel %vm2400_vm10, %v5034_v30, %v5033_v18  ;;  %v5153_v17 = vsub.s32 3, %v9928_v13 }
 0x788   :  { %v4903_v36 = vsel %vm2403_vm11, %v4902_v57, %v4901_v10  ;;  %v5037_v37 = vsel %vm2403_vm11, %v5036_v33, %v5035_v35  ;;  %v4816_v43 = vpop.f32.mrb[124].mxu0 }
 0x789   :  { %v4876_v45 = vpack.c.bf16 %v4816_v43, %v4816_v43  ;;  %v9148_v11 = vpop.f32.mrb[125].mxu0  ;;  %v4856_v47 = vpop.f32.mrb[112].mxu1  ;;  %v5154_v31 = vrot.slane %v9801_v26, %v5153_v17  ;;  %v11101_v17 = vld [vmem:[#allocation2 + $0x210] sm:$0xff]  }
 0x78a   :  { %v4819_v61 = vpop.f32.mrb[126].mxu0  ;;  %v4877_v9 = vpack.c.bf16 %v4856_v47, %v4856_v47  ;;  %v9156_v12 = vpop.f32.mrb[113].mxu1 }
 0x78b   :  { %v4892_v24 = vunpack.c.l.b16 %v4876_v45  ;;  %v9149_v40 = vpop.f32.mrb[127].mxu0  ;;  %v4859_v1 = vpop.f32.mrb[114].mxu1 }
 0x78c   :  { %v4893_v42 = vunpack.c.l.b16 %v4877_v9  ;;  %v9157_v5 = vpop.f32.mrb[115].mxu1 }
 0x78d   :  { %v4904_v46 = vrot.slane %v4892_v24, 2  ;;  %v5038_v48 = vrot.slane %v4892_v24, 3 }
 0x78e   :  { %v4906_v21 = vrot.slane %v4893_v42, 1  ;;  %v5040_v39 = vrot.slane %v4893_v42, 2 }
 0x78f   :  { %v4905_v32 = vsel %vm2406_vm12, %v4904_v46, %v4903_v36  ;;  %v5039_v50 = vsel %vm2406_vm12, %v5038_v48, %v5037_v37 }
 0x790   :  { %v4907_v51 = vsel %vm2409_vm13, %v4906_v21, %v4905_v32  ;;  %v5041_v15 = vsel %vm2409_vm13, %v5040_v39, %v5039_v50 }
 0x791   :  { %v4908_v20 = vpack.c.b16 %v4907_v51, %v4907_v51  ;;  %v5042_v56 = vpack.c.b16 %v5041_v15, %v5041_v15 }
 0x793   :  { %v4910_v7 = vsel %vm2416_vm14, %v4908_v20, 0  ;;  %v5044_v41 = vsel %vm2416_vm14, %v5042_v56, 0 }
 0x794   :  { %9159 = vmatpush3.bf16.msra.mxu0 %v4910_v7  ;;  %9171 = vmatpush3.bf16.msra.mxu1 %v5044_v41 }
 0x795   :  { %9164 = vmatprep.subr.bf16.mxu0 %v9859_v63  ;;  %9176 = vmatprep.subr.bf16.mxu1 %v9859_v63 }
 0x797   :  { %9161 = vmatmul.mubr.msk.bf16.vlgmr.msra.gmra.mrb[128].mxu0 %vm2412_vm15, %v9799_v59  ;;  %9173 = vmatmul.mubr.msk.bf16.vlgmr.msra.gmra.mrb[116].mxu1 %vm2412_vm15, %v9799_v59 }
 0x798   :  { %9165 = vmatpush3.bf16.msra.mxu0 %v4985_v60  ;;  %9177 = vmatpush3.bf16.msra.mxu1 %v5103_v38 }
 0x799   :  { %9166 = vmatprep.mubr.msk.bf16.mxu0 %vm9860_vm3, %v9859_v63  ;;  %9182 = vmatprep.subr.bf16.mxu0 %v9722_v58 }
 0x79a   :  { %9178 = vmatprep.mubr.msk.bf16.mxu1 %vm9860_vm3, %v9859_v63  ;;  %9190 = vmatprep.subr.bf16.mxu1 %v9859_v63 }
 0x7a3   :  { %9167 = vmatmul.mubr.msk.bf16.vlgmr.msra.gmra.mrb[128].mxu0 %vm2412_vm15, %v9800_v62  ;;  %9179 = vmatmul.mubr.msk.bf16.vlgmr.msra.gmra.mrb[116].mxu1 %vm2412_vm15, %v9800_v62 }
 0x7a4   :  { %9183 = vmatpush3.bf16.msra.mxu0 %v9722_v58  ;;  %9186 = vmatprep.mubr.msk.bf16.mxu0 %vm828_vm6, %v10512_v29 }
 0x7a5   :  { %9184 = vmatprep.subr.bf16.mxu0 %v9723_v34  ;;  %9192 = vmatprep.mubr.msk.bf16.mxu1 %vm9860_vm3, %v9859_v63 }
 0x7a8   :  { %9185 = vmatpush3.bf16.msra.mxu0 %v9723_v34 }
 0x7a9   :  { %9196 = vmatprep.subr.bf16.mxu0 %v9859_v63 }
 0x7ab   :  { %9187 = vmatmul.mubr.msk.bf16.vlgmr.msra.gmra.mrb[132].mxu0 %vm828_vm6, %v10510_v23 }
 0x7ac   :  { %9198 = vmatprep.mubr.msk.bf16.mxu0 %vm9860_vm3, %v9859_v63 }
 0x876   :  { %v5021_v2 = vpop.f32.mrb[128].mxu0  ;;  %v5139_v4 = vpop.f32.mrb[116].mxu1 }
 0x877   :  { %v9168_v8 = vpop.f32.mrb[129].mxu0  ;;  %v9180_v6 = vpop.f32.mrb[117].mxu1 }
 0x878   :  { %v5024_v29 = vpop.f32.mrb[130].mxu0  ;;  %v5142_v18 = vpop.f32.mrb[118].mxu1  ;;  %v9803_v8 = vld [vmem:[%s11648_s1 + $0x8] sm:$0xf] }
 0x879   :  { %v9169_v49 = vpop.f32.mrb[131].mxu0  ;;  %v9181_v19 = vpop.f32.mrb[119].mxu1  ;;  %v11098_v6 = vld [vmem:[#allocation2 + $0x200] sm:$0xff]  }
 0x87e   :  { %v9188_v52 = vpop.f32.mrb[132].mxu0 }
 0x87f   :  { %v5216_v23 = vadd.f32 %v9188_v52, %v5154_v31  ;;  %v5207_v22 = vpop.f32.mrb[133].mxu0 }
 0x880   :  { %v5208_v44 = vadd.f32 %v5207_v22, %v5154_v31  ;;  %v9189_v16 = vpop.f32.mrb[134].mxu0 }
 0x881   :  { %v5224_v25 = vadd.f32 %v5216_v23, %v5139_v4  ;;  %v5219_v28 = vadd.f32 %v9189_v16, %v5154_v31  ;;  %v5210_v55 = vpop.f32.mrb[135].mxu0  ;;  %v9802_v4 = vld [vmem:[%s11648_s1] sm:$0xf] }
 0x882   :  { %v5222_v0 = vadd.f32 %v5208_v44, %v5021_v2  ;;  %v5211_v3 = vadd.f32 %v5210_v55, %v5154_v31 }
 0x883   :  { %v5228_v30 = vmul.f32 %v5224_v25, %v5224_v25  ;;  %v5225_v57 = vadd.f32 %v5219_v28, %v5142_v18  ;;  %v11107_v18 = vld [vmem:[#allocation2 + $0x218] sm:$0xff]  }
 0x884   :  { %v5226_v33 = vmul.f32 %v5222_v0, %v5222_v0  ;;  %v5223_v10 = vadd.f32 %v5211_v3, %v5024_v29  ;;  %v11105_v29 = vld [vmem:[#allocation2 + $0x208] sm:$0xff]  }
 0x885   :  { %v5232_v35 = vmul.f32 %v5228_v30, %v5224_v25  ;;  %v5229_v36 = vmul.f32 %v5225_v57, %v5225_v57 }
 0x886   :  { %v5230_v37 = vmul.f32 %v5226_v33, %v5222_v0  ;;  %v5227_v43 = vmul.f32 %v5223_v10, %v5223_v10 }
 0x887   :  { %v5236_v45 = vmul.f32 0.044715, %v5232_v35  ;;  %v5233_v11 = vmul.f32 %v5229_v36, %v5225_v57 }
 0x888   :  { %v5234_v47 = vmul.f32 0.044715, %v5230_v37  ;;  %v5231_v61 = vmul.f32 %v5227_v43, %v5223_v10 }
 0x889   :  { %v5240_v9 = vadd.f32 %v5236_v45, %v5224_v25  ;;  %v5237_v12 = vmul.f32 0.044715, %v5233_v11 }
 0x88a   :  { %v5238_v24 = vadd.f32 %v5234_v47, %v5222_v0  ;;  %v5235_v40 = vmul.f32 0.044715, %v5231_v61 }
 0x88b   :  { %v5244_v1 = vmul.f32 0.7978846, %v5240_v9  ;;  %v5241_v42 = vadd.f32 %v5237_v12, %v5225_v57 }
 0x88c   :  { %v5242_v5 = vmul.f32 0.7978846, %v5238_v24  ;;  %v5239_v46 = vadd.f32 %v5235_v40, %v5223_v10 }
 0x88d   :  { %9780 = vtanh.f32 %v5244_v1  ;;  %v5245_v48 = vmul.f32 0.7978846, %v5241_v42 }
 0x88e   :  { %9782 = vtanh.f32 %v5242_v5  ;;  %v5243_v21 = vmul.f32 0.7978846, %v5239_v46 }
 0x88f   :  { %9784 = vtanh.f32 %v5245_v48 }
 0x890   :  { %9786 = vtanh.f32 %v5243_v21 }
 0x897   :  { %v9781_v39 = vpop.eup %9780 }
 0x898   :  { %v9783_v32 = vpop.eup %9782  ;;  %v5252_v50 = vadd.f32 1.0, %v9781_v39 }
 0x899   :  { %v9785_v51 = vpop.eup %9784  ;;  %v5250_v15 = vadd.f32 1.0, %v9783_v32 }
 0x89a   :  { %v9787_v20 = vpop.eup %9786  ;;  %v5253_v56 = vadd.f32 1.0, %v9785_v51  ;;  %v5256_v7 = vmul.f32 0.5, %v5252_v50 }
 0x89b   :  { %v5251_v41 = vadd.f32 1.0, %v9787_v20  ;;  %v5254_v53 = vmul.f32 0.5, %v5250_v15 }
 0x89c   :  { %v5257_v54 = vmul.f32 0.5, %v5253_v56  ;;  %v5260_v59 = vmul.f32 %v5256_v7, %v5224_v25 }
 0x89d   :  { %v5255_v58 = vmul.f32 0.5, %v5251_v41  ;;  %v5258_v38 = vmul.f32 %v5254_v53, %v5222_v0 }
 0x89e   :  { %v5261_v60 = vmul.f32 %v5257_v54, %v5225_v57 }
 0x89f   :  { %v5259_v34 = vmul.f32 %v5255_v58, %v5223_v10 }
 0x8a0   :  { %v11068_v62 = vpack.c.bf16 %v5261_v60, %v5260_v59 }
 0x8a1   :  { %v11070_v2 = vpack.c.bf16 %v5259_v34, %v5258_v38 }
 0x8a3   :  { %9191 = vmatpush3.bf16.msra.mxu1 %v11070_v2  ;;  %9197 = vmatpush3.bf16.msra.mxu0 %v11070_v2 }
 0x8a4   :  { %9202 = vmatprep.subr.bf16.mxu1 %v9859_v63  ;;  %9208 = vmatprep.subr.bf16.mxu0 %v9859_v63 }
 0x8a6   :  { %9193 = vmatmul.mubr.msk.bf16.vlgmr.msra.gmra.mrb[120].mxu1 %vm327_vm4, %v9802_v4  ;;  %9199 = vmatmul.mubr.msk.bf16.vlgmr.msra.gmra.mrb[136].mxu0 %vm327_vm4, %v9803_v8 }
 0x8a7   :  { %9203 = vmatpush3.bf16.msra.mxu1 %v11068_v62  ;;  %9209 = vmatpush3.bf16.msra.mxu0 %v11068_v62 }
 0x8a8   :  { %9204 = vmatprep.mubr.msk.bf16.mxu1 %vm9860_vm3, %v9859_v63  ;;  %9210 = vmatprep.mubr.msk.bf16.mxu0 %vm9860_vm3, %v9859_v63 }
 0x8a9   :  { %9214 = vmatprep.subr.bf16.mxu1 %v9859_v63  ;;  %9222 = vmatprep.subr.bf16.mxu0 %v9859_v63 }
 0x8ae   :  { %9205 = vmatmul.mubr.msk.bf16.vlgmr.msra.gmra.mrb[124].mxu1 %vm327_vm4, %v9802_v4  ;;  %9211 = vmatmul.mubr.msk.bf16.vlgmr.msra.gmra.mrb[140].mxu0 %vm327_vm4, %v9803_v8 }
 0x8af   :  { %9218 = vmatprep.mubr.msk.bf16.mxu1 %vm9860_vm3, %v9859_v63  ;;  %9226 = vmatprep.mubr.msk.bf16.mxu0 %vm9860_vm3, %v9859_v63 }
 0x8b0   :  { %9215 = vmatpush3.bf16.msra.mxu1 %v11098_v6  ;;  %9223 = vmatpush3.bf16.msra.mxu0 %v11101_v17 }
 0x8b1   :  { %9216 = vmatprep.subr.bf16.mxu1 %v9859_v63  ;;  %9224 = vmatprep.subr.bf16.mxu0 %v9859_v63 }
 0x8b4   :  { %9217 = vmatpush3.bf16.msra.mxu1 %v11105_v29  ;;  %9225 = vmatpush3.bf16.msra.mxu0 %v11107_v18 }
 0x8b5   :  { %9230 = vmatprep.subr.bf16.mxu1 %v9859_v63  ;;  %9238 = vmatprep.subr.bf16.mxu0 %v9859_v63 }
 0x979   :  { %v5363_v49 = vpop.f32.mrb[120].mxu1  ;;  %v5403_v19 = vpop.f32.mrb[136].mxu0 }
 0x97a   :  { %v5491_v26 = vcombine.high %v5363_v49, %v5363_v49  ;;  %v5498_v31 = vrot.slane %v5363_v49, %v9993_v27  ;;  %v9194_v52 = vpop.f32.mrb[121].mxu1  ;;  %v5647_v23 = vcombine.high %v5403_v19, %v5403_v19  ;;  %v9200_v22 = vpop.f32.mrb[137].mxu0  ;;  %v5654_v16 = vrot.slane %v5403_v19, %v9993_v27 }
 0x97b   :  { %v5366_v44 = vpop.f32.mrb[122].mxu1  ;;  %v5406_v25 = vpop.f32.mrb[138].mxu0 }
 0x97c   :  { %v5505_v28 = vrot.slane %v5491_v26, %v9993_v27  ;;  %v9195_v55 = vpop.f32.mrb[123].mxu1  ;;  %v9201_v0 = vpop.f32.mrb[139].mxu0  ;;  %v5506_v3 = vcombine.high %v5498_v31, %v5498_v31  ;;  %v5514_v30 = vrot.slane %v5498_v31, %v9993_v27  ;;  %v5661_v57 = vrot.slane %v5647_v23, %v9993_v27 }
 0x97d   :  { %v5662_v10 = vcombine.high %v5654_v16, %v5654_v16  ;;  %v11120_v35 = vrot.slane %v5654_v16, %v9993_v27  ;;  %v11160_v55 = vld [vmem:[#allocation2 + $0x220] sm:$0xff]  }
 0x97e   :  { %v5507_v33 = vcombine.high %v5505_v28, %v5505_v28  ;;  %v11123_v36 = vrot.slane %v5505_v28, %v9993_v27  ;;  %v5528_v37 = vrot.slane %v5506_v3, %v9993_v27  ;;  %v5536_v43 = vcombine.high %v5514_v30, %v5514_v30 }
 0x97f   :  { %v5663_v11 = vcombine.high %v5661_v57, %v5661_v57  ;;  %v11128_v24 = vrot.slane %v5661_v57, %v9993_v27  ;;  %v11134_v46 = vrot.slane %v5662_v10, %v9993_v27  ;;  %v5692_v48 = vcombine.high %v11120_v35, %v11120_v35  ;;  %v11168_v10 = vld [vmem:[#allocation2 + $0x230] sm:$0xff]  }
 0x980   :  { %v11131_v42 = vrot.slane %v5507_v33, %v9993_v27  ;;  %v5537_v7 = vcombine.high %v11123_v36, %v11123_v36  ;;  %v5538_v41 = vcombine.high %v5528_v37, %v5528_v37 }
 0x981   :  { %v5444_v45 = vpop.f32.mrb[124].mxu1  ;;  %v5484_v47 = vpop.f32.mrb[140].mxu0  ;;  %v11145_v53 = vrot.slane %v5663_v11, %v9993_v27  ;;  %v5693_v4 = vcombine.high %v11128_v24, %v11128_v24  ;;  %v5694_v0 = vcombine.high %v11134_v46, %v11134_v46 }
 0x982   :  { %v5549_v61 = vcombine.high %v5444_v45, %v5444_v45  ;;  %v5556_v9 = vrot.slane %v5444_v45, %v9993_v27  ;;  %v9206_v12 = vpop.f32.mrb[125].mxu1  ;;  %v5705_v40 = vcombine.high %v5484_v47, %v5484_v47  ;;  %v9212_v1 = vpop.f32.mrb[141].mxu0  ;;  %v5712_v21 = vrot.slane %v5484_v47, %v9993_v27 }
 0x983   :  { %v5447_v5 = vpop.f32.mrb[126].mxu1  ;;  %v5487_v39 = vpop.f32.mrb[142].mxu0  ;;  %v5539_v11 = vcombine.high %v11131_v42, %v11131_v42  ;;  %v11185_v1 = vld [vmem:[#allocation2 + $0x228] sm:$0xff]  }
 0x984   :  { %v5563_v32 = vrot.slane %v5549_v61, %v9993_v27  ;;  %v5564_v50 = vcombine.high %v5556_v9, %v5556_v9  ;;  %v5572_v51 = vrot.slane %v5556_v9, %v9993_v27  ;;  %v9207_v15 = vpop.f32.mrb[127].mxu1  ;;  %v5719_v20 = vrot.slane %v5705_v40, %v9993_v27  ;;  %v9213_v56 = vpop.f32.mrb[143].mxu0  ;;  %v11190_v39 = vld [vmem:[#allocation2 + $0x238] sm:$0xff]  }
 0x985   :  { %v5720_v54 = vcombine.high %v5712_v21, %v5712_v21  ;;  %v5728_v49 = vrot.slane %v5712_v21, %v9993_v27 }
 0x986   :  { %v5565_v58 = vcombine.high %v5563_v32, %v5563_v32  ;;  %v5579_v59 = vrot.slane %v5563_v32, %v9993_v27  ;;  %v5586_v60 = vrot.slane %v5564_v50, %v9993_v27  ;;  %v5594_v38 = vcombine.high %v5572_v51, %v5572_v51 }
 0x987   :  { %v5601_v34 = vrot.slane %v5572_v51, %v9931_v14  ;;  %v5721_v8 = vcombine.high %v5719_v20, %v5719_v20  ;;  %v5735_v52 = vrot.slane %v5719_v20, %v9993_v27  ;;  %v5742_v16 = vrot.slane %v5720_v54, %v9993_v27 }
 0x988   :  { %v5593_v19 = vrot.slane %v5565_v58, %v9993_v27  ;;  %v5596_v26 = vcombine.high %v5586_v60, %v5586_v60  ;;  %v5605_v31 = vrot.slane %v5586_v60, %v9931_v14  ;;  %v5595_v23 = vcombine.high %v5579_v59, %v5579_v59 }
 0x989   :  { %v5609_v22 = vrot.slane %v5594_v38, %v9931_v14  ;;  %v5638_v44 = vsel %vm643_vm5, %v5514_v30, %v5601_v34  ;;  %v5749_v3 = vrot.slane %v5721_v8, %v9993_v27  ;;  %v5750_v45 = vcombine.high %v5728_v49, %v5728_v49  ;;  %v11215_v38 = vld [vmem:[#allocation2 + $0x240] sm:$0xff]  }
 0x98a   :  { %v5597_v25 = vcombine.high %v5593_v19, %v5593_v19  ;;  %v5613_v28 = vrot.slane %v5596_v26, %v9931_v14  ;;  %v11165_v57 = vpack.c.bf16 %v5638_v44, %v5638_v44  ;;  %v5639_v33 = vsel %vm643_vm5, %v5528_v37, %v5605_v31  ;;  %v11293_v44 = vld [vmem:[#allocation2 + $0x278] sm:$0xff]  }
 0x98b   :  { %v5640_v30 = vsel %vm643_vm5, %v5536_v43, %v5609_v22  ;;  %v5617_v47 = vrot.slane %v5579_v59, %v9931_v14  ;;  %v11174_v61 = vpack.c.bf16 %v5639_v33, %v5639_v33  ;;  %v5621_v27 = vrot.slane %v5593_v19, %v9931_v14  ;;  %v11289_v22 = vld [vmem:[#allocation2 + $0x268] sm:$0xff]   ;;  %v11321_v33 = vld [vmem:[#allocation2 + $0x298] sm:$0xff]  }
 0x98c   :  { %v5641_v9 = vsel %vm643_vm5, %v5538_v41, %v5613_v28  ;;  %v5625_v12 = vrot.slane %v5595_v23, %v9931_v14  ;;  %9219 = vmatmul.mubr.msk.bf16.vlgmr.msra.gmra.mrb[128].mxu1 %vm828_vm6, %v11165_v57  ;;  %v5751_v37 = vcombine.high %v5735_v52, %v5735_v52  ;;  %v5752_v40 = vcombine.high %v5742_v16, %v5742_v16  ;;  %v11307_v28 = vld [vmem:[#allocation2 + $0x290] sm:$0xff]  }
 0x98d   :  { %v5629_v43 = vrot.slane %v5597_v25, %v9931_v14  ;;  %9231 = vmatpush3.bf16.msra.mxu1 %v11160_v55  ;;  %9227 = vmatmul.mubr.msk.bf16.vlgmr.msra.gmra.mrb[144].mxu0 %vm828_vm6, %v11174_v61  ;;  %v5753_v5 = vcombine.high %v5749_v3, %v5749_v3  ;;  %v5757_v21 = vrot.slane %v5728_v49, %v9931_v14 }
 0x98e   :  { %9239 = vmatpush3.bf16.msra.mxu0 %v11168_v10  ;;  %9232 = vmatprep.subr.bf16.mxu1 %v9859_v63  ;;  %v5761_v32 = vrot.slane %v5742_v16, %v9931_v14  ;;  %v5765_v50 = vrot.slane %v5750_v45, %v9931_v14  ;;  %v5769_v51 = vrot.slane %v5752_v40, %v9931_v14  ;;  %v11301_v16 = vld [vmem:[#allocation2 + $0x280] sm:$0xff]   ;;  %v11367_v40 = vld [vmem:[#allocation2 + $0x2d0] sm:$0xff]  }
 0x98f   :  { %9240 = vmatprep.subr.bf16.mxu0 %v9859_v63  ;;  %9234 = vmatprep.mubr.msk.bf16.mxu1 %vm9860_vm3, %v9859_v63  ;;  %v5773_v15 = vrot.slane %v5735_v52, %v9931_v14  ;;  %v5777_v20 = vrot.slane %v5749_v3, %v9931_v14  ;;  %v11202_v56 = vsel %vm643_vm5, %v11120_v35, %v5757_v21  ;;  %v11279_v52 = vld [vmem:[#allocation2 + $0x270] sm:$0xff]   ;;  %v11317_v3 = vld [vmem:[#allocation2 + $0x288] sm:$0xff]   ;;  %v11380_v21 = vld [vmem:[#allocation2 + $0x2d8] sm:$0xff]  }
 0x990   :  { %9242 = vmatprep.mubr.msk.bf16.mxu0 %vm9860_vm3, %v9859_v63  ;;  %v5781_v41 = vrot.slane %v5751_v37, %v9931_v14  ;;  %v5642_v54 = vsel %vm643_vm5, %v11123_v36, %v5617_v47  ;;  %v5643_v58 = vsel %vm643_vm5, %v11131_v42, %v5621_v27  ;;  %v5644_v59 = vsel %vm643_vm5, %v5537_v7, %v5625_v12  ;;  %v11223_v36 = vld [vmem:[#allocation2 + $0x250] sm:$0xff]   ;;  %v11351_v27 = vld [vmem:[#allocation2 + $0x2b8] sm:$0xff]   ;;  %v11359_v12 = vld [vmem:[#allocation2 + $0x2c0] sm:$0xff]  }
 0x991   :  { %9233 = vmatpush3.bf16.msra.mxu1 %v11185_v1  ;;  %v5695_v60 = vcombine.high %v11145_v53, %v11145_v53  ;;  %v5785_v34 = vrot.slane %v5753_v5, %v9931_v14  ;;  %v5645_v8 = vsel %vm643_vm5, %v5539_v11, %v5629_v43  ;;  %v11220_v49 = vpack.c.bf16 %v5640_v30, %v5640_v30  ;;  %v11329_v30 = vld [vmem:[#allocation2 + $0x2a0] sm:$0xff]   ;;  %v11337_v11 = vld [vmem:[#allocation2 + $0x2b0] sm:$0xff]   ;;  %v11376_v5 = vld [vmem:[#allocation2 + $0x2c8] sm:$0xff]  }
 0x992   :  { %9241 = vmatpush3.bf16.msra.mxu0 %v11190_v39  ;;  %9246 = vmatprep.subr.bf16.mxu1 %v9859_v63  ;;  %v5795_v42 = vsel %vm643_vm5, %v11134_v46, %v5761_v32  ;;  %v11231_v7 = vsel %vm643_vm5, %v5692_v48, %v5765_v50  ;;  %v11233_v14 = vpack.c.bf16 %v5641_v9, %v5641_v9  ;;  %v11258_v48 = vld [vmem:[#allocation2 + $0x248] sm:$0xff]   ;;  %v11388_v32 = vld [vmem:[#allocation2 + $0x2e0] sm:$0xff]  }
 0x993   :  { %9254 = vmatprep.subr.bf16.mxu0 %v9859_v63  ;;  %v11237_v19 = vsel %vm643_vm5, %v5694_v0, %v5769_v51  ;;  %v11241_v26 = vsel %vm643_vm5, %v11128_v24, %v5773_v15  ;;  %v11247_v35 = vsel %vm643_vm5, %v11145_v53, %v5777_v20  ;;  %v11253_v46 = vsel %vm643_vm5, %v5693_v4, %v5781_v41  ;;  %v11265_v53 = vld [vmem:[#allocation2 + $0x258] sm:$0xff]   ;;  %v11273_v24 = vld [vmem:[#allocation2 + $0x260] sm:$0xff]   ;;  %v11347_v9 = vld [vmem:[#allocation2 + $0x2a8] sm:$0xff]  }
 0x994   :  { %9235 = vmatmul.mubr.msk.bf16.vlgmr.msra.gmra.mrb[132].mxu1 %vm828_vm6, %v11220_v49  ;;  %v11261_v31 = vsel %vm643_vm5, %v5695_v60, %v5785_v34  ;;  %v11276_v4 = vpack.c.bf16 %v5642_v54, %v5642_v54  ;;  %v11281_v23 = vpack.c.bf16 %v5643_v58, %v5643_v58  ;;  %v11304_v25 = vpack.c.bf16 %v5644_v59, %v5644_v59  ;;  %v11394_v51 = vld [vmem:[#allocation2 + $0x2f0] sm:$0xff]   ;;  %v11402_v20 = vld [vmem:[#allocation2 + $0x2e8] sm:$0xff]  }
 0x995   :  { %9247 = vmatpush3.bf16.msra.mxu1 %v11215_v38  ;;  %9243 = vmatmul.mubr.msk.bf16.vlgmr.msra.gmra.mrb[148].mxu0 %vm828_vm6, %v11233_v14  ;;  %v11309_v0 = vpack.c.bf16 %v5645_v8, %v5645_v8  ;;  %v11333_v45 = vpack.c.bf16 %v11202_v56, %v11202_v56  ;;  %v11339_v47 = vpack.c.bf16 %v5795_v42, %v5795_v42  ;;  %v11406_v56 = vld [vmem:[#allocation2 + $0x2f8] sm:$0xff]  }
 0x996   :  { %9255 = vmatpush3.bf16.msra.mxu0 %v11223_v36  ;;  %9248 = vmatprep.subr.bf16.mxu1 %v9859_v63  ;;  %v11364_v37 = vpack.c.bf16 %v11231_v7, %v11231_v7  ;;  %v6253_v43 = vpack.c.bf16 %v11237_v19, %v11237_v19  ;;  %v6254_v50 = vpack.c.bf16 %v11241_v26, %v11241_v26 }
 0x997   :  { %9256 = vmatprep.subr.bf16.mxu0 %v9859_v63  ;;  %9250 = vmatprep.mubr.msk.bf16.mxu1 %vm9860_vm3, %v9859_v63  ;;  %v6255_v15 = vpack.c.bf16 %v11247_v35, %v11247_v35  ;;  %v6256_v41 = vpack.c.bf16 %v11253_v46, %v11253_v46  ;;  %v6257_v54 = vpack.c.bf16 %v11261_v31, %v11261_v31 }
 0x998   :  { %9258 = vmatprep.mubr.msk.bf16.mxu0 %vm9860_vm3, %v9859_v63 }
 0x999   :  { %9249 = vmatpush3.bf16.msra.mxu1 %v11258_v48 }
 0x99a   :  { %9257 = vmatpush3.bf16.msra.mxu0 %v11265_v53  ;;  %9262 = vmatprep.subr.bf16.mxu1 %v9859_v63 }
 0x99b   :  { %9270 = vmatprep.subr.bf16.mxu0 %v9859_v63 }
 0x99c   :  { %9251 = vmatmul.mubr.msk.bf16.vlgmr.msra.gmra.mrb[136].mxu1 %vm828_vm6, %v11276_v4 }
 0x99d   :  { %9263 = vmatpush3.bf16.msra.mxu1 %v11273_v24  ;;  %9259 = vmatmul.mubr.msk.bf16.vlgmr.msra.gmra.mrb[152].mxu0 %vm828_vm6, %v11281_v23 }
 0x99e   :  { %9271 = vmatpush3.bf16.msra.mxu0 %v11279_v52  ;;  %9264 = vmatprep.subr.bf16.mxu1 %v9859_v63 }
 0x99f   :  { %9272 = vmatprep.subr.bf16.mxu0 %v9859_v63  ;;  %9266 = vmatprep.mubr.msk.bf16.mxu1 %vm9860_vm3, %v9859_v63 }
 0x9a0   :  { %9274 = vmatprep.mubr.msk.bf16.mxu0 %vm9860_vm3, %v9859_v63 }
 0x9a1   :  { %9265 = vmatpush3.bf16.msra.mxu1 %v11289_v22 }
 0x9a2   :  { %9273 = vmatpush3.bf16.msra.mxu0 %v11293_v44  ;;  %9278 = vmatprep.subr.bf16.mxu1 %v9859_v63 }
 0x9a3   :  { %9286 = vmatprep.subr.bf16.mxu0 %v9859_v63 }
 0x9a4   :  { %9267 = vmatmul.mubr.msk.bf16.vlgmr.msra.gmra.mrb[140].mxu1 %vm828_vm6, %v11304_v25 }
 0x9a5   :  { %9279 = vmatpush3.bf16.msra.mxu1 %v11301_v16  ;;  %9275 = vmatmul.mubr.msk.bf16.vlgmr.msra.gmra.mrb[156].mxu0 %vm828_vm6, %v11309_v0 }
 0x9a6   :  { %9287 = vmatpush3.bf16.msra.mxu0 %v11307_v28  ;;  %9280 = vmatprep.subr.bf16.mxu1 %v9859_v63 }
 0x9a7   :  { %9288 = vmatprep.subr.bf16.mxu0 %v9859_v63  ;;  %9282 = vmatprep.mubr.msk.bf16.mxu1 %vm9860_vm3, %v9859_v63 }
 0x9a8   :  { %9290 = vmatprep.mubr.msk.bf16.mxu0 %vm9860_vm3, %v9859_v63 }
 0x9a9   :  { %9281 = vmatpush3.bf16.msra.mxu1 %v11317_v3 }
 0x9aa   :  { %9289 = vmatpush3.bf16.msra.mxu0 %v11321_v33  ;;  %9294 = vmatprep.subr.bf16.mxu1 %v9859_v63 }
 0x9ab   :  { %9302 = vmatprep.subr.bf16.mxu0 %v9859_v63 }
 0x9ac   :  { %9283 = vmatmul.mubr.msk.bf16.vlgmr.msra.gmra.mrb[144].mxu1 %vm828_vm6, %v11333_v45 }
 0x9ad   :  { %9295 = vmatpush3.bf16.msra.mxu1 %v11329_v30  ;;  %9291 = vmatmul.mubr.msk.bf16.vlgmr.msra.gmra.mrb[160].mxu0 %vm828_vm6, %v11339_v47 }
 0x9ae   :  { %9303 = vmatpush3.bf16.msra.mxu0 %v11337_v11  ;;  %9296 = vmatprep.subr.bf16.mxu1 %v9859_v63 }
 0x9af   :  { %9304 = vmatprep.subr.bf16.mxu0 %v9859_v63  ;;  %9298 = vmatprep.mubr.msk.bf16.mxu1 %vm9860_vm3, %v9859_v63 }
 0x9b0   :  { %9306 = vmatprep.mubr.msk.bf16.mxu0 %vm9860_vm3, %v9859_v63 }
 0x9b1   :  { %9297 = vmatpush3.bf16.msra.mxu1 %v11347_v9 }
 0x9b2   :  { %9305 = vmatpush3.bf16.msra.mxu0 %v11351_v27  ;;  %9310 = vmatprep.subr.bf16.mxu1 %v9859_v63 }
 0x9b3   :  { %9318 = vmatprep.subr.bf16.mxu0 %v9859_v63 }
 0x9b4   :  { %9299 = vmatmul.mubr.msk.bf16.vlgmr.msra.gmra.mrb[148].mxu1 %vm828_vm6, %v11364_v37 }
 0x9b5   :  { %9311 = vmatpush3.bf16.msra.mxu1 %v11359_v12  ;;  %9307 = vmatmul.mubr.msk.bf16.vlgmr.msra.gmra.mrb[164].mxu0 %vm828_vm6, %v6253_v43 }
 0x9b6   :  { %9319 = vmatpush3.bf16.msra.mxu0 %v11367_v40  ;;  %9312 = vmatprep.subr.bf16.mxu1 %v9859_v63 }
 0x9b7   :  { %9320 = vmatprep.subr.bf16.mxu0 %v9859_v63  ;;  %9314 = vmatprep.mubr.msk.bf16.mxu1 %vm9860_vm3, %v9859_v63 }
 0x9b8   :  { %9322 = vmatprep.mubr.msk.bf16.mxu0 %vm9860_vm3, %v9859_v63 }
 0x9b9   :  { %9313 = vmatpush3.bf16.msra.mxu1 %v11376_v5 }
 0x9ba   :  { %9321 = vmatpush3.bf16.msra.mxu0 %v11380_v21  ;;  %9326 = vmatprep.subr.bf16.mxu1 %v9859_v63 }
 0x9bb   :  { %9334 = vmatprep.subr.bf16.mxu0 %v9859_v63 }
 0x9bc   :  { %9315 = vmatmul.mubr.msk.bf16.vlgmr.msra.gmra.mrb[152].mxu1 %vm828_vm6, %v6254_v50 }
 0x9bd   :  { %9327 = vmatpush3.bf16.msra.mxu1 %v11388_v32  ;;  %9323 = vmatmul.mubr.msk.bf16.vlgmr.msra.gmra.mrb[168].mxu0 %vm828_vm6, %v6255_v15 }
 0x9be   :  { %9335 = vmatpush3.bf16.msra.mxu0 %v11394_v51  ;;  %9328 = vmatprep.subr.bf16.mxu1 %v9859_v63 }
 0x9bf   :  { %9336 = vmatprep.subr.bf16.mxu0 %v9859_v63  ;;  %9330 = vmatprep.mubr.msk.bf16.mxu1 %vm9860_vm3, %v9859_v63 }
 0x9c0   :  { %9338 = vmatprep.mubr.msk.bf16.mxu0 %vm9860_vm3, %v9859_v63 }
 0x9c1   :  { %9329 = vmatpush3.bf16.msra.mxu1 %v11402_v20 }
 0x9c2   :  { %9337 = vmatpush3.bf16.msra.mxu0 %v11406_v56  ;;  %9342 = vmatprep.subr.bf16.mxu1 %v9859_v63 }
 0x9c3   :  { %9350 = vmatprep.subr.bf16.mxu0 %v9859_v63 }
 0x9c4   :  { %9331 = vmatmul.mubr.msk.bf16.vlgmr.msra.gmra.mrb[156].mxu1 %vm828_vm6, %v6256_v41 }
 0x9c5   :  { %9343 = vmatpush3.bf16.msra.mxu1 %v11098_v6  ;;  %9339 = vmatmul.mubr.msk.bf16.vlgmr.msra.gmra.mrb[172].mxu0 %vm828_vm6, %v6257_v54 }
 0x9c6   :  { %9351 = vmatpush3.bf16.msra.mxu0 %v11101_v17  ;;  %9344 = vmatprep.subr.bf16.mxu1 %v9859_v63 }
 0x9c7   :  { %9352 = vmatprep.subr.bf16.mxu0 %v9859_v63  ;;  %9346 = vmatprep.mubr.msk.bf16.mxu1 %vm9860_vm3, %v9859_v63 }
 0x9c8   :  { %9354 = vmatprep.mubr.msk.bf16.mxu0 %vm9860_vm3, %v9859_v63 }
 0x9c9   :  { %9345 = vmatpush3.bf16.msra.mxu1 %v11105_v29 }
 0x9ca   :  { %9353 = vmatpush3.bf16.msra.mxu0 %v11107_v18  ;;  %9358 = vmatprep.subr.bf16.mxu1 %v9859_v63 }
 0x9cb   :  { %9366 = vmatprep.subr.bf16.mxu0 %v9859_v63 }
 0x9cc   :  { %9347 = vmatmul.mubr.msk.bf16.vlgmr.msra.gmra.mrb[160].mxu1 %vm828_vm6, %v11333_v45 }
 0x9cd   :  { %9359 = vmatpush3.bf16.msra.mxu1 %v11160_v55  ;;  %9355 = vmatmul.mubr.msk.bf16.vlgmr.msra.gmra.mrb[176].mxu0 %vm828_vm6, %v11339_v47 }
 0x9ce   :  { %9367 = vmatpush3.bf16.msra.mxu0 %v11168_v10  ;;  %9360 = vmatprep.subr.bf16.mxu1 %v9859_v63 }
 0x9cf   :  { %9368 = vmatprep.subr.bf16.mxu0 %v9859_v63  ;;  %9362 = vmatprep.mubr.msk.bf16.mxu1 %vm9860_vm3, %v9859_v63 }
 0x9d0   :  { %9370 = vmatprep.mubr.msk.bf16.mxu0 %vm9860_vm3, %v9859_v63 }
 0x9d1   :  { %9361 = vmatpush3.bf16.msra.mxu1 %v11185_v1 }
 0x9d2   :  { %9369 = vmatpush3.bf16.msra.mxu0 %v11190_v39  ;;  %9374 = vmatprep.subr.bf16.mxu1 %v9859_v63 }
 0x9d3   :  { %9382 = vmatprep.subr.bf16.mxu0 %v9859_v63 }
 0x9d4   :  { %9363 = vmatmul.mubr.msk.bf16.vlgmr.msra.gmra.mrb[164].mxu1 %vm828_vm6, %v11364_v37 }
 0x9d5   :  { %9375 = vmatpush3.bf16.msra.mxu1 %v11215_v38  ;;  %9371 = vmatmul.mubr.msk.bf16.vlgmr.msra.gmra.mrb[180].mxu0 %vm828_vm6, %v6253_v43 }
 0x9d6   :  { %9383 = vmatpush3.bf16.msra.mxu0 %v11223_v36  ;;  %9376 = vmatprep.subr.bf16.mxu1 %v9859_v63 }
 0x9d7   :  { %9384 = vmatprep.subr.bf16.mxu0 %v9859_v63  ;;  %9378 = vmatprep.mubr.msk.bf16.mxu1 %vm9860_vm3, %v9859_v63 }
 0x9d8   :  { %9386 = vmatprep.mubr.msk.bf16.mxu0 %vm9860_vm3, %v9859_v63 }
 0x9d9   :  { %9377 = vmatpush3.bf16.msra.mxu1 %v11258_v48 }
 0x9da   :  { %9385 = vmatpush3.bf16.msra.mxu0 %v11265_v53  ;;  %9390 = vmatprep.subr.bf16.mxu1 %v9859_v63 }
 0x9db   :  { %9398 = vmatprep.subr.bf16.mxu0 %v9859_v63 }
 0x9dc   :  { %9379 = vmatmul.mubr.msk.bf16.vlgmr.msra.gmra.mrb[168].mxu1 %vm828_vm6, %v6254_v50 }
 0x9dd   :  { %9391 = vmatpush3.bf16.msra.mxu1 %v11273_v24  ;;  %9387 = vmatmul.mubr.msk.bf16.vlgmr.msra.gmra.mrb[184].mxu0 %vm828_vm6, %v6255_v15 }
 0x9de   :  { %9399 = vmatpush3.bf16.msra.mxu0 %v11279_v52  ;;  %9392 = vmatprep.subr.bf16.mxu1 %v9859_v63 }
 0x9df   :  { %9400 = vmatprep.subr.bf16.mxu0 %v9859_v63  ;;  %9394 = vmatprep.mubr.msk.bf16.mxu1 %vm9860_vm3, %v9859_v63 }
 0x9e0   :  { %9402 = vmatprep.mubr.msk.bf16.mxu0 %vm9860_vm3, %v9859_v63 }
 0x9e1   :  { %9393 = vmatpush3.bf16.msra.mxu1 %v11289_v22 }
 0x9e2   :  { %9401 = vmatpush3.bf16.msra.mxu0 %v11293_v44  ;;  %9406 = vmatprep.subr.bf16.mxu1 %v9859_v63 }
 0x9e3   :  { %9414 = vmatprep.subr.bf16.mxu0 %v9859_v63 }
 0x9e4   :  { %9395 = vmatmul.mubr.msk.bf16.vlgmr.msra.gmra.mrb[172].mxu1 %vm828_vm6, %v6256_v41 }
 0x9e5   :  { %9407 = vmatpush3.bf16.msra.mxu1 %v11301_v16  ;;  %9403 = vmatmul.mubr.msk.bf16.vlgmr.msra.gmra.mrb[188].mxu0 %vm828_vm6, %v6257_v54 }
 0x9e6   :  { %9415 = vmatpush3.bf16.msra.mxu0 %v11307_v28  ;;  %9408 = vmatprep.subr.bf16.mxu1 %v9859_v63 }
 0x9e7   :  { %9416 = vmatprep.subr.bf16.mxu0 %v9859_v63  ;;  %9410 = vmatprep.mubr.msk.bf16.mxu1 %vm9860_vm3, %v9859_v63 }
 0x9e8   :  { %9418 = vmatprep.mubr.msk.bf16.mxu0 %vm9860_vm3, %v9859_v63 }
 0x9e9   :  { %9409 = vmatpush3.bf16.msra.mxu1 %v11317_v3 }
 0x9ea   :  { %9417 = vmatpush3.bf16.msra.mxu0 %v11321_v33  ;;  %9422 = vmatprep.subr.bf16.mxu1 %v9859_v63 }
 0x9eb   :  { %9430 = vmatprep.subr.bf16.mxu0 %v9859_v63 }
 0x9ec   :  { %9411 = vmatmul.mubr.msk.bf16.vlgmr.msra.gmra.mrb[160].mxu1 %vm828_vm6, %v11165_v57 }
 0x9ed   :  { %9423 = vmatpush3.bf16.msra.mxu1 %v11329_v30  ;;  %9419 = vmatmul.mubr.msk.bf16.vlgmr.msra.gmra.mrb[176].mxu0 %vm828_vm6, %v11174_v61 }
 0x9ee   :  { %9431 = vmatpush3.bf16.msra.mxu0 %v11337_v11  ;;  %9424 = vmatprep.subr.bf16.mxu1 %v9859_v63 }
 0x9ef   :  { %9432 = vmatprep.subr.bf16.mxu0 %v9859_v63  ;;  %9426 = vmatprep.mubr.msk.bf16.mxu1 %vm9860_vm3, %v9859_v63 }
 0x9f0   :  { %9434 = vmatprep.mubr.msk.bf16.mxu0 %vm9860_vm3, %v9859_v63 }
 0x9f1   :  { %9425 = vmatpush3.bf16.msra.mxu1 %v11347_v9 }
 0x9f2   :  { %9433 = vmatpush3.bf16.msra.mxu0 %v11351_v27  ;;  %9438 = vmatprep.subr.bf16.mxu1 %v9859_v63 }
 0x9f3   :  { %9446 = vmatprep.subr.bf16.mxu0 %v9859_v63 }
 0x9f4   :  { %9427 = vmatmul.mubr.msk.bf16.vlgmr.msra.gmra.mrb[164].mxu1 %vm828_vm6, %v11220_v49 }
 0x9f5   :  { %9439 = vmatpush3.bf16.msra.mxu1 %v11359_v12  ;;  %9435 = vmatmul.mubr.msk.bf16.vlgmr.msra.gmra.mrb[180].mxu0 %vm828_vm6, %v11233_v14 }
 0x9f6   :  { %9447 = vmatpush3.bf16.msra.mxu0 %v11367_v40  ;;  %9440 = vmatprep.subr.bf16.mxu1 %v9859_v63 }
 0x9f7   :  { %9448 = vmatprep.subr.bf16.mxu0 %v9859_v63  ;;  %9442 = vmatprep.mubr.msk.bf16.mxu1 %vm9860_vm3, %v9859_v63 }
 0x9f8   :  { %9450 = vmatprep.mubr.msk.bf16.mxu0 %vm9860_vm3, %v9859_v63 }
 0x9f9   :  { %9441 = vmatpush3.bf16.msra.mxu1 %v11376_v5 }
 0x9fa   :  { %9449 = vmatpush3.bf16.msra.mxu0 %v11380_v21  ;;  %9454 = vmatprep.subr.bf16.mxu1 %v9859_v63 }
 0x9fb   :  { %9462 = vmatprep.subr.bf16.mxu0 %v9859_v63 }
 0x9fc   :  { %9443 = vmatmul.mubr.msk.bf16.vlgmr.msra.gmra.mrb[168].mxu1 %vm828_vm6, %v11276_v4 }
 0x9fd   :  { %9455 = vmatpush3.bf16.msra.mxu1 %v11388_v32  ;;  %9451 = vmatmul.mubr.msk.bf16.vlgmr.msra.gmra.mrb[184].mxu0 %vm828_vm6, %v11281_v23 }
 0x9fe   :  { %9463 = vmatpush3.bf16.msra.mxu0 %v11394_v51  ;;  %9456 = vmatprep.subr.bf16.mxu1 %v9859_v63 }
 0x9ff   :  { %9464 = vmatprep.subr.bf16.mxu0 %v9859_v63  ;;  %9458 = vmatprep.mubr.msk.bf16.mxu1 %vm9860_vm3, %v9859_v63 }
 0xa00   :  { %9466 = vmatprep.mubr.msk.bf16.mxu0 %vm9860_vm3, %v9859_v63 }
 0xa01   :  { %9457 = vmatpush3.bf16.msra.mxu1 %v11402_v20 }
 0xa02   :  { %9465 = vmatpush3.bf16.msra.mxu0 %v11406_v56  ;;  %9470 = vmatprep.subr.bf16.mxu1 %v9859_v63 }
 0xa03   :  { %9482 = vmatprep.subr.bf16.mxu0 %v9859_v63 }
 0xa04   :  { %9459 = vmatmul.mubr.msk.bf16.vlgmr.msra.gmra.mrb[172].mxu1 %vm828_vm6, %v11304_v25 }
 0xa05   :  { %9467 = vmatmul.mubr.msk.bf16.vlgmr.msra.gmra.mrb[188].mxu0 %vm828_vm6, %v11309_v0  ;;  %9472 = vmatprep.mubr.msk.bf16.mxu1 %vm9860_vm3, %v9859_v63 }
 0xa06   :  { %9484 = vmatprep.mubr.msk.bf16.mxu0 %vm9860_vm3, %v9859_v63 }
 0xa5f   :  { %v5859_v6 = vpop.f32.mrb[128].mxu1 }
 0xa60   :  { %v9220_v17 = vpop.f32.mrb[129].mxu1  ;;  %v5914_v29 = vpop.f32.mrb[144].mxu0 }
 0xa61   :  { %v5862_v18 = vpop.f32.mrb[130].mxu1  ;;  %v9228_v55 = vpop.f32.mrb[145].mxu0 }
 0xa62   :  { %v9221_v57 = vpop.f32.mrb[131].mxu1  ;;  %v5917_v10 = vpop.f32.mrb[146].mxu0 }
 0xa63   :  { %v9229_v61 = vpop.f32.mrb[147].mxu0 }
 0xa67   :  { %v5969_v1 = vpop.f32.mrb[132].mxu1 }
 0xa68   :  { %v9236_v39 = vpop.f32.mrb[133].mxu1  ;;  %v6024_v58 = vpop.f32.mrb[148].mxu0 }
 0xa69   :  { %v5972_v59 = vpop.f32.mrb[134].mxu1  ;;  %v9244_v60 = vpop.f32.mrb[149].mxu0 }
 0xa6a   :  { %v9237_v38 = vpop.f32.mrb[135].mxu1  ;;  %v6027_v34 = vpop.f32.mrb[150].mxu0 }
 0xa6b   :  { %v9245_v8 = vpop.f32.mrb[151].mxu0 }
 0xa6f   :  { %v6079_v49 = vpop.f32.mrb[136].mxu1 }
 0xa70   :  { %v9252_v36 = vpop.f32.mrb[137].mxu1  ;;  %v6134_v42 = vpop.f32.mrb[152].mxu0 }
 0xa71   :  { %v6082_v7 = vpop.f32.mrb[138].mxu1  ;;  %v9260_v14 = vpop.f32.mrb[153].mxu0 }
 0xa72   :  { %v9253_v19 = vpop.f32.mrb[139].mxu1  ;;  %v6137_v26 = vpop.f32.mrb[154].mxu0 }
 0xa73   :  { %v9261_v35 = vpop.f32.mrb[155].mxu0 }
 0xa77   :  { %v11550_v46 = vpop.f32.mrb[140].mxu1 }
 0xa78   :  { %v9268_v48 = vpop.f32.mrb[141].mxu1  ;;  %v11552_v31 = vpop.f32.mrb[156].mxu0 }
 0xa79   :  { %v6192_v53 = vpop.f32.mrb[142].mxu1  ;;  %v9276_v24 = vpop.f32.mrb[157].mxu0 }
 0xa7a   :  { %v9269_v4 = vpop.f32.mrb[143].mxu1  ;;  %v6247_v52 = vpop.f32.mrb[158].mxu0 }
 0xa7b   :  { %v9277_v23 = vpop.f32.mrb[159].mxu0 }
 0xa7f   :  { %v6307_v22 = vpop.f32.mrb[144].mxu1 }
 0xa80   :  { %v6698_v44 = vsub.f32 %v5859_v6, %v6307_v22  ;;  %v9284_v16 = vpop.f32.mrb[145].mxu1  ;;  %v6362_v25 = vpop.f32.mrb[160].mxu0 }
 0xa81   :  { %v6310_v28 = vpop.f32.mrb[146].mxu1  ;;  %v6699_v0 = vsub.f32 %v5914_v29, %v6362_v25  ;;  %v9292_v3 = vpop.f32.mrb[161].mxu0 }
 0xa82   :  { %v7346_v33 = vpack.c.bf16 %v6698_v44, %v6698_v44  ;;  %v9285_v30 = vpop.f32.mrb[147].mxu1  ;;  %v6365_v45 = vpop.f32.mrb[162].mxu0 }
 0xa83   :  { %v7347_v11 = vpack.c.bf16 %v6699_v0, %v6699_v0  ;;  %v9293_v47 = vpop.f32.mrb[163].mxu0 }
 0xa84   :  { %v7445_v9 = vunpack.c.l.b16 %v7346_v33 }
 0xa85   :  { %v7446_v27 = vunpack.c.l.b16 %v7347_v11 }
 0xa86   :  { %v7571_v12 = vrot.slane %v7445_v9, 1 }
 0xa87   :  { %v7453_v37 = vrot.slane %v7446_v27, 7  ;;  %v6417_v40 = vpop.f32.mrb[148].mxu1 }
 0xa88   :  { %v7572_v43 = vsel %vm2391_vm7, %v7446_v27, %v7571_v12  ;;  %v6700_v5 = vsub.f32 %v5969_v1, %v6417_v40  ;;  %v9300_v21 = vpop.f32.mrb[149].mxu1  ;;  %v6472_v32 = vpop.f32.mrb[164].mxu0 }
 0xa89   :  { %v7454_v50 = vsel %vm2391_vm7, %v7453_v37, %v7445_v9  ;;  %v6420_v51 = vpop.f32.mrb[150].mxu1  ;;  %v6701_v15 = vsub.f32 %v6024_v58, %v6472_v32  ;;  %v9308_v20 = vpop.f32.mrb[165].mxu0 }
 0xa8a   :  { %v7348_v56 = vpack.c.bf16 %v6700_v5, %v6700_v5  ;;  %v9301_v41 = vpop.f32.mrb[151].mxu1  ;;  %v6475_v54 = vpop.f32.mrb[166].mxu0 }
 0xa8b   :  { %v7349_v6 = vpack.c.bf16 %v6701_v15, %v6701_v15  ;;  %v9309_v17 = vpop.f32.mrb[167].mxu0 }
 0xa8c   :  { %v7447_v29 = vunpack.c.l.b16 %v7348_v56 }
 0xa8d   :  { %v7448_v18 = vunpack.c.l.b16 %v7349_v6 }
 0xa8e   :  { %v7455_v55 = vrot.slane %v7447_v29, 6  ;;  %v7573_v57 = vrot.slane %v7447_v29, 7 }
 0xa8f   :  { %v7457_v10 = vrot.slane %v7448_v18, 5  ;;  %v7575_v61 = vrot.slane %v7448_v18, 6  ;;  %v6527_v39 = vpop.f32.mrb[152].mxu1 }
 0xa90   :  { %v7456_v1 = vsel %vm2394_vm8, %v7455_v55, %v7454_v50  ;;  %v7574_v59 = vsel %vm2394_vm8, %v7573_v57, %v7572_v43  ;;  %v6702_v60 = vsub.f32 %v6079_v49, %v6527_v39  ;;  %v9316_v38 = vpop.f32.mrb[153].mxu1  ;;  %v6582_v58 = vpop.f32.mrb[168].mxu0 }
 0xa91   :  { %v7458_v34 = vsel %vm2397_vm9, %v7457_v10, %v7456_v1  ;;  %v7576_v8 = vsel %vm2397_vm9, %v7575_v61, %v7574_v59  ;;  %v6530_v36 = vpop.f32.mrb[154].mxu1  ;;  %v6703_v7 = vsub.f32 %v6134_v42, %v6582_v58  ;;  %v9324_v14 = vpop.f32.mrb[169].mxu0 }
 0xa92   :  { %v7350_v19 = vpack.c.bf16 %v6702_v60, %v6702_v60  ;;  %v9317_v26 = vpop.f32.mrb[155].mxu1  ;;  %v6585_v35 = vpop.f32.mrb[170].mxu0 }
 0xa93   :  { %v7351_v48 = vpack.c.bf16 %v6703_v7, %v6703_v7  ;;  %v9325_v53 = vpop.f32.mrb[171].mxu0 }
 0xa94   :  { %v7449_v24 = vunpack.c.l.b16 %v7350_v19 }
 0xa95   :  { %v7450_v4 = vunpack.c.l.b16 %v7351_v48 }
 0xa96   :  { %v7459_v52 = vrot.slane %v7449_v24, 4  ;;  %v7577_v23 = vrot.slane %v7449_v24, 5 }
 0xa97   :  { %v7461_v22 = vrot.slane %v7450_v4, 3  ;;  %v7579_v49 = vrot.slane %v7450_v4, 4  ;;  %v6637_v44 = vpop.f32.mrb[156].mxu1 }
 0xa98   :  { %v7460_v16 = vsel %vm2400_vm10, %v7459_v52, %v7458_v34  ;;  %v7578_v25 = vsel %vm2400_vm10, %v7577_v23, %v7576_v8  ;;  %v6704_v28 = vsub.f32 %v11550_v46, %v6637_v44  ;;  %v9332_v42 = vpop.f32.mrb[157].mxu1  ;;  %v6692_v0 = vpop.f32.mrb[172].mxu0 }
 0xa99   :  { %v7462_v3 = vsel %vm2403_vm11, %v7461_v22, %v7460_v16  ;;  %v7580_v33 = vsel %vm2403_vm11, %v7579_v49, %v7578_v25  ;;  %v6640_v30 = vpop.f32.mrb[158].mxu1  ;;  %v6705_v45 = vsub.f32 %v11552_v31, %v6692_v0  ;;  %v9340_v11 = vpop.f32.mrb[173].mxu0 }
 0xa9a   :  { %v7352_v47 = vpack.c.bf16 %v6704_v28, %v6704_v28  ;;  %v9333_v9 = vpop.f32.mrb[159].mxu1  ;;  %v6695_v27 = vpop.f32.mrb[174].mxu0 }
 0xa9b   :  { %v7353_v12 = vpack.c.bf16 %v6705_v45, %v6705_v45  ;;  %v9341_v37 = vpop.f32.mrb[175].mxu0 }
 0xa9c   :  { %v7451_v40 = vunpack.c.l.b16 %v7352_v47 }
 0xa9d   :  { %v7452_v43 = vunpack.c.l.b16 %v7353_v12 }
 0xa9e   :  { %v7463_v5 = vrot.slane %v7451_v40, 2  ;;  %v7581_v21 = vrot.slane %v7451_v40, 3 }
 0xa9f   :  { %v7465_v46 = vrot.slane %v7452_v43, 1  ;;  %v7583_v32 = vrot.slane %v7452_v43, 2 }
 0xaa0   :  { %v7464_v50 = vsel %vm2406_vm12, %v7463_v5, %v7462_v3  ;;  %v7582_v51 = vsel %vm2406_vm12, %v7581_v21, %v7580_v33 }
 0xaa1   :  { %v11569_v15 = vsel %vm2409_vm13, %v7465_v46, %v7464_v50  ;;  %v11572_v31 = vsel %vm2409_vm13, %v7583_v32, %v7582_v51 }
 0xabf   :  { %v7060_v20 = vpop.f32.mrb[160].mxu1 }
 0xac0   :  { %v7354_v56 = vpack.c.bf16 %v7060_v20, %v7060_v20  ;;  %v9412_v41 = vpop.f32.mrb[161].mxu1  ;;  %v7100_v54 = vpop.f32.mrb[176].mxu0 }
 0xac1   :  { %v7063_v6 = vpop.f32.mrb[162].mxu1  ;;  %v7355_v17 = vpack.c.bf16 %v7100_v54, %v7100_v54  ;;  %v9420_v29 = vpop.f32.mrb[177].mxu0 }
 0xac2   :  { %v7370_v18 = vunpack.c.l.b16 %v7354_v56  ;;  %v9413_v55 = vpop.f32.mrb[163].mxu1  ;;  %v7103_v57 = vpop.f32.mrb[178].mxu0 }
 0xac3   :  { %v7371_v10 = vunpack.c.l.b16 %v7355_v17  ;;  %v9421_v61 = vpop.f32.mrb[179].mxu0 }
 0xac4   :  { %v7512_v39 = vrot.slane %v7370_v18, 1 }
 0xac5   :  { %v7378_v1 = vrot.slane %v7371_v10, 7 }
 0xac6   :  { %v7513_v59 = vsel %vm2391_vm7, %v7371_v10, %v7512_v39 }
 0xac7   :  { %v7379_v60 = vsel %vm2391_vm7, %v7378_v1, %v7370_v18  ;;  %v7140_v38 = vpop.f32.mrb[164].mxu1 }
 0xac8   :  { %v7356_v58 = vpack.c.bf16 %v7140_v38, %v7140_v38  ;;  %v9428_v34 = vpop.f32.mrb[165].mxu1  ;;  %v7180_v8 = vpop.f32.mrb[180].mxu0 }
 0xac9   :  { %v7143_v36 = vpop.f32.mrb[166].mxu1  ;;  %v7357_v7 = vpack.c.bf16 %v7180_v8, %v7180_v8  ;;  %v9436_v14 = vpop.f32.mrb[181].mxu0 }
 0xaca   :  { %v7372_v19 = vunpack.c.l.b16 %v7356_v58  ;;  %v9429_v26 = vpop.f32.mrb[167].mxu1  ;;  %v7183_v35 = vpop.f32.mrb[182].mxu0  ;;  %v7467_v14 = vpack.c.b16 %v11569_v15, %v11569_v15 }
 0xacb   :  { %v7373_v48 = vunpack.c.l.b16 %v7357_v7  ;;  %v9437_v53 = vpop.f32.mrb[183].mxu0  ;;  %v9756_v26 = vld [vmem:[#allocation4 + $0x80] sm:$0xff]   ;;  %v9804_v35 = vld [vmem:[%s11648_s1 + $0x18] sm:$0xff]  }
 0xacc   :  { %v7380_v24 = vrot.slane %v7372_v19, 6  ;;  %v7514_v4 = vrot.slane %v7372_v19, 7  ;;  %v7585_v19 = vpack.c.b16 %v11572_v31, %v11572_v31  ;;  %v9757_v31 = vld [vmem:[#allocation4 + $0x88] sm:$0xff]  }
 0xacd   :  { %v7382_v52 = vrot.slane %v7373_v48, 5  ;;  %v7516_v23 = vrot.slane %v7373_v48, 6  ;;  %v7469_v48 = vsel %vm2416_vm14, %v7467_v14, 0  ;;  %v9805_v53 = vld [vmem:[%s11648_s1 + $0x10] sm:$0xff]  }
 0xace   :  { %v7381_v22 = vsel %vm2394_vm8, %v7380_v24, %v7379_v60  ;;  %v7515_v49 = vsel %vm2394_vm8, %v7514_v4, %v7513_v59  ;;  %v7587_v15 = vsel %vm2416_vm14, %v7585_v19, 0  ;;  %v9758_v24 = vld [vmem:[#allocation4 + $0xa0] sm:$0xff]  }
 0xacf   :  { %v7383_v44 = vsel %vm2397_vm9, %v7382_v52, %v7381_v22  ;;  %v7517_v16 = vsel %vm2397_vm9, %v7516_v23, %v7515_v49  ;;  %v7220_v25 = vpop.f32.mrb[168].mxu1  ;;  %v7637_v49 = vsub.s32 4, %v9928_v13 }
 0xad0   :  { %v7358_v28 = vpack.c.bf16 %v7220_v25, %v7220_v25  ;;  %v9444_v42 = vpop.f32.mrb[169].mxu1  ;;  %v7260_v0 = vpop.f32.mrb[184].mxu0 }
 0xad1   :  { %v7223_v3 = vpop.f32.mrb[170].mxu1  ;;  %v7359_v33 = vpack.c.bf16 %v7260_v0, %v7260_v0  ;;  %v9452_v30 = vpop.f32.mrb[185].mxu0 }
 0xad2   :  { %v7374_v45 = vunpack.c.l.b16 %v7358_v28  ;;  %v9445_v11 = vpop.f32.mrb[171].mxu1  ;;  %v7263_v47 = vpop.f32.mrb[186].mxu0 }
 0xad3   :  { %v7375_v9 = vunpack.c.l.b16 %v7359_v33  ;;  %v9453_v27 = vpop.f32.mrb[187].mxu0 }
 0xad4   :  { %v7384_v12 = vrot.slane %v7374_v45, 4  ;;  %v7518_v37 = vrot.slane %v7374_v45, 5 }
 0xad5   :  { %v7386_v40 = vrot.slane %v7375_v9, 3  ;;  %v7520_v43 = vrot.slane %v7375_v9, 4 }
 0xad6   :  { %v7385_v5 = vsel %vm2400_vm10, %v7384_v12, %v7383_v44  ;;  %v7519_v21 = vsel %vm2400_vm10, %v7518_v37, %v7517_v16 }
 0xad7   :  { %v7387_v46 = vsel %vm2403_vm11, %v7386_v40, %v7385_v5  ;;  %v7521_v32 = vsel %vm2403_vm11, %v7520_v43, %v7519_v21  ;;  %v7300_v50 = vpop.f32.mrb[172].mxu1  ;;  %v9760_v5 = vld [vmem:[#allocation4 + $0xc0] sm:$0xff]   ;;  %v9761_v21 = vld [vmem:[#allocation4 + $0xc8] sm:$0xff]  }
 0xad8   :  { %v7360_v51 = vpack.c.bf16 %v7300_v50, %v7300_v50  ;;  %v9460_v20 = vpop.f32.mrb[173].mxu1  ;;  %v7340_v56 = vpop.f32.mrb[188].mxu0  ;;  %v7719_v50 = vsub.s32 5, %v9928_v13 }
 0xad9   :  { %v7303_v41 = vpop.f32.mrb[174].mxu1  ;;  %v7361_v54 = vpack.c.bf16 %v7340_v56, %v7340_v56  ;;  %v9468_v6 = vpop.f32.mrb[189].mxu0 }
 0xada   :  { %v7376_v17 = vunpack.c.l.b16 %v7360_v51  ;;  %v9461_v29 = vpop.f32.mrb[175].mxu1  ;;  %v7343_v18 = vpop.f32.mrb[190].mxu0 }
 0xadb   :  { %v7377_v55 = vunpack.c.l.b16 %v7361_v54  ;;  %v9469_v57 = vpop.f32.mrb[191].mxu0 }
 0xadc   :  { %v7388_v10 = vrot.slane %v7376_v17, 2  ;;  %v7522_v61 = vrot.slane %v7376_v17, 3 }
 0xadd   :  { %v7390_v39 = vrot.slane %v7377_v55, 1  ;;  %v7524_v1 = vrot.slane %v7377_v55, 2 }
 0xade   :  { %v7389_v59 = vsel %vm2406_vm12, %v7388_v10, %v7387_v46  ;;  %v7523_v60 = vsel %vm2406_vm12, %v7522_v61, %v7521_v32  ;;  %v9762_v46 = vld [vmem:[#allocation4 + $0xd0] sm:$0xff]   ;;  %v9763_v32 = vld [vmem:[#allocation4 + $0xd8] sm:$0xff]  }
 0xadf   :  { %v7391_v38 = vsel %vm2409_vm13, %v7390_v39, %v7389_v59  ;;  %v7525_v58 = vsel %vm2409_vm13, %v7524_v1, %v7523_v60 }
 0xae0   :  { %v7392_v34 = vpack.c.b16 %v7391_v38, %v7391_v38  ;;  %v7526_v8 = vpack.c.b16 %v7525_v58, %v7525_v58 }
 0xae2   :  { %v7394_v36 = vsel %vm2416_vm14, %v7392_v34, 0  ;;  %v7528_v7 = vsel %vm2416_vm14, %v7526_v8, 0 }
 0xae3   :  { %9471 = vmatpush3.bf16.msra.mxu1 %v7394_v36  ;;  %9483 = vmatpush3.bf16.msra.mxu0 %v7528_v7 }
 0xae4   :  { %9476 = vmatprep.subr.bf16.mxu1 %v9859_v63  ;;  %9488 = vmatprep.subr.bf16.mxu0 %v9859_v63 }
 0xae6   :  { %9473 = vmatmul.mubr.msk.bf16.vlgmr.msra.gmra.mrb[176].mxu1 %vm2412_vm15, %v9804_v35  ;;  %9485 = vmatmul.mubr.msk.bf16.vlgmr.msra.gmra.mrb[192].mxu0 %vm2412_vm15, %v9804_v35 }
 0xae7   :  { %9477 = vmatpush3.bf16.msra.mxu1 %v7469_v48  ;;  %9489 = vmatpush3.bf16.msra.mxu0 %v7587_v15 }
 0xae8   :  { %9478 = vmatprep.mubr.msk.bf16.mxu1 %vm9860_vm3, %v9859_v63  ;;  %9494 = vmatprep.subr.bf16.mxu1 %v9756_v26 }
 0xae9   :  { %9490 = vmatprep.mubr.msk.bf16.mxu0 %vm9860_vm3, %v9859_v63  ;;  %v9759_v63 = vld [vmem:[#allocation4 + $0xa8] sm:$0xff]   ;;  %9502 = vmatprep.subr.bf16.mxu0 %v9758_v24 }
 0xaf2   :  { %9479 = vmatmul.mubr.msk.bf16.vlgmr.msra.gmra.mrb[176].mxu1 %vm2412_vm15, %v9805_v53  ;;  %9491 = vmatmul.mubr.msk.bf16.vlgmr.msra.gmra.mrb[192].mxu0 %vm2412_vm15, %v9805_v53 }
 0xaf3   :  { %9495 = vmatpush3.bf16.msra.mxu1 %v9756_v26  ;;  %9498 = vmatprep.mubr.msk.bf16.mxu1 %vm828_vm6, %v11070_v2 }
 0xaf4   :  { %9496 = vmatprep.subr.bf16.mxu1 %v9757_v31  ;;  %9503 = vmatpush3.bf16.msra.mxu0 %v9758_v24 }
 0xaf5   :  { %9504 = vmatprep.subr.bf16.mxu0 %v9759_v63 }
 0xaf7   :  { %9497 = vmatpush3.bf16.msra.mxu1 %v9757_v31 }
 0xaf8   :  { %9505 = vmatpush3.bf16.msra.mxu0 %v9759_v63  ;;  %9510 = vmatprep.subr.bf16.mxu1 %v9760_v5 }
 0xafa   :  { %9499 = vmatmul.mubr.msk.bf16.vlgmr.msra.gmra.mrb[180].mxu1 %vm828_vm6, %v11068_v62  ;;  %v11620_v62 = vld [vmem:[%s11651_s4] sm:$0x7f] }
 0xafb   :  { %v7638_v28 = vrot.slane %v11620_v62, %v7637_v49  ;;  %9511 = vmatpush3.bf16.msra.mxu1 %v9760_v5  ;;  %v7720_v51 = vrot.slane %v11620_v62, %v7719_v50 }
 0xafc   :  { %9512 = vmatprep.subr.bf16.mxu1 %v9761_v21 }
 0xaff   :  { %9513 = vmatpush3.bf16.msra.mxu1 %v9761_v21 }
 0xb00   :  { %9514 = vmatprep.subr.bf16.mxu1 %v9762_v46 }
 0xb03   :  { %9515 = vmatpush3.bf16.msra.mxu1 %v9762_v46 }
 0xb04   :  { %9516 = vmatprep.subr.bf16.mxu1 %v9763_v32 }
 0xb07   :  { %9517 = vmatpush3.bf16.msra.mxu1 %v9763_v32 }
 0xbc5   :  { %v7505_v4 = vpop.f32.mrb[176].mxu1  ;;  %v7623_v52 = vpop.f32.mrb[192].mxu0 }
 0xbc6   :  { %v9480_v23 = vpop.f32.mrb[177].mxu1  ;;  %v9492_v22 = vpop.f32.mrb[193].mxu0 }
 0xbc7   :  { %v7508_v44 = vpop.f32.mrb[178].mxu1  ;;  %v7626_v16 = vpop.f32.mrb[194].mxu0 }
 0xbc8   :  { %v9481_v2 = vpop.f32.mrb[179].mxu1  ;;  %v9493_v25 = vpop.f32.mrb[195].mxu0 }
 0xbcd   :  { %v9500_v42 = vpop.f32.mrb[180].mxu1 }
 0xbce   :  { %v7700_v0 = vadd.f32 %v9500_v42, %v7638_v28  ;;  %v7691_v3 = vpop.f32.mrb[181].mxu1 }
 0xbcf   :  { %v7692_v33 = vadd.f32 %v7691_v3, %v7638_v28  ;;  %v9501_v30 = vpop.f32.mrb[182].mxu1 }
 0xbd0   :  { %v7708_v45 = vadd.f32 %v7700_v0, %v7623_v52  ;;  %v7703_v11 = vadd.f32 %v9501_v30, %v7638_v28  ;;  %v7694_v47 = vpop.f32.mrb[183].mxu1  ;;  %v7837_v30 = vsub.s32 6, %v9928_v13 }
 0xbd1   :  { %v7706_v9 = vadd.f32 %v7692_v33, %v7505_v4  ;;  %v7695_v27 = vadd.f32 %v7694_v47, %v7638_v28 }
 0xbd2   :  { %v7709_v12 = vadd.f32 %v7703_v11, %v7626_v16 }
 0xbd3   :  { %v7707_v37 = vadd.f32 %v7695_v27, %v7508_v44 }
 0xbd4   :  { %v7716_v40 = vpack.c.bf16 %v7709_v12, %v7708_v45  ;;  %v7838_v45 = vrot.slane %v11620_v62, %v7837_v30 }
 0xbd5   :  { %v7715_v43 = vpack.c.bf16 %v7707_v37, %v7706_v9 }
 0xbd7   :  { %9506 = vmatprep.mubr.msk.bf16.mxu0 %vm828_vm6, %v7715_v43 }
 0xbd8   :  { %9507 = vmatmul.mubr.msk.bf16.vlgmr.msra.gmra.mrb[196].mxu0 %vm828_vm6, %v7716_v40 }
 0xcab   :  { %v9508_v20 = vpop.f32.mrb[196].mxu0 }
 0xcac   :  { %v7782_v56 = vadd.f32 %v9508_v20, %v7720_v51  ;;  %v7773_v41 = vpop.f32.mrb[197].mxu0 }
 0xcad   :  { %v7774_v54 = vadd.f32 %v7773_v41, %v7720_v51  ;;  %v9509_v6 = vpop.f32.mrb[198].mxu0 }
 0xcae   :  { %v7790_v17 = vmul.f32 %v7782_v56, %v7782_v56  ;;  %v7785_v29 = vadd.f32 %v9509_v6, %v7720_v51  ;;  %v7776_v18 = vpop.f32.mrb[199].mxu0 }
 0xcaf   :  { %v7788_v55 = vmul.f32 %v7774_v54, %v7774_v54  ;;  %v7777_v57 = vadd.f32 %v7776_v18, %v7720_v51 }
 0xcb0   :  { %v7794_v10 = vmul.f32 %v7790_v17, %v7782_v56  ;;  %v7791_v61 = vmul.f32 %v7785_v29, %v7785_v29 }
 0xcb1   :  { %v7792_v39 = vmul.f32 %v7788_v55, %v7774_v54  ;;  %v7789_v1 = vmul.f32 %v7777_v57, %v7777_v57 }
 0xcb2   :  { %v7798_v59 = vmul.f32 0.044715, %v7794_v10  ;;  %v7795_v60 = vmul.f32 %v7791_v61, %v7785_v29 }
 0xcb3   :  { %v7796_v38 = vmul.f32 0.044715, %v7792_v39  ;;  %v7793_v58 = vmul.f32 %v7789_v1, %v7777_v57 }
 0xcb4   :  { %v7802_v34 = vadd.f32 %v7798_v59, %v7782_v56  ;;  %v7799_v8 = vmul.f32 0.044715, %v7795_v60 }
 0xcb5   :  { %v7800_v36 = vadd.f32 %v7796_v38, %v7774_v54  ;;  %v7797_v7 = vmul.f32 0.044715, %v7793_v58 }
 0xcb6   :  { %v7806_v14 = vmul.f32 0.7978846, %v7802_v34  ;;  %v7803_v19 = vadd.f32 %v7799_v8, %v7785_v29 }
 0xcb7   :  { %v7804_v26 = vmul.f32 0.7978846, %v7800_v36  ;;  %v7801_v35 = vadd.f32 %v7797_v7, %v7777_v57 }
 0xcb8   :  { %9788 = vtanh.f32 %v7806_v14  ;;  %v7807_v48 = vmul.f32 0.7978846, %v7803_v19 }
 0xcb9   :  { %9790 = vtanh.f32 %v7804_v26  ;;  %v7805_v15 = vmul.f32 0.7978846, %v7801_v35 }
 0xcba   :  { %9792 = vtanh.f32 %v7807_v48 }
 0xcbb   :  { %9794 = vtanh.f32 %v7805_v15 }
 0xcc2   :  { %v9789_v31 = vpop.eup %9788 }
 0xcc3   :  { %v9791_v53 = vpop.eup %9790  ;;  %v7814_v24 = vadd.f32 1.0, %v9789_v31 }
 0xcc4   :  { %v9793_v63 = vpop.eup %9792  ;;  %v7812_v4 = vadd.f32 1.0, %v9791_v53 }
 0xcc5   :  { %v9795_v52 = vpop.eup %9794  ;;  %v7818_v23 = vmul.f32 0.5, %v7814_v24  ;;  %v7815_v22 = vadd.f32 1.0, %v9793_v63 }
 0xcc6   :  { %v7816_v49 = vmul.f32 0.5, %v7812_v4  ;;  %v7813_v44 = vadd.f32 1.0, %v9795_v52 }
 0xcc7   :  { %v7819_v16 = vmul.f32 0.5, %v7815_v22  ;;  %v7822_v25 = vmul.f32 %v7818_v23, %v7782_v56 }
 0xcc8   :  { %v7817_v2 = vmul.f32 0.5, %v7813_v44  ;;  %v7820_v42 = vmul.f32 %v7816_v49, %v7774_v54 }
 0xcc9   :  { %v7823_v28 = vmul.f32 %v7819_v16, %v7785_v29 }
 0xcca   :  { %v7821_v0 = vmul.f32 %v7817_v2, %v7777_v57 }
 0xccb   :  { %v7834_v3 = vpack.c.bf16 %v7823_v28, %v7822_v25 }
 0xccc   :  { %v7833_v33 = vpack.c.bf16 %v7821_v0, %v7820_v42 }
 0xcce   :  { %9518 = vmatprep.mubr.msk.bf16.mxu1 %vm205_vm2, %v7833_v33 }
 0xccf   :  { %9519 = vmatmul.mubr.msk.bf16.vlgmr.msra.gmra.mrb[184].mxu1 %vm205_vm2, %v7834_v3 }
 0xda2   :  { %v9520_v11 = vpop.f32.mrb[184].mxu1 }
 0xda3   :  { %v7912_v47 = vadd.f32 %v9520_v11, %v7838_v45  ;;  %v7903_v9 = vpop.f32.mrb[185].mxu1 }
 0xda4   :  { %v7904_v27 = vadd.f32 %v7903_v9, %v7838_v45  ;;  %v9521_v12 = vpop.f32.mrb[186].mxu1 }
 0xda5   :  { %7920 = vst.msk [vmem:[%s11652_s5 + $0x10] sm:$0xff] %vm2412_vm15, %v7912_v47  ;;  %v7915_v37 = vadd.f32 %v9521_v12, %v7838_v45  ;;  %v7906_v40 = vpop.f32.mrb[187].mxu1 }
 0xda6   :  { %7918 = vst.msk [vmem:[%s11652_s5] sm:$0xff] %vm2412_vm15, %v7904_v27  ;;  %v7907_v13 = vadd.f32 %v7906_v40, %v7838_v45 }
 0xda7   :  { %7921 = vst.msk [vmem:[%s11652_s5 + $0x18] sm:$0xff] %vm2412_vm15, %v7915_v37 }
 0xda8   :  { %7919 = vst.msk [vmem:[%s11652_s5 + $0x8] sm:$0xff] %vm2412_vm15, %v7907_v13 }
 0xda9   :  { %7926 = vsyncpa [#allocation3], 1 }
 0xdaa   :  { %7927 = vsyncpa [#allocation5], 1 }

</bundles_post_ra>
